<compile_context>
chip_gen: v5e
topology: v5e:2x2
jax: 0.10.0
libtpu: 0.0.40
codegen_flags: <defaults>
</compile_context>

<pallas_src>
import math

import jax
import jax.numpy as jnp
from jax import lax
from jax.experimental import pallas as pl
from jax.experimental.pallas import tpu as pltpu

# Scaled-down dims (original model: n_vocab=len(words)+2, dw=600, dh=100).
N_VOCAB = 64
PAD = N_VOCAB - 1          # padding_idx = len(words) + 1 == n_vocab - 1
VOCAB_PAD = 128            # one-hot lane dim padded to a full 128-lane vreg
DW = 128                   # embedding dim
DH = 128                   # hidden dim per direction
N_CLASSES = 4
OUT_PAD = 128              # classifier padded to 128 lanes (lane-dense store)
BATCH = 8
SEQ = 8


def _vmem():
    return pl.BlockSpec(memory_space=pltpu.MemorySpace.VMEM)


# ---------------------------------------------------------------------------
# Single fused kernel: embedding -> biRNN x3 -> last step -> linear
# ---------------------------------------------------------------------------
def fused_rnn_kernel(ids_ref, emb_ref, h0_ref,
                     w1i_ref, w1h_ref, b1_ref,
                     w2i_ref, w2h_ref, b2_ref,
                     w3i_ref, w3hf_ref, w3hb_ref, b3_ref,
                     lw_ref, lb_ref,
                     out_ref,
                     y_ref, xp_ref):
    """Layouts:
      ids_ref : (T*B, 1) int32, time-major (row t*B+b <-> token[b, t]).
      emb_ref : (128, DW) bf16 embedding table, vocab padded with zero rows.
      h0_ref  : (B, 2H) f32 lane-concatenated initial hidden [h_fwd | h_bwd].
      w*i_ref : (din, 2H) bf16 = [Wih_fwd | Wih_bwd] (both directions at once).
      w1h/w2h : (2H, 2H) bf16 block-diag(Whh_fwd, Whh_bwd).
      b*_ref  : (1, 2H) f32 = [b_fwd | b_bwd] (b_ih + b_hh already summed).
      lw/lb   : (2H, 128) bf16 / (1, 128) f32, classifier padded to 128 lanes.
      y_ref   : (T*B, 2H) f32 scratch, current layer's [fwd | bwd] outputs.
      xp_ref  : (T*B, 2H) f32 scratch, hoisted input projections x@Wih + b.
      out_ref : (B, 128) f32 padded logits.
    """
    TB, H2 = y_ref.shape
    H = H2 // 2
    B = h0_ref.shape[0]
    T = TB // B
    f32, bf16 = jnp.float32, jnp.bfloat16

    def mm(a, b):
        return jnp.dot(a, b, preferred_element_type=f32)

    # ---- embedding: one-hot (padded to 128 lanes) @ bf16 table, one MXU op ----
    ids = ids_ref[...]                                            # (T*B, 1) int32
    vocab_iota = lax.broadcasted_iota(jnp.int32, (TB, emb_ref.shape[0]), 1)
    onehot = (vocab_iota == ids).astype(f32).astype(bf16)         # (T*B, 128)
    x0 = mm(onehot, emb_ref[...]).astype(bf16)                    # (T*B, DW) bf16

    def birnn_layer(wh_ref, hcat):
        """Interleaved fwd/bwd tanh-RNN chains, fully unrolled over T (small).

        Per step: one (B, 2H) @ block-diag(Whh_f, Whh_b) bf16 MXU op covers
        both directions; tanh and bias adds in f32.  Reads the hoisted input
        projections from xp_ref (fwd lanes 0:H at time i, bwd lanes H:2H at
        time T-1-i) and stores outputs lane-concatenated into y_ref with
        aligned (8,128) stores at lane offsets 0 / 128.
        """
        wh = wh_ref[...]                                          # hoisted bf16
        # TODO(synk): large T -> lax.fori_loop + pltpu.matmul_push_rhs (hold
        # Whh in MXU staging regs instead of re-streaming it every step).
        for i in range(T):                                        # static unroll
            rf, rb = i * B, (T - 1 - i) * B
            z = jnp.concatenate([xp_ref[rf:rf + B, :H],           # fwd, t = i
                                 xp_ref[rb:rb + B, H:]], axis=-1)  # bwd, t = T-1-i
            hcat = jnp.tanh(z + mm(hcat.astype(bf16), wh))        # f32 tanh
            y_ref[rf:rf + B, :H] = hcat[:, :H]
            y_ref[rb:rb + B, H:] = hcat[:, H:]
        return hcat

    # ---------------- layer 1 (input = embeddings) ----------------
    xp_ref[...] = mm(x0, w1i_ref[...]) + b1_ref[...]              # (T*B, 2H) f32
    hcat = birnn_layer(w1h_ref, h0_ref[...])

    # -------- layer 2 (input = layer-1 [fwd|bwd], one K=2H contraction) -------
    xp_ref[...] = mm(y_ref[...].astype(bf16), w2i_ref[...]) + b2_ref[...]
    hcat = birnn_layer(w2h_ref, hcat)          # overwrites y_ref (layer 1 dead)

    # ---------------- layer 3: only y[:, -1, :] is needed ----------------
    xp_ref[...] = mm(y_ref[...].astype(bf16), w3i_ref[...]) + b3_ref[...]
    hf, hb = hcat[:, :H], hcat[:, H:]
    # y[:, -1, H:] is the FIRST backward step -> one cell seeded from layer-2's
    # final backward hidden (matches the reference semantics exactly).
    r_last = (T - 1) * B
    hb = jnp.tanh(xp_ref[r_last:r_last + B, H:]
                  + mm(hb.astype(bf16), w3hb_ref[...]))
    w3hf = w3hf_ref[...]
    for i in range(T):                                            # fwd chain only
        r = i * B
        hf = jnp.tanh(xp_ref[r:r + B, :H] + mm(hf.astype(bf16), w3hf))

    # -------- final linear, 128 padded output lanes (lane-dense store) --------
    hlast = jnp.concatenate([hf, hb], axis=-1).astype(bf16)       # (B, 2H)
    out_ref[...] = mm(hlast, lw_ref[...]) + lb_ref[...]


# ---------------------------------------------------------------------------
# Wrapper: weight packing (lane-concat / block-diag / bf16) + pallas_call
# ---------------------------------------------------------------------------
def _blockdiag(a, b):
    za, zb = jnp.zeros_like(a), jnp.zeros_like(b)
    return jnp.concatenate([jnp.concatenate([a, zb], axis=1),
                            jnp.concatenate([za, b], axis=1)], axis=0)


def _vmem_budget_bytes(args, scratch_bytes):
    arg_bytes = sum(int(a.size) * a.dtype.itemsize for a in args)
    # 2x headroom for compiler temporaries / layout padding, with a safe floor.
    return max(2 * (arg_bytes + scratch_bytes) + (4 << 20), 16 << 20)


def rnn_pallas(params, x_tokens, h=None):
    """Forward pass mirroring RNN.forward (the torch Softmax is never applied)."""
    B, T = x_tokens.shape
    if h is None:
        h = jnp.zeros((2, B, DH), jnp.float32)
    hcat0 = jnp.concatenate([h[0], h[1]], axis=-1)                # (B, 2H)
    # time-major flattened ids: row t*B + b  <->  token[b, t]
    ids = jnp.transpose(x_tokens, (1, 0)).reshape(T * B, 1).astype(jnp.int32)

    bf16 = jnp.bfloat16
    emb_pad = jnp.zeros((VOCAB_PAD, DW), bf16).at[:N_VOCAB].set(
        params["emb"].astype(bf16))

    def pack_layer(p):
        wi = jnp.concatenate([p["wih_f"], p["wih_b"]], axis=1).astype(bf16)
        wh = _blockdiag(p["whh_f"], p["whh_b"]).astype(bf16)
        b = jnp.concatenate([p["b_f"], p["b_b"]], axis=1)         # stays f32
        return wi, wh, b

    w1i, w1h, b1 = pack_layer(params["rnn1"])
    w2i, w2h, b2 = pack_layer(params["rnn2"])
    p3 = params["rnn3"]
    w3i = jnp.concatenate([p3["wih_f"], p3["wih_b"]], axis=1).astype(bf16)
    w3hf = p3["whh_f"].astype(bf16)
    w3hb = p3["whh_b"].astype(bf16)
    b3 = jnp.concatenate([p3["b_f"], p3["b_b"]], axis=1)

    lw_pad = jnp.zeros((2 * DH, OUT_PAD), bf16).at[:, :N_CLASSES].set(
        params["lin_w"].astype(bf16))
    lb_pad = jnp.zeros((1, OUT_PAD), jnp.float32).at[:, :N_CLASSES].set(
        params["lin_b"])

    args = (ids, emb_pad, hcat0,
            w1i, w1h, b1, w2i, w2h, b2, w3i, w3hf, w3hb, b3,
            lw_pad, lb_pad)
    scratch_bytes = 2 * (T * B * 2 * DH * 4)

    out_pad = pl.pallas_call(
        fused_rnn_kernel,
        out_shape=jax.ShapeDtypeStruct((B, OUT_PAD), jnp.float32),
        in_specs=[_vmem()] * len(args),
        out_specs=_vmem(),
        scratch_shapes=[
            pltpu.VMEM((T * B, 2 * DH), jnp.float32),   # layer [fwd|bwd] outputs
            pltpu.VMEM((T * B, 2 * DH), jnp.float32),   # hoisted input projections
        ],
        compiler_params=pltpu.CompilerParams(
            vmem_limit_bytes=_vmem_budget_bytes(args, scratch_bytes)),
    )(*args)
    return out_pad[:, :N_CLASSES]


# ---------------------------------------------------------------------------
# Parameter init (deterministic, matches the torch module's shapes)
# ---------------------------------------------------------------------------
def init_params(key):
    keys = iter(jax.random.split(key, 32))

    def u(shape, scale):
        return jax.random.uniform(next(keys), shape, jnp.float32, -scale, scale)

    emb = jax.random.normal(next(keys), (N_VOCAB, DW), jnp.float32)
    emb = emb.at[PAD].set(0.0)                     # padding_idx row zeroed

    def rnn_layer_params(din):
        s = 1.0 / math.sqrt(DH)
        return {
            "wih_f": u((din, DH), s),
            "whh_f": u((DH, DH), s),
            "b_f": u((1, DH), s) + u((1, DH), s),  # b_ih + b_hh (forward)
            "wih_b": u((din, DH), s),
            "whh_b": u((DH, DH), s),
            "b_b": u((1, DH), s) + u((1, DH), s),  # b_ih + b_hh (backward)
        }

    s_lin = 1.0 / math.sqrt(2 * DH)
    return {
        "emb": emb,
        "rnn1": rnn_layer_params(DW),
        "rnn2": rnn_layer_params(2 * DH),
        "rnn3": rnn_layer_params(2 * DH),
        "lin_w": u((2 * DH, N_CLASSES), s_lin),
        "lin_b": u((1, N_CLASSES), s_lin),
    }


# ---------------------------------------------------------------------------
# Plain-JAX reference (full f32, HIGHEST precision) for the self-check
# ---------------------------------------------------------------------------
def rnn_reference(params, x_tokens, h=None):
    B, T = x_tokens.shape
    x = jnp.take(params["emb"], x_tokens, axis=0)          # (B, T, DW)
    if h is None:
        h = jnp.zeros((2, B, DH), jnp.float32)

    def dot(a, b):
        return jnp.dot(a, b, precision=lax.Precision.HIGHEST)

    def layer(x_btd, p, h0):
        hf, hb = h0[0], h0[1]
        yf, yb = [None] * T, [None] * T
        for t in range(T):
            hf = jnp.tanh(dot(x_btd[:, t], p["wih_f"]) + dot(hf, p["whh_f"]) + p["b_f"])
            yf[t] = hf
        for t in range(T - 1, -1, -1):
            hb = jnp.tanh(dot(x_btd[:, t], p["wih_b"]) + dot(hb, p["whh_b"]) + p["b_b"])
            yb[t] = hb
        y = jnp.stack([jnp.concatenate([yf[t], yb[t]], axis=-1) for t in range(T)], axis=1)
        return y, jnp.stack([hf, hb])

    y, h = layer(x, params["rnn1"], h)
    y, h = layer(y, params["rnn2"], h)
    y, h = layer(y, params["rnn3"], h)
    return dot(y[:, -1, :], params["lin_w"]) + params["lin_b"]


if __name__ == "__main__":
    root = jax.random.PRNGKey(0)
    k_params, k_tokens = jax.random.split(root)
    params = init_params(k_params)

    x_tokens = jax.random.randint(k_tokens, (BATCH, SEQ), 0, N_VOCAB,
                                  dtype=jnp.int32)
    x_tokens = x_tokens.at[0, -2:].set(PAD)       # padded tail, like a real batch
    # torch Embedding would raise on out-of-range ids; the one-hot gather maps
    # them to zero vectors, so validate here.
    assert int(x_tokens.min()) >= 0 and int(x_tokens.max()) < N_VOCAB

    logits = jax.jit(rnn_pallas)(params, x_tokens)
    jax.block_until_ready(logits)
    assert logits.shape == (BATCH, N_CLASSES)

    ref = jax.jit(rnn_reference)(params, x_tokens)
    ref = jax.block_until_ready(ref)
    # Kernel uses bf16 MXU operands (f32 accumulation) across a 3-layer serial
    # tanh chain vs. the f32 HIGHEST-precision reference; observed error is
    # ~1e-2 scale, tolerance kept with margin.
    max_diff = float(jnp.max(jnp.abs(logits - ref)))
    assert max_diff < 7.5e-2, f"mismatch vs reference, max |diff| = {max_diff}"

    print("KERNEL_OK")
</pallas_src>

<mosaic_0001>
module attributes {stable_mosaic.version = 11 : i64} {
  func.func @fused_rnn_kernel(%arg0: memref<64x1xi32, #tpu.memory_space<vmem>>, %arg1: memref<128x128xbf16, #tpu.memory_space<vmem>>, %arg2: memref<8x256xf32, #tpu.memory_space<vmem>>, %arg3: memref<128x256xbf16, #tpu.memory_space<vmem>>, %arg4: memref<256x256xbf16, #tpu.memory_space<vmem>>, %arg5: memref<1x256xf32, #tpu.memory_space<vmem>>, %arg6: memref<256x256xbf16, #tpu.memory_space<vmem>>, %arg7: memref<256x256xbf16, #tpu.memory_space<vmem>>, %arg8: memref<1x256xf32, #tpu.memory_space<vmem>>, %arg9: memref<256x256xbf16, #tpu.memory_space<vmem>>, %arg10: memref<128x128xbf16, #tpu.memory_space<vmem>>, %arg11: memref<128x128xbf16, #tpu.memory_space<vmem>>, %arg12: memref<1x256xf32, #tpu.memory_space<vmem>>, %arg13: memref<256x128xbf16, #tpu.memory_space<vmem>>, %arg14: memref<1x128xf32, #tpu.memory_space<vmem>>, %arg15: memref<8x128xf32, #tpu.memory_space<vmem>>, %arg16: memref<64x256xf32, #tpu.memory_space<vmem>>, %arg17: memref<64x256xf32, #tpu.memory_space<vmem>>) attributes {dimension_semantics = [], scalar_prefetch = 0 : i64, scratch_operands = 2 : i64, tpu.core_type = #tpu.core_type<tc>} {
    %c0 = arith.constant 0 : index
    %c0_0 = arith.constant 0 : index
    %0 = vector.load %arg0[%c0, %c0_0] : memref<64x1xi32, #tpu.memory_space<vmem>>, vector<64x1xi32>
    %1 = tpu.iota {dimensions = array<i32: 1>} : vector<64x128xi32>
    %2 = vector.broadcast %0 : vector<64x1xi32> to vector<64x128xi32>
    %3 = arith.cmpi eq, %1, %2 : vector<64x128xi32>
    %4 = arith.extui %3 : vector<64x128xi1> to vector<64x128xi32>
    %5 = arith.sitofp %4 : vector<64x128xi32> to vector<64x128xf32>
    %6 = arith.truncf %5 : vector<64x128xf32> to vector<64x128xbf16>
    %c0_1 = arith.constant 0 : index
    %c0_2 = arith.constant 0 : index
    %7 = vector.load %arg1[%c0_1, %c0_2] : memref<128x128xbf16, #tpu.memory_space<vmem>>, vector<128x128xbf16>
    %cst = arith.constant dense<0.000000e+00> : vector<64x128xf32>
    %8 = tpu.matmul %6, %7, %cst {dimension_numbers = #tpu.dot_dimension_numbers<[1], [0], [0], [1], [0, 0, 1, 1], [], []>} : vector<64x128xbf16>, vector<128x128xbf16>, vector<64x128xf32> -> vector<64x128xf32>
    %9 = arith.truncf %8 : vector<64x128xf32> to vector<64x128xbf16>
    %c0_3 = arith.constant 0 : index
    %c0_4 = arith.constant 0 : index
    %10 = vector.load %arg3[%c0_3, %c0_4] : memref<128x256xbf16, #tpu.memory_space<vmem>>, vector<128x256xbf16>
    %cst_5 = arith.constant dense<0.000000e+00> : vector<64x256xf32>
    %11 = tpu.matmul %9, %10, %cst_5 {dimension_numbers = #tpu.dot_dimension_numbers<[1], [0], [0], [1], [0, 0, 1, 1], [], []>} : vector<64x128xbf16>, vector<128x256xbf16>, vector<64x256xf32> -> vector<64x256xf32>
    %c0_6 = arith.constant 0 : index
    %c0_7 = arith.constant 0 : index
    %12 = vector.load %arg5[%c0_6, %c0_7] : memref<1x256xf32, #tpu.memory_space<vmem>>, vector<1x256xf32>
    %13 = vector.broadcast %12 : vector<1x256xf32> to vector<64x256xf32>
    %14 = arith.addf %11, %13 : vector<64x256xf32>
    %c0_8 = arith.constant 0 : index
    %c0_9 = arith.constant 0 : index
    %15 = vector.load %arg17[%c0_8, %c0_9] : memref<64x256xf32, #tpu.memory_space<vmem>>, vector<64x256xf32>
    tpu.vector_store %arg17[%c0_8, %c0_9], %14 {strides = array<i32>} : memref<64x256xf32, #tpu.memory_space<vmem>>, vector<64x256xf32>,
    %c0_10 = arith.constant 0 : index
    %c0_11 = arith.constant 0 : index
    %16 = vector.load %arg2[%c0_10, %c0_11] : memref<8x256xf32, #tpu.memory_space<vmem>>, vector<8x256xf32>
    %c0_12 = arith.constant 0 : index
    %c0_13 = arith.constant 0 : index
    %17 = vector.load %arg4[%c0_12, %c0_13] : memref<256x256xbf16, #tpu.memory_space<vmem>>, vector<256x256xbf16>
    %c0_14 = arith.constant 0 : index
    %c0_15 = arith.constant 0 : index
    %18 = vector.load %arg17[%c0_14, %c0_15] : memref<64x256xf32, #tpu.memory_space<vmem>>, vector<8x128xf32>
    %c56 = arith.constant 56 : index
    %c128 = arith.constant 128 : index
    %19 = vector.load %arg17[%c56, %c128] : memref<64x256xf32, #tpu.memory_space<vmem>>, vector<8x128xf32>
    %20 = tpu.concatenate %18, %19 in 1 : vector<8x128xf32>, vector<8x128xf32> -> vector<8x256xf32>
    %21 = arith.truncf %16 : vector<8x256xf32> to vector<8x256xbf16>
    %cst_16 = arith.constant dense<0.000000e+00> : vector<8x256xf32>
    %22 = tpu.matmul %21, %17, %cst_16 {dimension_numbers = #tpu.dot_dimension_numbers<[1], [0], [0], [1], [0, 0, 1, 1], [], []>} : vector<8x256xbf16>, vector<256x256xbf16>, vector<8x256xf32> -> vector<8x256xf32>
    %23 = arith.addf %20, %22 : vector<8x256xf32>
    %24 = math.tanh %23 : vector<8x256xf32>
    %25 = vector.extract_strided_slice %24 {offsets = [0, 0], sizes = [8, 128], strides = [1, 1]} : vector<8x256xf32> to vector<8x128xf32>
    %c0_17 = arith.constant 0 : index
    %c0_18 = arith.constant 0 : index
    %26 = vector.load %arg16[%c0_17, %c0_18] : memref<64x256xf32, #tpu.memory_space<vmem>>, vector<8x128xf32>
    tpu.vector_store %arg16[%c0_17, %c0_18], %25 {strides = array<i32>} : memref<64x256xf32, #tpu.memory_space<vmem>>, vector<8x128xf32>,
    %27 = vector.extract_strided_slice %24 {offsets = [0, 128], sizes = [8, 128], strides = [1, 1]} : vector<8x256xf32> to vector<8x128xf32>
    %c56_19 = arith.constant 56 : index
    %c128_20 = arith.constant 128 : index
    %28 = vector.load %arg16[%c56_19, %c128_20] : memref<64x256xf32, #tpu.memory_space<vmem>>, vector<8x128xf32>
    tpu.vector_store %arg16[%c56_19, %c128_20], %27 {strides = array<i32>} : memref<64x256xf32, #tpu.memory_space<vmem>>, vector<8x128xf32>,
    %c8 = arith.constant 8 : index
    %c0_21 = arith.constant 0 : index
    %29 = vector.load %arg17[%c8, %c0_21] : memref<64x256xf32, #tpu.memory_space<vmem>>, vector<8x128xf32>
    %c48 = arith.constant 48 : index
    %c128_22 = arith.constant 128 : index
    %30 = vector.load %arg17[%c48, %c128_22] : memref<64x256xf32, #tpu.memory_space<vmem>>, vector<8x128xf32>
    %31 = tpu.concatenate %29, %30 in 1 : vector<8x128xf32>, vector<8x128xf32> -> vector<8x256xf32>
    %32 = arith.truncf %24 : vector<8x256xf32> to vector<8x256xbf16>
    %cst_23 = arith.constant dense<0.000000e+00> : vector<8x256xf32>
    %33 = tpu.matmul %32, %17, %cst_23 {dimension_numbers = #tpu.dot_dimension_numbers<[1], [0], [0], [1], [0, 0, 1, 1], [], []>} : vector<8x256xbf16>, vector<256x256xbf16>, vector<8x256xf32> -> vector<8x256xf32>
    %34 = arith.addf %31, %33 : vector<8x256xf32>
    %35 = math.tanh %34 : vector<8x256xf32>
    %36 = vector.extract_strided_slice %35 {offsets = [0, 0], sizes = [8, 128], strides = [1, 1]} : vector<8x256xf32> to vector<8x128xf32>
    %c8_24 = arith.constant 8 : index
    %c0_25 = arith.constant 0 : index
    %37 = vector.load %arg16[%c8_24, %c0_25] : memref<64x256xf32, #tpu.memory_space<vmem>>, vector<8x128xf32>
    tpu.vector_store %arg16[%c8_24, %c0_25], %36 {strides = array<i32>} : memref<64x256xf32, #tpu.memory_space<vmem>>, vector<8x128xf32>,
    %38 = vector.extract_strided_slice %35 {offsets = [0, 128], sizes = [8, 128], strides = [1, 1]} : vector<8x256xf32> to vector<8x128xf32>
    %c48_26 = arith.constant 48 : index
    %c128_27 = arith.constant 128 : index
    %39 = vector.load %arg16[%c48_26, %c128_27] : memref<64x256xf32, #tpu.memory_space<vmem>>, vector<8x128xf32>
    tpu.vector_store %arg16[%c48_26, %c128_27], %38 {strides = array<i32>} : memref<64x256xf32, #tpu.memory_space<vmem>>, vector<8x128xf32>,
    %c16 = arith.constant 16 : index
    %c0_28 = arith.constant 0 : index
    %40 = vector.load %arg17[%c16, %c0_28] : memref<64x256xf32, #tpu.memory_space<vmem>>, vector<8x128xf32>
    %c40 = arith.constant 40 : index
    %c128_29 = arith.constant 128 : index
    %41 = vector.load %arg17[%c40, %c128_29] : memref<64x256xf32, #tpu.memory_space<vmem>>, vector<8x128xf32>
    %42 = tpu.concatenate %40, %41 in 1 : vector<8x128xf32>, vector<8x128xf32> -> vector<8x256xf32>
    %43 = arith.truncf %35 : vector<8x256xf32> to vector<8x256xbf16>
    %cst_30 = arith.constant dense<0.000000e+00> : vector<8x256xf32>
    %44 = tpu.matmul %43, %17, %cst_30 {dimension_numbers = #tpu.dot_dimension_numbers<[1], [0], [0], [1], [0, 0, 1, 1], [], []>} : vector<8x256xbf16>, vector<256x256xbf16>, vector<8x256xf32> -> vector<8x256xf32>
    %45 = arith.addf %42, %44 : vector<8x256xf32>
    %46 = math.tanh %45 : vector<8x256xf32>
    %47 = vector.extract_strided_slice %46 {offsets = [0, 0], sizes = [8, 128], strides = [1, 1]} : vector<8x256xf32> to vector<8x128xf32>
    %c16_31 = arith.constant 16 : index
    %c0_32 = arith.constant 0 : index
    %48 = vector.load %arg16[%c16_31, %c0_32] : memref<64x256xf32, #tpu.memory_space<vmem>>, vector<8x128xf32>
    tpu.vector_store %arg16[%c16_31, %c0_32], %47 {strides = array<i32>} : memref<64x256xf32, #tpu.memory_space<vmem>>, vector<8x128xf32>,
    %49 = vector.extract_strided_slice %46 {offsets = [0, 128], sizes = [8, 128], strides = [1, 1]} : vector<8x256xf32> to vector<8x128xf32>
    %c40_33 = arith.constant 40 : index
    %c128_34 = arith.constant 128 : index
    %50 = vector.load %arg16[%c40_33, %c128_34] : memref<64x256xf32, #tpu.memory_space<vmem>>, vector<8x128xf32>
    tpu.vector_store %arg16[%c40_33, %c128_34], %49 {strides = array<i32>} : memref<64x256xf32, #tpu.memory_space<vmem>>, vector<8x128xf32>,
    %c24 = arith.constant 24 : index
    %c0_35 = arith.constant 0 : index
    %51 = vector.load %arg17[%c24, %c0_35] : memref<64x256xf32, #tpu.memory_space<vmem>>, vector<8x128xf32>
    %c32 = arith.constant 32 : index
    %c128_36 = arith.constant 128 : index
    %52 = vector.load %arg17[%c32, %c128_36] : memref<64x256xf32, #tpu.memory_space<vmem>>, vector<8x128xf32>
    %53 = tpu.concatenate %51, %52 in 1 : vector<8x128xf32>, vector<8x128xf32> -> vector<8x256xf32>
    %54 = arith.truncf %46 : vector<8x256xf32> to vector<8x256xbf16>
    %cst_37 = arith.constant dense<0.000000e+00> : vector<8x256xf32>
    %55 = tpu.matmul %54, %17, %cst_37 {dimension_numbers = #tpu.dot_dimension_numbers<[1], [0], [0], [1], [0, 0, 1, 1], [], []>} : vector<8x256xbf16>, vector<256x256xbf16>, vector<8x256xf32> -> vector<8x256xf32>
    %56 = arith.addf %53, %55 : vector<8x256xf32>
    %57 = math.tanh %56 : vector<8x256xf32>
    %58 = vector.extract_strided_slice %57 {offsets = [0, 0], sizes = [8, 128], strides = [1, 1]} : vector<8x256xf32> to vector<8x128xf32>
    %c24_38 = arith.constant 24 : index
    %c0_39 = arith.constant 0 : index
    %59 = vector.load %arg16[%c24_38, %c0_39] : memref<64x256xf32, #tpu.memory_space<vmem>>, vector<8x128xf32>
    tpu.vector_store %arg16[%c24_38, %c0_39], %58 {strides = array<i32>} : memref<64x256xf32, #tpu.memory_space<vmem>>, vector<8x128xf32>,
    %60 = vector.extract_strided_slice %57 {offsets = [0, 128], sizes = [8, 128], strides = [1, 1]} : vector<8x256xf32> to vector<8x128xf32>
    %c32_40 = arith.constant 32 : index
    %c128_41 = arith.constant 128 : index
    %61 = vector.load %arg16[%c32_40, %c128_41] : memref<64x256xf32, #tpu.memory_space<vmem>>, vector<8x128xf32>
    tpu.vector_store %arg16[%c32_40, %c128_41], %60 {strides = array<i32>} : memref<64x256xf32, #tpu.memory_space<vmem>>, vector<8x128xf32>,
    %c32_42 = arith.constant 32 : index
    %c0_43 = arith.constant 0 : index
    %62 = vector.load %arg17[%c32_42, %c0_43] : memref<64x256xf32, #tpu.memory_space<vmem>>, vector<8x128xf32>
    %c24_44 = arith.constant 24 : index
    %c128_45 = arith.constant 128 : index
    %63 = vector.load %arg17[%c24_44, %c128_45] : memref<64x256xf32, #tpu.memory_space<vmem>>, vector<8x128xf32>
    %64 = tpu.concatenate %62, %63 in 1 : vector<8x128xf32>, vector<8x128xf32> -> vector<8x256xf32>
    %65 = arith.truncf %57 : vector<8x256xf32> to vector<8x256xbf16>
    %cst_46 = arith.constant dense<0.000000e+00> : vector<8x256xf32>
    %66 = tpu.matmul %65, %17, %cst_46 {dimension_numbers = #tpu.dot_dimension_numbers<[1], [0], [0], [1], [0, 0, 1, 1], [], []>} : vector<8x256xbf16>, vector<256x256xbf16>, vector<8x256xf32> -> vector<8x256xf32>
    %67 = arith.addf %64, %66 : vector<8x256xf32>
    %68 = math.tanh %67 : vector<8x256xf32>
    %69 = vector.extract_strided_slice %68 {offsets = [0, 0], sizes = [8, 128], strides = [1, 1]} : vector<8x256xf32> to vector<8x128xf32>
    %c32_47 = arith.constant 32 : index
    %c0_48 = arith.constant 0 : index
    %70 = vector.load %arg16[%c32_47, %c0_48] : memref<64x256xf32, #tpu.memory_space<vmem>>, vector<8x128xf32>
    tpu.vector_store %arg16[%c32_47, %c0_48], %69 {strides = array<i32>} : memref<64x256xf32, #tpu.memory_space<vmem>>, vector<8x128xf32>,
    %71 = vector.extract_strided_slice %68 {offsets = [0, 128], sizes = [8, 128], strides = [1, 1]} : vector<8x256xf32> to vector<8x128xf32>
    %c24_49 = arith.constant 24 : index
    %c128_50 = arith.constant 128 : index
    %72 = vector.load %arg16[%c24_49, %c128_50] : memref<64x256xf32, #tpu.memory_space<vmem>>, vector<8x128xf32>
    tpu.vector_store %arg16[%c24_49, %c128_50], %71 {strides = array<i32>} : memref<64x256xf32, #tpu.memory_space<vmem>>, vector<8x128xf32>,
    %c40_51 = arith.constant 40 : index
    %c0_52 = arith.constant 0 : index
    %73 = vector.load %arg17[%c40_51, %c0_52] : memref<64x256xf32, #tpu.memory_space<vmem>>, vector<8x128xf32>
    %c16_53 = arith.constant 16 : index
    %c128_54 = arith.constant 128 : index
    %74 = vector.load %arg17[%c16_53, %c128_54] : memref<64x256xf32, #tpu.memory_space<vmem>>, vector<8x128xf32>
    %75 = tpu.concatenate %73, %74 in 1 : vector<8x128xf32>, vector<8x128xf32> -> vector<8x256xf32>
    %76 = arith.truncf %68 : vector<8x256xf32> to vector<8x256xbf16>
    %cst_55 = arith.constant dense<0.000000e+00> : vector<8x256xf32>
    %77 = tpu.matmul %76, %17, %cst_55 {dimension_numbers = #tpu.dot_dimension_numbers<[1], [0], [0], [1], [0, 0, 1, 1], [], []>} : vector<8x256xbf16>, vector<256x256xbf16>, vector<8x256xf32> -> vector<8x256xf32>
    %78 = arith.addf %75, %77 : vector<8x256xf32>
    %79 = math.tanh %78 : vector<8x256xf32>
    %80 = vector.extract_strided_slice %79 {offsets = [0, 0], sizes = [8, 128], strides = [1, 1]} : vector<8x256xf32> to vector<8x128xf32>
    %c40_56 = arith.constant 40 : index
    %c0_57 = arith.constant 0 : index
    %81 = vector.load %arg16[%c40_56, %c0_57] : memref<64x256xf32, #tpu.memory_space<vmem>>, vector<8x128xf32>
    tpu.vector_store %arg16[%c40_56, %c0_57], %80 {strides = array<i32>} : memref<64x256xf32, #tpu.memory_space<vmem>>, vector<8x128xf32>,
    %82 = vector.extract_strided_slice %79 {offsets = [0, 128], sizes = [8, 128], strides = [1, 1]} : vector<8x256xf32> to vector<8x128xf32>
    %c16_58 = arith.constant 16 : index
    %c128_59 = arith.constant 128 : index
    %83 = vector.load %arg16[%c16_58, %c128_59] : memref<64x256xf32, #tpu.memory_space<vmem>>, vector<8x128xf32>
    tpu.vector_store %arg16[%c16_58, %c128_59], %82 {strides = array<i32>} : memref<64x256xf32, #tpu.memory_space<vmem>>, vector<8x128xf32>,
    %c48_60 = arith.constant 48 : index
    %c0_61 = arith.constant 0 : index
    %84 = vector.load %arg17[%c48_60, %c0_61] : memref<64x256xf32, #tpu.memory_space<vmem>>, vector<8x128xf32>
    %c8_62 = arith.constant 8 : index
    %c128_63 = arith.constant 128 : index
    %85 = vector.load %arg17[%c8_62, %c128_63] : memref<64x256xf32, #tpu.memory_space<vmem>>, vector<8x128xf32>
    %86 = tpu.concatenate %84, %85 in 1 : vector<8x128xf32>, vector<8x128xf32> -> vector<8x256xf32>
    %87 = arith.truncf %79 : vector<8x256xf32> to vector<8x256xbf16>
    %cst_64 = arith.constant dense<0.000000e+00> : vector<8x256xf32>
    %88 = tpu.matmul %87, %17, %cst_64 {dimension_numbers = #tpu.dot_dimension_numbers<[1], [0], [0], [1], [0, 0, 1, 1], [], []>} : vector<8x256xbf16>, vector<256x256xbf16>, vector<8x256xf32> -> vector<8x256xf32>
    %89 = arith.addf %86, %88 : vector<8x256xf32>
    %90 = math.tanh %89 : vector<8x256xf32>
    %91 = vector.extract_strided_slice %90 {offsets = [0, 0], sizes = [8, 128], strides = [1, 1]} : vector<8x256xf32> to vector<8x128xf32>
    %c48_65 = arith.constant 48 : index
    %c0_66 = arith.constant 0 : index
    %92 = vector.load %arg16[%c48_65, %c0_66] : memref<64x256xf32, #tpu.memory_space<vmem>>, vector<8x128xf32>
    tpu.vector_store %arg16[%c48_65, %c0_66], %91 {strides = array<i32>} : memref<64x256xf32, #tpu.memory_space<vmem>>, vector<8x128xf32>,
    %93 = vector.extract_strided_slice %90 {offsets = [0, 128], sizes = [8, 128], strides = [1, 1]} : vector<8x256xf32> to vector<8x128xf32>
    %c8_67 = arith.constant 8 : index
    %c128_68 = arith.constant 128 : index
    %94 = vector.load %arg16[%c8_67, %c128_68] : memref<64x256xf32, #tpu.memory_space<vmem>>, vector<8x128xf32>
    tpu.vector_store %arg16[%c8_67, %c128_68], %93 {strides = array<i32>} : memref<64x256xf32, #tpu.memory_space<vmem>>, vector<8x128xf32>,
    %c56_69 = arith.constant 56 : index
    %c0_70 = arith.constant 0 : index
    %95 = vector.load %arg17[%c56_69, %c0_70] : memref<64x256xf32, #tpu.memory_space<vmem>>, vector<8x128xf32>
    %c0_71 = arith.constant 0 : index
    %c128_72 = arith.constant 128 : index
    %96 = vector.load %arg17[%c0_71, %c128_72] : memref<64x256xf32, #tpu.memory_space<vmem>>, vector<8x128xf32>
    %97 = tpu.concatenate %95, %96 in 1 : vector<8x128xf32>, vector<8x128xf32> -> vector<8x256xf32>
    %98 = arith.truncf %90 : vector<8x256xf32> to vector<8x256xbf16>
    %cst_73 = arith.constant dense<0.000000e+00> : vector<8x256xf32>
    %99 = tpu.matmul %98, %17, %cst_73 {dimension_numbers = #tpu.dot_dimension_numbers<[1], [0], [0], [1], [0, 0, 1, 1], [], []>} : vector<8x256xbf16>, vector<256x256xbf16>, vector<8x256xf32> -> vector<8x256xf32>
    %100 = arith.addf %97, %99 : vector<8x256xf32>
    %101 = math.tanh %100 : vector<8x256xf32>
    %102 = vector.extract_strided_slice %101 {offsets = [0, 0], sizes = [8, 128], strides = [1, 1]} : vector<8x256xf32> to vector<8x128xf32>
    %c56_74 = arith.constant 56 : index
    %c0_75 = arith.constant 0 : index
    %103 = vector.load %arg16[%c56_74, %c0_75] : memref<64x256xf32, #tpu.memory_space<vmem>>, vector<8x128xf32>
    tpu.vector_store %arg16[%c56_74, %c0_75], %102 {strides = array<i32>} : memref<64x256xf32, #tpu.memory_space<vmem>>, vector<8x128xf32>,
    %104 = vector.extract_strided_slice %101 {offsets = [0, 128], sizes = [8, 128], strides = [1, 1]} : vector<8x256xf32> to vector<8x128xf32>
    %c0_76 = arith.constant 0 : index
    %c128_77 = arith.constant 128 : index
    %105 = vector.load %arg16[%c0_76, %c128_77] : memref<64x256xf32, #tpu.memory_space<vmem>>, vector<8x128xf32>
    tpu.vector_store %arg16[%c0_76, %c128_77], %104 {strides = array<i32>} : memref<64x256xf32, #tpu.memory_space<vmem>>, vector<8x128xf32>,
    %c0_78 = arith.constant 0 : index
    %c0_79 = arith.constant 0 : index
    %106 = vector.load %arg16[%c0_78, %c0_79] : memref<64x256xf32, #tpu.memory_space<vmem>>, vector<64x256xf32>
    %107 = arith.truncf %106 : vector<64x256xf32> to vector<64x256xbf16>
    %c0_80 = arith.constant 0 : index
    %c0_81 = arith.constant 0 : index
    %108 = vector.load %arg6[%c0_80, %c0_81] : memref<256x256xbf16, #tpu.memory_space<vmem>>, vector<256x256xbf16>
    %cst_82 = arith.constant dense<0.000000e+00> : vector<64x256xf32>
    %109 = tpu.matmul %107, %108, %cst_82 {dimension_numbers = #tpu.dot_dimension_numbers<[1], [0], [0], [1], [0, 0, 1, 1], [], []>} : vector<64x256xbf16>, vector<256x256xbf16>, vector<64x256xf32> -> vector<64x256xf32>
    %c0_83 = arith.constant 0 : index
    %c0_84 = arith.constant 0 : index
    %110 = vector.load %arg8[%c0_83, %c0_84] : memref<1x256xf32, #tpu.memory_space<vmem>>, vector<1x256xf32>
    %111 = vector.broadcast %110 : vector<1x256xf32> to vector<64x256xf32>
    %112 = arith.addf %109, %111 : vector<64x256xf32>
    %c0_85 = arith.constant 0 : index
    %c0_86 = arith.constant 0 : index
    %113 = vector.load %arg17[%c0_85, %c0_86] : memref<64x256xf32, #tpu.memory_space<vmem>>, vector<64x256xf32>
    tpu.vector_store %arg17[%c0_85, %c0_86], %112 {strides = array<i32>} : memref<64x256xf32, #tpu.memory_space<vmem>>, vector<64x256xf32>,
    %c0_87 = arith.constant 0 : index
    %c0_88 = arith.constant 0 : index
    %114 = vector.load %arg7[%c0_87, %c0_88] : memref<256x256xbf16, #tpu.memory_space<vmem>>, vector<256x256xbf16>
    %c0_89 = arith.constant 0 : index
    %c0_90 = arith.constant 0 : index
    %115 = vector.load %arg17[%c0_89, %c0_90] : memref<64x256xf32, #tpu.memory_space<vmem>>, vector<8x128xf32>
    %c56_91 = arith.constant 56 : index
    %c128_92 = arith.constant 128 : index
    %116 = vector.load %arg17[%c56_91, %c128_92] : memref<64x256xf32, #tpu.memory_space<vmem>>, vector<8x128xf32>
    %117 = tpu.concatenate %115, %116 in 1 : vector<8x128xf32>, vector<8x128xf32> -> vector<8x256xf32>
    %118 = arith.truncf %101 : vector<8x256xf32> to vector<8x256xbf16>
    %cst_93 = arith.constant dense<0.000000e+00> : vector<8x256xf32>
    %119 = tpu.matmul %118, %114, %cst_93 {dimension_numbers = #tpu.dot_dimension_numbers<[1], [0], [0], [1], [0, 0, 1, 1], [], []>} : vector<8x256xbf16>, vector<256x256xbf16>, vector<8x256xf32> -> vector<8x256xf32>
    %120 = arith.addf %117, %119 : vector<8x256xf32>
    %121 = math.tanh %120 : vector<8x256xf32>
    %122 = vector.extract_strided_slice %121 {offsets = [0, 0], sizes = [8, 128], strides = [1, 1]} : vector<8x256xf32> to vector<8x128xf32>
    %c0_94 = arith.constant 0 : index
    %c0_95 = arith.constant 0 : index
    %123 = vector.load %arg16[%c0_94, %c0_95] : memref<64x256xf32, #tpu.memory_space<vmem>>, vector<8x128xf32>
    tpu.vector_store %arg16[%c0_94, %c0_95], %122 {strides = array<i32>} : memref<64x256xf32, #tpu.memory_space<vmem>>, vector<8x128xf32>,
    %124 = vector.extract_strided_slice %121 {offsets = [0, 128], sizes = [8, 128], strides = [1, 1]} : vector<8x256xf32> to vector<8x128xf32>
    %c56_96 = arith.constant 56 : index
    %c128_97 = arith.constant 128 : index
    %125 = vector.load %arg16[%c56_96, %c128_97] : memref<64x256xf32, #tpu.memory_space<vmem>>, vector<8x128xf32>
    tpu.vector_store %arg16[%c56_96, %c128_97], %124 {strides = array<i32>} : memref<64x256xf32, #tpu.memory_space<vmem>>, vector<8x128xf32>,
    %c8_98 = arith.constant 8 : index
    %c0_99 = arith.constant 0 : index
    %126 = vector.load %arg17[%c8_98, %c0_99] : memref<64x256xf32, #tpu.memory_space<vmem>>, vector<8x128xf32>
    %c48_100 = arith.constant 48 : index
    %c128_101 = arith.constant 128 : index
    %127 = vector.load %arg17[%c48_100, %c128_101] : memref<64x256xf32, #tpu.memory_space<vmem>>, vector<8x128xf32>
    %128 = tpu.concatenate %126, %127 in 1 : vector<8x128xf32>, vector<8x128xf32> -> vector<8x256xf32>
    %129 = arith.truncf %121 : vector<8x256xf32> to vector<8x256xbf16>
    %cst_102 = arith.constant dense<0.000000e+00> : vector<8x256xf32>
    %130 = tpu.matmul %129, %114, %cst_102 {dimension_numbers = #tpu.dot_dimension_numbers<[1], [0], [0], [1], [0, 0, 1, 1], [], []>} : vector<8x256xbf16>, vector<256x256xbf16>, vector<8x256xf32> -> vector<8x256xf32>
    %131 = arith.addf %128, %130 : vector<8x256xf32>
    %132 = math.tanh %131 : vector<8x256xf32>
    %133 = vector.extract_strided_slice %132 {offsets = [0, 0], sizes = [8, 128], strides = [1, 1]} : vector<8x256xf32> to vector<8x128xf32>
    %c8_103 = arith.constant 8 : index
    %c0_104 = arith.constant 0 : index
    %134 = vector.load %arg16[%c8_103, %c0_104] : memref<64x256xf32, #tpu.memory_space<vmem>>, vector<8x128xf32>
    tpu.vector_store %arg16[%c8_103, %c0_104], %133 {strides = array<i32>} : memref<64x256xf32, #tpu.memory_space<vmem>>, vector<8x128xf32>,
    %135 = vector.extract_strided_slice %132 {offsets = [0, 128], sizes = [8, 128], strides = [1, 1]} : vector<8x256xf32> to vector<8x128xf32>
    %c48_105 = arith.constant 48 : index
    %c128_106 = arith.constant 128 : index
    %136 = vector.load %arg16[%c48_105, %c128_106] : memref<64x256xf32, #tpu.memory_space<vmem>>, vector<8x128xf32>
    tpu.vector_store %arg16[%c48_105, %c128_106], %135 {strides = array<i32>} : memref<64x256xf32, #tpu.memory_space<vmem>>, vector<8x128xf32>,
    %c16_107 = arith.constant 16 : index
    %c0_108 = arith.constant 0 : index
    %137 = vector.load %arg17[%c16_107, %c0_108] : memref<64x256xf32, #tpu.memory_space<vmem>>, vector<8x128xf32>
    %c40_109 = arith.constant 40 : index
    %c128_110 = arith.constant 128 : index
    %138 = vector.load %arg17[%c40_109, %c128_110] : memref<64x256xf32, #tpu.memory_space<vmem>>, vector<8x128xf32>
    %139 = tpu.concatenate %137, %138 in 1 : vector<8x128xf32>, vector<8x128xf32> -> vector<8x256xf32>
    %140 = arith.truncf %132 : vector<8x256xf32> to vector<8x256xbf16>
    %cst_111 = arith.constant dense<0.000000e+00> : vector<8x256xf32>
    %141 = tpu.matmul %140, %114, %cst_111 {dimension_numbers = #tpu.dot_dimension_numbers<[1], [0], [0], [1], [0, 0, 1, 1], [], []>} : vector<8x256xbf16>, vector<256x256xbf16>, vector<8x256xf32> -> vector<8x256xf32>
    %142 = arith.addf %139, %141 : vector<8x256xf32>
    %143 = math.tanh %142 : vector<8x256xf32>
    %144 = vector.extract_strided_slice %143 {offsets = [0, 0], sizes = [8, 128], strides = [1, 1]} : vector<8x256xf32> to vector<8x128xf32>
    %c16_112 = arith.constant 16 : index
    %c0_113 = arith.constant 0 : index
    %145 = vector.load %arg16[%c16_112, %c0_113] : memref<64x256xf32, #tpu.memory_space<vmem>>, vector<8x128xf32>
    tpu.vector_store %arg16[%c16_112, %c0_113], %144 {strides = array<i32>} : memref<64x256xf32, #tpu.memory_space<vmem>>, vector<8x128xf32>,
    %146 = vector.extract_strided_slice %143 {offsets = [0, 128], sizes = [8, 128], strides = [1, 1]} : vector<8x256xf32> to vector<8x128xf32>
    %c40_114 = arith.constant 40 : index
    %c128_115 = arith.constant 128 : index
    %147 = vector.load %arg16[%c40_114, %c128_115] : memref<64x256xf32, #tpu.memory_space<vmem>>, vector<8x128xf32>
    tpu.vector_store %arg16[%c40_114, %c128_115], %146 {strides = array<i32>} : memref<64x256xf32, #tpu.memory_space<vmem>>, vector<8x128xf32>,
    %c24_116 = arith.constant 24 : index
    %c0_117 = arith.constant 0 : index
    %148 = vector.load %arg17[%c24_116, %c0_117] : memref<64x256xf32, #tpu.memory_space<vmem>>, vector<8x128xf32>
    %c32_118 = arith.constant 32 : index
    %c128_119 = arith.constant 128 : index
    %149 = vector.load %arg17[%c32_118, %c128_119] : memref<64x256xf32, #tpu.memory_space<vmem>>, vector<8x128xf32>
    %150 = tpu.concatenate %148, %149 in 1 : vector<8x128xf32>, vector<8x128xf32> -> vector<8x256xf32>
    %151 = arith.truncf %143 : vector<8x256xf32> to vector<8x256xbf16>
    %cst_120 = arith.constant dense<0.000000e+00> : vector<8x256xf32>
    %152 = tpu.matmul %151, %114, %cst_120 {dimension_numbers = #tpu.dot_dimension_numbers<[1], [0], [0], [1], [0, 0, 1, 1], [], []>} : vector<8x256xbf16>, vector<256x256xbf16>, vector<8x256xf32> -> vector<8x256xf32>
    %153 = arith.addf %150, %152 : vector<8x256xf32>
    %154 = math.tanh %153 : vector<8x256xf32>
    %155 = vector.extract_strided_slice %154 {offsets = [0, 0], sizes = [8, 128], strides = [1, 1]} : vector<8x256xf32> to vector<8x128xf32>
    %c24_121 = arith.constant 24 : index
    %c0_122 = arith.constant 0 : index
    %156 = vector.load %arg16[%c24_121, %c0_122] : memref<64x256xf32, #tpu.memory_space<vmem>>, vector<8x128xf32>
    tpu.vector_store %arg16[%c24_121, %c0_122], %155 {strides = array<i32>} : memref<64x256xf32, #tpu.memory_space<vmem>>, vector<8x128xf32>,
    %157 = vector.extract_strided_slice %154 {offsets = [0, 128], sizes = [8, 128], strides = [1, 1]} : vector<8x256xf32> to vector<8x128xf32>
    %c32_123 = arith.constant 32 : index
    %c128_124 = arith.constant 128 : index
    %158 = vector.load %arg16[%c32_123, %c128_124] : memref<64x256xf32, #tpu.memory_space<vmem>>, vector<8x128xf32>
    tpu.vector_store %arg16[%c32_123, %c128_124], %157 {strides = array<i32>} : memref<64x256xf32, #tpu.memory_space<vmem>>, vector<8x128xf32>,
    %c32_125 = arith.constant 32 : index
    %c0_126 = arith.constant 0 : index
    %159 = vector.load %arg17[%c32_125, %c0_126] : memref<64x256xf32, #tpu.memory_space<vmem>>, vector<8x128xf32>
    %c24_127 = arith.constant 24 : index
    %c128_128 = arith.constant 128 : index
    %160 = vector.load %arg17[%c24_127, %c128_128] : memref<64x256xf32, #tpu.memory_space<vmem>>, vector<8x128xf32>
    %161 = tpu.concatenate %159, %160 in 1 : vector<8x128xf32>, vector<8x128xf32> -> vector<8x256xf32>
    %162 = arith.truncf %154 : vector<8x256xf32> to vector<8x256xbf16>
    %cst_129 = arith.constant dense<0.000000e+00> : vector<8x256xf32>
    %163 = tpu.matmul %162, %114, %cst_129 {dimension_numbers = #tpu.dot_dimension_numbers<[1], [0], [0], [1], [0, 0, 1, 1], [], []>} : vector<8x256xbf16>, vector<256x256xbf16>, vector<8x256xf32> -> vector<8x256xf32>
    %164 = arith.addf %161, %163 : vector<8x256xf32>
    %165 = math.tanh %164 : vector<8x256xf32>
    %166 = vector.extract_strided_slice %165 {offsets = [0, 0], sizes = [8, 128], strides = [1, 1]} : vector<8x256xf32> to vector<8x128xf32>
    %c32_130 = arith.constant 32 : index
    %c0_131 = arith.constant 0 : index
    %167 = vector.load %arg16[%c32_130, %c0_131] : memref<64x256xf32, #tpu.memory_space<vmem>>, vector<8x128xf32>
    tpu.vector_store %arg16[%c32_130, %c0_131], %166 {strides = array<i32>} : memref<64x256xf32, #tpu.memory_space<vmem>>, vector<8x128xf32>,
    %168 = vector.extract_strided_slice %165 {offsets = [0, 128], sizes = [8, 128], strides = [1, 1]} : vector<8x256xf32> to vector<8x128xf32>
    %c24_132 = arith.constant 24 : index
    %c128_133 = arith.constant 128 : index
    %169 = vector.load %arg16[%c24_132, %c128_133] : memref<64x256xf32, #tpu.memory_space<vmem>>, vector<8x128xf32>
    tpu.vector_store %arg16[%c24_132, %c128_133], %168 {strides = array<i32>} : memref<64x256xf32, #tpu.memory_space<vmem>>, vector<8x128xf32>,
    %c40_134 = arith.constant 40 : index
    %c0_135 = arith.constant 0 : index
    %170 = vector.load %arg17[%c40_134, %c0_135] : memref<64x256xf32, #tpu.memory_space<vmem>>, vector<8x128xf32>
    %c16_136 = arith.constant 16 : index
    %c128_137 = arith.constant 128 : index
    %171 = vector.load %arg17[%c16_136, %c128_137] : memref<64x256xf32, #tpu.memory_space<vmem>>, vector<8x128xf32>
    %172 = tpu.concatenate %170, %171 in 1 : vector<8x128xf32>, vector<8x128xf32> -> vector<8x256xf32>
    %173 = arith.truncf %165 : vector<8x256xf32> to vector<8x256xbf16>
    %cst_138 = arith.constant dense<0.000000e+00> : vector<8x256xf32>
    %174 = tpu.matmul %173, %114, %cst_138 {dimension_numbers = #tpu.dot_dimension_numbers<[1], [0], [0], [1], [0, 0, 1, 1], [], []>} : vector<8x256xbf16>, vector<256x256xbf16>, vector<8x256xf32> -> vector<8x256xf32>
    %175 = arith.addf %172, %174 : vector<8x256xf32>
    %176 = math.tanh %175 : vector<8x256xf32>
    %177 = vector.extract_strided_slice %176 {offsets = [0, 0], sizes = [8, 128], strides = [1, 1]} : vector<8x256xf32> to vector<8x128xf32>
    %c40_139 = arith.constant 40 : index
    %c0_140 = arith.constant 0 : index
    %178 = vector.load %arg16[%c40_139, %c0_140] : memref<64x256xf32, #tpu.memory_space<vmem>>, vector<8x128xf32>
    tpu.vector_store %arg16[%c40_139, %c0_140], %177 {strides = array<i32>} : memref<64x256xf32, #tpu.memory_space<vmem>>, vector<8x128xf32>,
    %179 = vector.extract_strided_slice %176 {offsets = [0, 128], sizes = [8, 128], strides = [1, 1]} : vector<8x256xf32> to vector<8x128xf32>
    %c16_141 = arith.constant 16 : index
    %c128_142 = arith.constant 128 : index
    %180 = vector.load %arg16[%c16_141, %c128_142] : memref<64x256xf32, #tpu.memory_space<vmem>>, vector<8x128xf32>
    tpu.vector_store %arg16[%c16_141, %c128_142], %179 {strides = array<i32>} : memref<64x256xf32, #tpu.memory_space<vmem>>, vector<8x128xf32>,
    %c48_143 = arith.constant 48 : index
    %c0_144 = arith.constant 0 : index
    %181 = vector.load %arg17[%c48_143, %c0_144] : memref<64x256xf32, #tpu.memory_space<vmem>>, vector<8x128xf32>
    %c8_145 = arith.constant 8 : index
    %c128_146 = arith.constant 128 : index
    %182 = vector.load %arg17[%c8_145, %c128_146] : memref<64x256xf32, #tpu.memory_space<vmem>>, vector<8x128xf32>
    %183 = tpu.concatenate %181, %182 in 1 : vector<8x128xf32>, vector<8x128xf32> -> vector<8x256xf32>
    %184 = arith.truncf %176 : vector<8x256xf32> to vector<8x256xbf16>
    %cst_147 = arith.constant dense<0.000000e+00> : vector<8x256xf32>
    %185 = tpu.matmul %184, %114, %cst_147 {dimension_numbers = #tpu.dot_dimension_numbers<[1], [0], [0], [1], [0, 0, 1, 1], [], []>} : vector<8x256xbf16>, vector<256x256xbf16>, vector<8x256xf32> -> vector<8x256xf32>
    %186 = arith.addf %183, %185 : vector<8x256xf32>
    %187 = math.tanh %186 : vector<8x256xf32>
    %188 = vector.extract_strided_slice %187 {offsets = [0, 0], sizes = [8, 128], strides = [1, 1]} : vector<8x256xf32> to vector<8x128xf32>
    %c48_148 = arith.constant 48 : index
    %c0_149 = arith.constant 0 : index
    %189 = vector.load %arg16[%c48_148, %c0_149] : memref<64x256xf32, #tpu.memory_space<vmem>>, vector<8x128xf32>
    tpu.vector_store %arg16[%c48_148, %c0_149], %188 {strides = array<i32>} : memref<64x256xf32, #tpu.memory_space<vmem>>, vector<8x128xf32>,
    %190 = vector.extract_strided_slice %187 {offsets = [0, 128], sizes = [8, 128], strides = [1, 1]} : vector<8x256xf32> to vector<8x128xf32>
    %c8_150 = arith.constant 8 : index
    %c128_151 = arith.constant 128 : index
    %191 = vector.load %arg16[%c8_150, %c128_151] : memref<64x256xf32, #tpu.memory_space<vmem>>, vector<8x128xf32>
    tpu.vector_store %arg16[%c8_150, %c128_151], %190 {strides = array<i32>} : memref<64x256xf32, #tpu.memory_space<vmem>>, vector<8x128xf32>,
    %c56_152 = arith.constant 56 : index
    %c0_153 = arith.constant 0 : index
    %192 = vector.load %arg17[%c56_152, %c0_153] : memref<64x256xf32, #tpu.memory_space<vmem>>, vector<8x128xf32>
    %c0_154 = arith.constant 0 : index
    %c128_155 = arith.constant 128 : index
    %193 = vector.load %arg17[%c0_154, %c128_155] : memref<64x256xf32, #tpu.memory_space<vmem>>, vector<8x128xf32>
    %194 = tpu.concatenate %192, %193 in 1 : vector<8x128xf32>, vector<8x128xf32> -> vector<8x256xf32>
    %195 = arith.truncf %187 : vector<8x256xf32> to vector<8x256xbf16>
    %cst_156 = arith.constant dense<0.000000e+00> : vector<8x256xf32>
    %196 = tpu.matmul %195, %114, %cst_156 {dimension_numbers = #tpu.dot_dimension_numbers<[1], [0], [0], [1], [0, 0, 1, 1], [], []>} : vector<8x256xbf16>, vector<256x256xbf16>, vector<8x256xf32> -> vector<8x256xf32>
    %197 = arith.addf %194, %196 : vector<8x256xf32>
    %198 = math.tanh %197 : vector<8x256xf32>
    %199 = vector.extract_strided_slice %198 {offsets = [0, 0], sizes = [8, 128], strides = [1, 1]} : vector<8x256xf32> to vector<8x128xf32>
    %c56_157 = arith.constant 56 : index
    %c0_158 = arith.constant 0 : index
    %200 = vector.load %arg16[%c56_157, %c0_158] : memref<64x256xf32, #tpu.memory_space<vmem>>, vector<8x128xf32>
    tpu.vector_store %arg16[%c56_157, %c0_158], %199 {strides = array<i32>} : memref<64x256xf32, #tpu.memory_space<vmem>>, vector<8x128xf32>,
    %201 = vector.extract_strided_slice %198 {offsets = [0, 128], sizes = [8, 128], strides = [1, 1]} : vector<8x256xf32> to vector<8x128xf32>
    %c0_159 = arith.constant 0 : index
    %c128_160 = arith.constant 128 : index
    %202 = vector.load %arg16[%c0_159, %c128_160] : memref<64x256xf32, #tpu.memory_space<vmem>>, vector<8x128xf32>
    tpu.vector_store %arg16[%c0_159, %c128_160], %201 {strides = array<i32>} : memref<64x256xf32, #tpu.memory_space<vmem>>, vector<8x128xf32>,
    %c0_161 = arith.constant 0 : index
    %c0_162 = arith.constant 0 : index
    %203 = vector.load %arg16[%c0_161, %c0_162] : memref<64x256xf32, #tpu.memory_space<vmem>>, vector<64x256xf32>
    %204 = arith.truncf %203 : vector<64x256xf32> to vector<64x256xbf16>
    %c0_163 = arith.constant 0 : index
    %c0_164 = arith.constant 0 : index
    %205 = vector.load %arg9[%c0_163, %c0_164] : memref<256x256xbf16, #tpu.memory_space<vmem>>, vector<256x256xbf16>
    %cst_165 = arith.constant dense<0.000000e+00> : vector<64x256xf32>
    %206 = tpu.matmul %204, %205, %cst_165 {dimension_numbers = #tpu.dot_dimension_numbers<[1], [0], [0], [1], [0, 0, 1, 1], [], []>} : vector<64x256xbf16>, vector<256x256xbf16>, vector<64x256xf32> -> vector<64x256xf32>
    %c0_166 = arith.constant 0 : index
    %c0_167 = arith.constant 0 : index
    %207 = vector.load %arg12[%c0_166, %c0_167] : memref<1x256xf32, #tpu.memory_space<vmem>>, vector<1x256xf32>
    %208 = vector.broadcast %207 : vector<1x256xf32> to vector<64x256xf32>
    %209 = arith.addf %206, %208 : vector<64x256xf32>
    %c0_168 = arith.constant 0 : index
    %c0_169 = arith.constant 0 : index
    %210 = vector.load %arg17[%c0_168, %c0_169] : memref<64x256xf32, #tpu.memory_space<vmem>>, vector<64x256xf32>
    tpu.vector_store %arg17[%c0_168, %c0_169], %209 {strides = array<i32>} : memref<64x256xf32, #tpu.memory_space<vmem>>, vector<64x256xf32>,
    %211 = vector.extract_strided_slice %198 {offsets = [0, 0], sizes = [8, 128], strides = [1, 1]} : vector<8x256xf32> to vector<8x128xf32>
    %212 = vector.extract_strided_slice %198 {offsets = [0, 128], sizes = [8, 128], strides = [1, 1]} : vector<8x256xf32> to vector<8x128xf32>
    %c56_170 = arith.constant 56 : index
    %c128_171 = arith.constant 128 : index
    %213 = vector.load %arg17[%c56_170, %c128_171] : memref<64x256xf32, #tpu.memory_space<vmem>>, vector<8x128xf32>
    %214 = arith.truncf %212 : vector<8x128xf32> to vector<8x128xbf16>
    %c0_172 = arith.constant 0 : index
    %c0_173 = arith.constant 0 : index
    %215 = vector.load %arg11[%c0_172, %c0_173] : memref<128x128xbf16, #tpu.memory_space<vmem>>, vector<128x128xbf16>
    %cst_174 = arith.constant dense<0.000000e+00> : vector<8x128xf32>
    %216 = tpu.matmul %214, %215, %cst_174 {dimension_numbers = #tpu.dot_dimension_numbers<[1], [0], [0], [1], [0, 0, 1, 1], [], []>} : vector<8x128xbf16>, vector<128x128xbf16>, vector<8x128xf32> -> vector<8x128xf32>
    %217 = arith.addf %213, %216 : vector<8x128xf32>
    %218 = math.tanh %217 : vector<8x128xf32>
    %c0_175 = arith.constant 0 : index
    %c0_176 = arith.constant 0 : index
    %219 = vector.load %arg10[%c0_175, %c0_176] : memref<128x128xbf16, #tpu.memory_space<vmem>>, vector<128x128xbf16>
    %c0_177 = arith.constant 0 : index
    %c0_178 = arith.constant 0 : index
    %220 = vector.load %arg17[%c0_177, %c0_178] : memref<64x256xf32, #tpu.memory_space<vmem>>, vector<8x128xf32>
    %221 = arith.truncf %211 : vector<8x128xf32> to vector<8x128xbf16>
    %cst_179 = arith.constant dense<0.000000e+00> : vector<8x128xf32>
    %222 = tpu.matmul %221, %219, %cst_179 {dimension_numbers = #tpu.dot_dimension_numbers<[1], [0], [0], [1], [0, 0, 1, 1], [], []>} : vector<8x128xbf16>, vector<128x128xbf16>, vector<8x128xf32> -> vector<8x128xf32>
    %223 = arith.addf %220, %222 : vector<8x128xf32>
    %224 = math.tanh %223 : vector<8x128xf32>
    %c8_180 = arith.constant 8 : index
    %c0_181 = arith.constant 0 : index
    %225 = vector.load %arg17[%c8_180, %c0_181] : memref<64x256xf32, #tpu.memory_space<vmem>>, vector<8x128xf32>
    %226 = arith.truncf %224 : vector<8x128xf32> to vector<8x128xbf16>
    %cst_182 = arith.constant dense<0.000000e+00> : vector<8x128xf32>
    %227 = tpu.matmul %226, %219, %cst_182 {dimension_numbers = #tpu.dot_dimension_numbers<[1], [0], [0], [1], [0, 0, 1, 1], [], []>} : vector<8x128xbf16>, vector<128x128xbf16>, vector<8x128xf32> -> vector<8x128xf32>
    %228 = arith.addf %225, %227 : vector<8x128xf32>
    %229 = math.tanh %228 : vector<8x128xf32>
    %c16_183 = arith.constant 16 : index
    %c0_184 = arith.constant 0 : index
    %230 = vector.load %arg17[%c16_183, %c0_184] : memref<64x256xf32, #tpu.memory_space<vmem>>, vector<8x128xf32>
    %231 = arith.truncf %229 : vector<8x128xf32> to vector<8x128xbf16>
    %cst_185 = arith.constant dense<0.000000e+00> : vector<8x128xf32>
    %232 = tpu.matmul %231, %219, %cst_185 {dimension_numbers = #tpu.dot_dimension_numbers<[1], [0], [0], [1], [0, 0, 1, 1], [], []>} : vector<8x128xbf16>, vector<128x128xbf16>, vector<8x128xf32> -> vector<8x128xf32>
    %233 = arith.addf %230, %232 : vector<8x128xf32>
    %234 = math.tanh %233 : vector<8x128xf32>
    %c24_186 = arith.constant 24 : index
    %c0_187 = arith.constant 0 : index
    %235 = vector.load %arg17[%c24_186, %c0_187] : memref<64x256xf32, #tpu.memory_space<vmem>>, vector<8x128xf32>
    %236 = arith.truncf %234 : vector<8x128xf32> to vector<8x128xbf16>
    %cst_188 = arith.constant dense<0.000000e+00> : vector<8x128xf32>
    %237 = tpu.matmul %236, %219, %cst_188 {dimension_numbers = #tpu.dot_dimension_numbers<[1], [0], [0], [1], [0, 0, 1, 1], [], []>} : vector<8x128xbf16>, vector<128x128xbf16>, vector<8x128xf32> -> vector<8x128xf32>
    %238 = arith.addf %235, %237 : vector<8x128xf32>
    %239 = math.tanh %238 : vector<8x128xf32>
    %c32_189 = arith.constant 32 : index
    %c0_190 = arith.constant 0 : index
    %240 = vector.load %arg17[%c32_189, %c0_190] : memref<64x256xf32, #tpu.memory_space<vmem>>, vector<8x128xf32>
    %241 = arith.truncf %239 : vector<8x128xf32> to vector<8x128xbf16>
    %cst_191 = arith.constant dense<0.000000e+00> : vector<8x128xf32>
    %242 = tpu.matmul %241, %219, %cst_191 {dimension_numbers = #tpu.dot_dimension_numbers<[1], [0], [0], [1], [0, 0, 1, 1], [], []>} : vector<8x128xbf16>, vector<128x128xbf16>, vector<8x128xf32> -> vector<8x128xf32>
    %243 = arith.addf %240, %242 : vector<8x128xf32>
    %244 = math.tanh %243 : vector<8x128xf32>
    %c40_192 = arith.constant 40 : index
    %c0_193 = arith.constant 0 : index
    %245 = vector.load %arg17[%c40_192, %c0_193] : memref<64x256xf32, #tpu.memory_space<vmem>>, vector<8x128xf32>
    %246 = arith.truncf %244 : vector<8x128xf32> to vector<8x128xbf16>
    %cst_194 = arith.constant dense<0.000000e+00> : vector<8x128xf32>
    %247 = tpu.matmul %246, %219, %cst_194 {dimension_numbers = #tpu.dot_dimension_numbers<[1], [0], [0], [1], [0, 0, 1, 1], [], []>} : vector<8x128xbf16>, vector<128x128xbf16>, vector<8x128xf32> -> vector<8x128xf32>
    %248 = arith.addf %245, %247 : vector<8x128xf32>
    %249 = math.tanh %248 : vector<8x128xf32>
    %c48_195 = arith.constant 48 : index
    %c0_196 = arith.constant 0 : index
    %250 = vector.load %arg17[%c48_195, %c0_196] : memref<64x256xf32, #tpu.memory_space<vmem>>, vector<8x128xf32>
    %251 = arith.truncf %249 : vector<8x128xf32> to vector<8x128xbf16>
    %cst_197 = arith.constant dense<0.000000e+00> : vector<8x128xf32>
    %252 = tpu.matmul %251, %219, %cst_197 {dimension_numbers = #tpu.dot_dimension_numbers<[1], [0], [0], [1], [0, 0, 1, 1], [], []>} : vector<8x128xbf16>, vector<128x128xbf16>, vector<8x128xf32> -> vector<8x128xf32>
    %253 = arith.addf %250, %252 : vector<8x128xf32>
    %254 = math.tanh %253 : vector<8x128xf32>
    %c56_198 = arith.constant 56 : index
    %c0_199 = arith.constant 0 : index
    %255 = vector.load %arg17[%c56_198, %c0_199] : memref<64x256xf32, #tpu.memory_space<vmem>>, vector<8x128xf32>
    %256 = arith.truncf %254 : vector<8x128xf32> to vector<8x128xbf16>
    %cst_200 = arith.constant dense<0.000000e+00> : vector<8x128xf32>
    %257 = tpu.matmul %256, %219, %cst_200 {dimension_numbers = #tpu.dot_dimension_numbers<[1], [0], [0], [1], [0, 0, 1, 1], [], []>} : vector<8x128xbf16>, vector<128x128xbf16>, vector<8x128xf32> -> vector<8x128xf32>
    %258 = arith.addf %255, %257 : vector<8x128xf32>
    %259 = math.tanh %258 : vector<8x128xf32>
    %260 = tpu.concatenate %259, %218 in 1 : vector<8x128xf32>, vector<8x128xf32> -> vector<8x256xf32>
    %261 = arith.truncf %260 : vector<8x256xf32> to vector<8x256xbf16>
    %c0_201 = arith.constant 0 : index
    %c0_202 = arith.constant 0 : index
    %262 = vector.load %arg13[%c0_201, %c0_202] : memref<256x128xbf16, #tpu.memory_space<vmem>>, vector<256x128xbf16>
    %cst_203 = arith.constant dense<0.000000e+00> : vector<8x128xf32>
    %263 = tpu.matmul %261, %262, %cst_203 {dimension_numbers = #tpu.dot_dimension_numbers<[1], [0], [0], [1], [0, 0, 1, 1], [], []>} : vector<8x256xbf16>, vector<256x128xbf16>, vector<8x128xf32> -> vector<8x128xf32>
    %c0_204 = arith.constant 0 : index
    %c0_205 = arith.constant 0 : index
    %264 = vector.load %arg14[%c0_204, %c0_205] : memref<1x128xf32, #tpu.memory_space<vmem>>, vector<1x128xf32>
    %265 = vector.broadcast %264 : vector<1x128xf32> to vector<8x128xf32>
    %266 = arith.addf %263, %265 : vector<8x128xf32>
    %c0_206 = arith.constant 0 : index
    %c0_207 = arith.constant 0 : index
    %267 = vector.load %arg15[%c0_206, %c0_207] : memref<8x128xf32, #tpu.memory_space<vmem>>, vector<8x128xf32>
    tpu.vector_store %arg15[%c0_206, %c0_207], %266 {strides = array<i32>} : memref<8x128xf32, #tpu.memory_space<vmem>>, vector<8x128xf32>,
    return
  }
}

</mosaic_0001>

<bundles_post_ra>
// kernel: rnn_pallas.1
= control target key start
LH: loop header
LB: loop body
LE: loop exit
PB: predicated region body
PF: predicated region fallthrough
CT: control target
= control target key end

     0   :  { %v3941_v0 = vmov 0   ;;  %v58_v18 = vlaneseq  ;;  %v3942_v21 = vmov 1.0|1.0   ;;  %s6075_s0 = inlined_call_operand.vmem [shape: s32[64,1], index: 0, kind: input, shape index: {}]   ;;  %s6076_s1 = inlined_call_operand.vmem [shape: bf16[128,128], index: 1, kind: input, shape index: {}]   ;;  %s6077_s4 = inlined_call_operand.vmem [shape: bf16[256,256], index: 4, kind: input, shape index: {}]   ;;  %s6078_s3 = inlined_call_operand.vmem [shape: bf16[128,256], index: 3, kind: input, shape index: {}]   ;;  %s6079_s2 = inlined_call_operand.vmem [shape: f32[8,256], index: 2, kind: input, shape index: {}]   ;;  %s6080_s5 = inlined_call_operand.vmem [shape: f32[1,256], index: 5, kind: input, shape index: {}]   ;;  %s6081_s6 = inlined_call_operand.vmem [shape: bf16[256,256], index: 6, kind: input, shape index: {}]   ;;  %s6082_s7 = inlined_call_operand.vmem [shape: bf16[256,256], index: 7, kind: input, shape index: {}]   ;;  %s6083_s8 = inlined_call_operand.vmem [shape: f32[1,256], index: 8, kind: input, shape index: {}]   ;;  %s6084_s9 = inlined_call_operand.vmem [shape: bf16[256,256], index: 9, kind: input, shape index: {}]   ;;  %s6085_s11 = inlined_call_operand.vmem [shape: bf16[128,128], index: 11, kind: input, shape index: {}]   ;;  %s6086_s10 = inlined_call_operand.vmem [shape: bf16[128,128], index: 10, kind: input, shape index: {}]   ;;  %s6087_s12 = inlined_call_operand.vmem [shape: f32[1,256], index: 12, kind: input, shape index: {}]   ;;  %s6088_s13 = inlined_call_operand.vmem [shape: bf16[256,128], index: 13, kind: input, shape index: {}]   ;;  %s6089_s14 = inlined_call_operand.vmem [shape: f32[1,128], index: 14, kind: input, shape index: {}]   ;;  %s6090_s15 = inlined_call_operand.vmem [shape: f32[8,128], index: 15, kind: output, shape index: {}]  }
   0x1   :  { %3856 = vset.pattern.permute.xlu1 %v3941_v0  ;;  %3855 = vset.pattern.permute.xlu0 %v3941_v0  ;;  %v52_v1 = vld [vmem:[%s6075_s0 + $0x10] sm:$0xff]  ;;  %v50_v2 = vld [vmem:[%s6075_s0] sm:$0xff]  ;;  %v3676_v4 = vld [vmem:[%s6076_s1 + $0x38] sm:$0xff] }
   0x2   :  { %67 = vperm.xlu1 %3856, %v52_v1   ;;  %61 = vperm.xlu0 %3855, %v50_v2   ;;  %v54_v3 = vld [vmem:[%s6075_s0 + $0x20] sm:$0xff]  ;;  %v3675_v5 = vld [vmem:[%s6076_s1 + $0x30] sm:$0xff]  ;;  %v53_v6 = vld [vmem:[%s6075_s0 + $0x18] sm:$0xff]  ;;  %v4071_v19 = vand.u32 127, %v58_v18 }
   0x3   :  { %3857 = vset.pattern.permute.xlu2 %v3941_v0  ;;  %176 = vmatpush.bf16.msra.mxu0 %v3676_v4  ;;  %v51_v7 = vld [vmem:[%s6075_s0 + $0x8] sm:$0xff]  ;;  %v3673_v10 = vld [vmem:[%s6076_s1 + $0x20] sm:$0xff]  ;;  %v57_v11 = vld [vmem:[%s6075_s0 + $0x38] sm:$0xff] }
   0x4   :  { %73 = vperm.xlu2 %3857, %v54_v3   ;;  %v55_v8 = vld [vmem:[%s6075_s0 + $0x28] sm:$0xff]  ;;  %v56_v12 = vld [vmem:[%s6075_s0 + $0x30] sm:$0xff]  ;;  %v3672_v13 = vld [vmem:[%s6076_s1 + $0x18] sm:$0xff] }
   0x5   :  { %v3674_v9 = vld [vmem:[%s6076_s1 + $0x28] sm:$0xff]  ;;  %v3671_v14 = vld [vmem:[%s6076_s1 + $0x10] sm:$0xff]  ;;  %v3669_v16 = vld [vmem:[%s6076_s1] sm:$0xff] }
   0x6   :  { %v3670_v15 = vld [vmem:[%s6076_s1 + $0x8] sm:$0xff]  ;;  %v3087_v25 = vld [vmem:[%s6077_s4 + $0x70] sm:$0xf]  ;;  %v3708_v26 = vld [vmem:[%s6077_s4 + $0x74] sm:$0xf0] }
   0x7   :  { %177 = vmatpush.bf16.msra.mxu0 %v3675_v5  ;;  %v3079_v27 = vld [vmem:[%s6077_s4 + $0x60] sm:$0xf]  ;;  %v4088_v28 = vor.u32 %v3708_v26, %v3087_v25  ;;  %v3706_v29 = vld [vmem:[%s6077_s4 + $0x64] sm:$0xf0]  ;;  %v3071_v31 = vld [vmem:[%s6077_s4 + $0x50] sm:$0xf] }
   0x8   :  { %v4094_v30 = vor.u32 %v3706_v29, %v3079_v27  ;;  %v3704_v32 = vld [vmem:[%s6077_s4 + $0x54] sm:$0xf0]  ;;  %v3023_v33 = vld [vmem:[%s6078_s3 + $0x70] sm:$0xf]  ;;  %v3691_v36 = vld [vmem:[%s6078_s3 + $0x74] sm:$0xf] }
   0x9   :  { %583 = vmatpush.bf16.msra.mxu3 %v4088_v28  ;;  %v4106_v34 = vor.u32 %v3704_v32, %v3071_v31  ;;  %v3692_v35 = vld [vmem:[%s6078_s3 + $0x74] sm:$0xf0]  ;;  %v3025_v37 = vld [vmem:[%s6078_s3 + $0x78] sm:$0xf0]  ;;  %v3063_v38 = vld [vmem:[%s6077_s4 + $0x40] sm:$0xf] }
   0xa   :  { %70 = vperm.xlu1 %3856, %v53_v6   ;;  %64 = vperm.xlu0 %3855, %v51_v7   ;;  %v3702_v39 = vld [vmem:[%s6077_s4 + $0x44] sm:$0xf0]  ;;  %v3024_v40 = vor.u32 %v3692_v35, %v3023_v33  ;;  %v3028_v41 = vor.u32 %v3691_v36, %v3025_v37  ;;  %v3015_v42 = vld [vmem:[%s6078_s3 + $0x60] sm:$0xf]  ;;  %v3689_v45 = vld [vmem:[%s6078_s3 + $0x64] sm:$0xf] }
   0xb   :  { %178 = vmatpush.bf16.msra.mxu0 %v3674_v9  ;;  %v3690_v44 = vld [vmem:[%s6078_s3 + $0x64] sm:$0xf0]  ;;  %v3017_v46 = vld [vmem:[%s6078_s3 + $0x68] sm:$0xf0]  ;;  %v4136_v49 = vor.u32 %v3702_v39, %v3063_v38  ;;  %v3055_v50 = vld [vmem:[%s6077_s4 + $0x30] sm:$0xf] }
   0xc   :  { %76 = vperm.xlu2 %3857, %v55_v8   ;;  %311 = vmatpush.bf16.msra.mxu1 %v3024_v40  ;;  %v3016_v47 = vor.u32 %v3690_v44, %v3015_v42  ;;  %v3020_v48 = vor.u32 %v3689_v45, %v3017_v46  ;;  %v3700_v51 = vld [vmem:[%s6077_s4 + $0x34] sm:$0xf0]  ;;  %v3007_v52 = vld [vmem:[%s6078_s3 + $0x50] sm:$0xf]  ;;  %v3687_v54 = vld [vmem:[%s6078_s3 + $0x54] sm:$0xf] }
   0xd   :  { %584 = vmatpush.bf16.msra.mxu3 %v4094_v30  ;;  %340 = vmatpush.bf16.msra.mxu2 %v3028_v41  ;;  %v3688_v53 = vld [vmem:[%s6078_s3 + $0x54] sm:$0xf0]  ;;  %v3009_v55 = vld [vmem:[%s6078_s3 + $0x58] sm:$0xf0]  ;;  %v4159_v58 = vor.u32 %v3700_v51, %v3055_v50  ;;  %v3047_v59 = vld [vmem:[%s6077_s4 + $0x20] sm:$0xf] }
   0xe   :  { %v3008_v56 = vor.u32 %v3688_v53, %v3007_v52  ;;  %v3012_v57 = vor.u32 %v3687_v54, %v3009_v55  ;;  %v3698_v60 = vld [vmem:[%s6077_s4 + $0x24] sm:$0xf0]  ;;  %v2999_v61 = vld [vmem:[%s6078_s3 + $0x40] sm:$0xf]  ;;  %v3685_v63 = vld [vmem:[%s6078_s3 + $0x44] sm:$0xf] }
   0xf   :  { %179 = vmatpush.bf16.msra.mxu0 %v3673_v10  ;;  %v3686_v62 = vld [vmem:[%s6078_s3 + $0x44] sm:$0xf0]  ;;  %v3001_v0 = vld [vmem:[%s6078_s3 + $0x48] sm:$0xf0]  ;;  %v4181_v3 = vor.u32 %v3698_v60, %v3047_v59  ;;  %v3039_v4 = vld [vmem:[%s6077_s4 + $0x10] sm:$0xf] }
  0x10   :  { %312 = vmatpush.bf16.msra.mxu1 %v3016_v47  ;;  %v3000_v1 = vor.u32 %v3686_v62, %v2999_v61  ;;  %v3004_v2 = vor.u32 %v3685_v63, %v3001_v0  ;;  %v3696_v5 = vld [vmem:[%s6077_s4 + $0x14] sm:$0xf0]  ;;  %v2991_v6 = vld [vmem:[%s6078_s3 + $0x30] sm:$0xf]  ;;  %v3683_v8 = vld [vmem:[%s6078_s3 + $0x34] sm:$0xf] }
  0x11   :  { %585 = vmatpush.bf16.msra.mxu3 %v4106_v34  ;;  %341 = vmatpush.bf16.msra.mxu2 %v3020_v48  ;;  %v3684_v7 = vld [vmem:[%s6078_s3 + $0x34] sm:$0xf0]  ;;  %v2993_v9 = vld [vmem:[%s6078_s3 + $0x38] sm:$0xf0]  ;;  %v3722_v25 = vld [vmem:[%s6077_s4 + $0xe4] sm:$0xf0] }
  0x12   :  { %82 = vperm.xlu1 %3856, %v57_v11   ;;  %79 = vperm.xlu0 %3855, %v56_v12   ;;  %v2992_v10 = vor.u32 %v3684_v7, %v2991_v6  ;;  %v2996_v11 = vor.u32 %v3683_v8, %v2993_v9  ;;  %v4202_v12 = vor.u32 %v3696_v5, %v3039_v4  ;;  %v3724_v18 = vld [vmem:[%s6077_s4 + $0xf4] sm:$0xf0]  ;;  %v3135_v27 = vld [vmem:[%s6077_s4 + $0xd0] sm:$0xf]  ;;  %v3718_v32 = vld [vmem:[%s6077_s4 + $0xc4] sm:$0xf0] }
  0x13   :  { %180 = vmatpush.bf16.msra.mxu0 %v3672_v13  ;;  %v3031_v13 = vld [vmem:[%s6077_s4] sm:$0xf]  ;;  %v3720_v29 = vld [vmem:[%s6077_s4 + $0xd4] sm:$0xf0]  ;;  %v3119_v35 = vld [vmem:[%s6077_s4 + $0xb0] sm:$0xf] }
  0x14   :  { %313 = vmatpush.bf16.msra.mxu1 %v3008_v56  ;;  %v4247_v31 = vor.u32 %v3720_v29, %v3135_v27  ;;  %v3716_v36 = vld [vmem:[%s6077_s4 + $0xb4] sm:$0xf0]  ;;  %v3111_v38 = vld [vmem:[%s6077_s4 + $0xa0] sm:$0xf]  ;;  %v3714_v39 = vld [vmem:[%s6077_s4 + $0xa4] sm:$0xf0] }
  0x15   :  { %586 = vmatpush.bf16.msra.mxu3 %v4136_v49  ;;  %342 = vmatpush.bf16.msra.mxu2 %v3012_v57  ;;  %v4265_v37 = vor.u32 %v3716_v36, %v3119_v35  ;;  %v4274_v40 = vor.u32 %v3714_v39, %v3111_v38  ;;  %v3103_v41 = vld [vmem:[%s6077_s4 + $0x90] sm:$0xf]  ;;  %v3712_v42 = vld [vmem:[%s6077_s4 + $0x94] sm:$0xf0]  ;;  %v2983_v44 = vld [vmem:[%s6078_s3 + $0x20] sm:$0xf] }
  0x16   :  { %v3682_v45 = vld [vmem:[%s6078_s3 + $0x24] sm:$0xf0]  ;;  %v3681_v46 = vld [vmem:[%s6078_s3 + $0x24] sm:$0xf]  ;;  %v2985_v50 = vld [vmem:[%s6078_s3 + $0x28] sm:$0xf0] }
  0x17   :  { %181 = vmatpush.bf16.msra.mxu0 %v3671_v14  ;;  %v3694_v14 = vld [vmem:[%s6077_s4 + $0x4] sm:$0xf0]  ;;  %v2984_v48 = vor.u32 %v3682_v45, %v2983_v44  ;;  %v2988_v51 = vor.u32 %v3681_v46, %v2985_v50  ;;  %v3095_v52 = vld [vmem:[%s6077_s4 + $0x80] sm:$0xf]  ;;  %v2975_v55 = vld [vmem:[%s6078_s3 + $0x10] sm:$0xf] }
  0x18   :  { %314 = vmatpush.bf16.msra.mxu1 %v3000_v1  ;;  %v386_v47 = vld [vmem:[%s6079_s2 + $0x8] sm:$0xff]  ;;  %v3680_v56 = vld [vmem:[%s6078_s3 + $0x14] sm:$0xf0]  ;;  %v3679_v57 = vld [vmem:[%s6078_s3 + $0x14] sm:$0xf] }
  0x19   :  { %587 = vmatpush.bf16.msra.mxu3 %v4159_v58  ;;  %343 = vmatpush.bf16.msra.mxu2 %v3004_v2  ;;  %v3710_v53 = vld [vmem:[%s6077_s4 + $0x84] sm:$0xf0]  ;;  %v2976_v59 = vor.u32 %v3680_v56, %v2975_v55  ;;  %v2977_v60 = vld [vmem:[%s6078_s3 + $0x18] sm:$0xf0]  ;;  %v4321_v61 = vpack.c.bf16 %v386_v47, %v386_v47  ;;  %v2967_v63 = vld [vmem:[%s6078_s3] sm:$0xf] }
  0x1a   :  { %v4307_v54 = vor.u32 %v3710_v53, %v3095_v52  ;;  %v2980_v62 = vor.u32 %v3679_v57, %v2977_v60  ;;  %v3678_v0 = vld [vmem:[%s6078_s3 + $0x4] sm:$0xf0]  ;;  %v3677_v1 = vld [vmem:[%s6078_s3 + $0x4] sm:$0xf]  ;;  %v2969_v4 = vld [vmem:[%s6078_s3 + $0x8] sm:$0xf0] }
  0x1b   :  { %182 = vmatpush.bf16.msra.mxu0 %v3670_v15  ;;  %v2968_v2 = vor.u32 %v3678_v0, %v2967_v63  ;;  %v2972_v5 = vor.u32 %v3677_v1, %v2969_v4  ;;  %v3707_v6 = vld [vmem:[%s6077_s4 + $0x74] sm:$0xf]  ;;  %v3089_v7 = vld [vmem:[%s6077_s4 + $0x78] sm:$0xf0]  ;;  %v3701_v35 = vld [vmem:[%s6077_s4 + $0x44] sm:$0xf] }
  0x1c   :  { %315 = vmatpush.bf16.msra.mxu1 %v2992_v10  ;;  %v3723_v8 = vld [vmem:[%s6077_s4 + $0xf4] sm:$0xf]  ;;  %v4350_v9 = vor.u32 %v3707_v6, %v3089_v7  ;;  %v3153_v10 = vld [vmem:[%s6077_s4 + $0xf8] sm:$0xf0]  ;;  %v3065_v36 = vld [vmem:[%s6077_s4 + $0x48] sm:$0xf0] }
  0x1d   :  { %588 = vmatpush.bf16.msra.mxu3 %v4181_v3  ;;  %344 = vmatpush.bf16.msra.mxu2 %v2996_v11  ;;  %v4355_v11 = vor.u32 %v3723_v8, %v3153_v10  ;;  %v3137_v29 = vld [vmem:[%s6077_s4 + $0xd8] sm:$0xf0]  ;;  %v3717_v38 = vld [vmem:[%s6077_s4 + $0xc4] sm:$0xf]  ;;  %v4415_v39 = vor.u32 %v3701_v35, %v3065_v36  ;;  %v3699_v46 = vld [vmem:[%s6077_s4 + $0x34] sm:$0xf] }
  0x1e   :  { %v3057_v47 = vld [vmem:[%s6077_s4 + $0x38] sm:$0xf0]  ;;  %v3697_v55 = vld [vmem:[%s6077_s4 + $0x24] sm:$0xf]  ;;  %v3049_v56 = vld [vmem:[%s6077_s4 + $0x28] sm:$0xf0] }
  0x1f   :  { %183 = vmatpush.bf16.msra.mxu0 %v3669_v16  ;;  %v4437_v50 = vor.u32 %v3699_v46, %v3057_v47  ;;  %v3713_v57 = vld [vmem:[%s6077_s4 + $0xa4] sm:$0xf]  ;;  %v3113_v60 = vld [vmem:[%s6077_s4 + $0xa8] sm:$0xf0]  ;;  %v3695_v1 = vld [vmem:[%s6077_s4 + $0x14] sm:$0xf] }
  0x20   :  { %316 = vmatpush.bf16.msra.mxu1 %v2984_v48  ;;  %v3715_v48 = vld [vmem:[%s6077_s4 + $0xb4] sm:$0xf]  ;;  %v3105_v6 = vld [vmem:[%s6077_s4 + $0x98] sm:$0xf0]  ;;  %v3693_v7 = vld [vmem:[%s6077_s4 + $0x4] sm:$0xf] }
  0x21   :  { %589 = vmatpush.bf16.msra.mxu3 %v4202_v12  ;;  %345 = vmatpush.bf16.msra.mxu2 %v2988_v51  ;;  %v3121_v51 = vld [vmem:[%s6077_s4 + $0xb8] sm:$0xf0]  ;;  %v3033_v10 = vld [vmem:[%s6077_s4 + $0x8] sm:$0xf0] }
  0x22   :  { %v4444_v52 = vor.u32 %v3715_v48, %v3121_v51 }
  0x23   :  { %609 = vmatpush.bf16.msrb.mxu0 %v4350_v9 }
  0x24   :  { %317 = vmatpush.bf16.msra.mxu1 %v2976_v59  ;;  %v4459_v59 = vor.u32 %v3697_v55, %v3049_v56 }
  0x25   :  { %346 = vmatpush.bf16.msra.mxu2 %v2980_v62  ;;  %v4464_v62 = vor.u32 %v3713_v57, %v3113_v60 }
  0x28   :  { %318 = vmatpush.bf16.msra.mxu1 %v2968_v2  ;;  %v3041_v2 = vld [vmem:[%s6077_s4 + $0x18] sm:$0xf0] }
  0x29   :  { %347 = vmatpush.bf16.msra.mxu2 %v2972_v5  ;;  %v4478_v4 = vor.u32 %v3695_v1, %v3041_v2  ;;  %v3711_v5 = vld [vmem:[%s6077_s4 + $0x94] sm:$0xf] }
  0x2a   :  { %v4490_v8 = vor.u32 %v3711_v5, %v3105_v6 }
  0x2c   :  { %622 = vmatpush.bf16.msrb.mxu1 %v4355_v11 }
  0x2d   :  { %645 = vmatpush.bf16.msrb.mxu2 %v4088_v28 }
  0x31   :  { %646 = vmatpush.bf16.msrb.mxu2 %v4094_v30 }
  0x35   :  { %647 = vmatpush.bf16.msrb.mxu2 %v4106_v34 }
  0x39   :  { %648 = vmatpush.bf16.msrb.mxu2 %v4136_v49 }
  0x3d   :  { %649 = vmatpush.bf16.msrb.mxu2 %v4159_v58 }
  0x41   :  { %650 = vmatpush.bf16.msrb.mxu2 %v4181_v3 }
  0x45   :  { %651 = vmatpush.bf16.msrb.mxu2 %v4202_v12 }
  0x5e   :  { %v74_v24 = vpop.permute.xlu2 %73 }
  0x5f   :  { %vm88_vm6 = vcmp.eq.s32.totalorder %v4071_v19, %v74_v24  ;;  %v3143_v24 = vld [vmem:[%s6077_s4 + $0xe0] sm:$0xf] }
  0x66   :  { %v77_v43 = vpop.permute.xlu2 %76 }
  0x67   :  { %vm89_vm7 = vcmp.eq.s32.totalorder %v4071_v19, %v77_v43  ;;  %v4283_v43 = vor.u32 %v3712_v42, %v3103_v41  ;;  %v3129_v41 = vld [vmem:[%s6077_s4 + $0xc8] sm:$0xf0] }
  0x68   :  { %vm2961_vm8 = vmpackc.low %vm89_vm7, %vm88_vm6  ;;  %v4420_v42 = vor.u32 %v3717_v38, %v3129_v41  ;;  %v225_v41 = vld [vmem:[%s6080_s5] sm:$0x3] }
  0x69   :  { %v4553_v51 = vperm.slane %v225_v41, 1 }
  0x74   :  { %v62_v17 = vpop.permute.xlu0 %61  ;;  %v68_v22 = vpop.permute.xlu1 %67 }
  0x75   :  { %vm84_vm1 = vcmp.eq.s32.totalorder %v4071_v19, %v62_v17  ;;  %vm86_vm3 = vcmp.eq.s32.totalorder %v4071_v19, %v68_v22  ;;  %v3151_v17 = vld [vmem:[%s6077_s4 + $0xf0] sm:$0xf]  ;;  %v385_v22 = vld [vmem:[%s6079_s2] sm:$0xff] }
  0x76   :  { %v4232_v26 = vpack.c.bf16 %v385_v22, %v385_v22  ;;  %v3703_v22 = vld [vmem:[%s6077_s4 + $0x54] sm:$0xf] }
  0x7c   :  { %v65_v20 = vpop.permute.xlu0 %64  ;;  %v71_v23 = vpop.permute.xlu1 %70 }
  0x7d   :  { %vm85_vm0 = vcmp.eq.s32.totalorder %v4071_v19, %v65_v20  ;;  %vm87_vm4 = vcmp.eq.s32.totalorder %v4071_v19, %v71_v23  ;;  %v4217_v20 = vor.u32 %v3694_v14, %v3031_v13  ;;  %v4224_v23 = vor.u32 %v3724_v18, %v3151_v17  ;;  %v3705_v13 = vld [vmem:[%s6077_s4 + $0x64] sm:$0xf]  ;;  %v3081_v14 = vld [vmem:[%s6077_s4 + $0x68] sm:$0xf0] }
  0x7e   :  { %vm2957_vm2 = vmpackc.low %vm85_vm0, %vm84_vm1  ;;  %v3145_v17 = vld [vmem:[%s6077_s4 + $0xe8] sm:$0xf0] }
  0x7f   :  { %2958 = vmatmul.msk.bf16.vlgmr.msra.gmra.mxu0 %vm2957_vm2, %v3942_v21  ;;  %vm2959_vm5 = vmpackc.low %vm87_vm4, %vm86_vm3  ;;  %590 = vmatpush.bf16.msra.mxu3 %v4217_v20 }
  0x80   :  { %652 = vmatpush.bf16.msrb.mxu2 %v4217_v20 }
  0x82   :  { %591 = vmatmul.bf16.vlgmr.msra.gmra.mxu3 %v4232_v26 }
  0x83   :  { %596 = vmatpush.bf16.msrb.mxu3 %v4224_v23 }
  0x84   :  { %v83_v15 = vpop.permute.xlu1 %82  ;;  %v80_v16 = vpop.permute.xlu0 %79 }
  0x85   :  { %vm91_vm9 = vcmp.eq.s32.totalorder %v4071_v19, %v83_v15  ;;  %vm90_vm10 = vcmp.eq.s32.totalorder %v4071_v19, %v80_v16  ;;  %v4237_v19 = vor.u32 %v3722_v25, %v3143_v24  ;;  %v3721_v15 = vld [vmem:[%s6077_s4 + $0xe4] sm:$0xf]  ;;  %v4370_v16 = vor.u32 %v3705_v13, %v3081_v14  ;;  %v3073_v24 = vld [vmem:[%s6077_s4 + $0x58] sm:$0xf0]  ;;  %v3719_v25 = vld [vmem:[%s6077_s4 + $0xd4] sm:$0xf] }
  0x86   :  { %vm2963_vm11 = vmpackc.low %vm91_vm9, %vm90_vm10  ;;  %v4375_v18 = vor.u32 %v3721_v15, %v3145_v17  ;;  %v4394_v27 = vor.u32 %v3703_v22, %v3073_v24  ;;  %v3709_v13 = vld [vmem:[%s6077_s4 + $0x84] sm:$0xf]  ;;  %v3097_v14 = vld [vmem:[%s6077_s4 + $0x88] sm:$0xf0]  ;;  %v4502_v15 = vor.u32 %v3693_v7, %v3033_v10 }
  0x87   :  { %597 = vmatpush.bf16.msrb.mxu3 %v4237_v19  ;;  %610 = vmatpush.bf16.msrb.mxu0 %v4370_v16  ;;  %v4506_v17 = vor.u32 %v3709_v13, %v3097_v14 }
  0x88   :  { %623 = vmatpush.bf16.msrb.mxu1 %v4375_v18 }
  0x8b   :  { %598 = vmatpush.bf16.msrb.mxu3 %v4247_v31  ;;  %611 = vmatpush.bf16.msrb.mxu0 %v4394_v27 }
  0x8f   :  { %2960 = vmatmul.msk.bf16.gmra.mxu0 %vm2959_vm5, %v3942_v21 }
  0x90   :  { %612 = vmatpush.bf16.msrb.mxu0 %v4415_v39 }
  0x94   :  { %613 = vmatpush.bf16.msrb.mxu0 %v4437_v50 }
  0x98   :  { %614 = vmatpush.bf16.msrb.mxu0 %v4459_v59 }
  0x9c   :  { %615 = vmatpush.bf16.msrb.mxu0 %v4478_v4 }
  0x9f   :  { %2962 = vmatmul.msk.bf16.gmra.mxu0 %vm2961_vm8, %v3942_v21 }
  0xa0   :  { %616 = vmatpush.bf16.msrb.mxu0 %v4502_v15 }
  0xa4   :  { %671 = vmatpush.bf16.msra.mxu0 %v4350_v9 }
  0xa8   :  { %672 = vmatpush.bf16.msra.mxu0 %v4370_v16 }
  0xac   :  { %673 = vmatpush.bf16.msra.mxu0 %v4394_v27 }
  0xaf   :  { %2964 = vmatmul.msk.bf16.gmra.mxu0 %vm2963_vm11, %v3942_v21  ;;  %v3127_v21 = vld [vmem:[%s6077_s4 + $0xc0] sm:$0xf] }
  0xb0   :  { %v4256_v33 = vor.u32 %v3718_v32, %v3127_v21  ;;  %v4399_v21 = vor.u32 %v3719_v25, %v3137_v29  ;;  %674 = vmatpush.bf16.msra.mxu0 %v4415_v39 }
  0xb2   :  { %599 = vmatpush.bf16.msrb.mxu3 %v4256_v33  ;;  %624 = vmatpush.bf16.msrb.mxu1 %v4399_v21 }
  0xb4   :  { %675 = vmatpush.bf16.msra.mxu0 %v4437_v50 }
  0xb6   :  { %600 = vmatpush.bf16.msrb.mxu3 %v4265_v37  ;;  %625 = vmatpush.bf16.msrb.mxu1 %v4420_v42 }
  0xb8   :  { %676 = vmatpush.bf16.msra.mxu0 %v4459_v59 }
  0xba   :  { %601 = vmatpush.bf16.msrb.mxu3 %v4274_v40  ;;  %626 = vmatpush.bf16.msrb.mxu1 %v4444_v52 }
  0xbc   :  { %677 = vmatpush.bf16.msra.mxu0 %v4478_v4 }
  0xbe   :  { %602 = vmatpush.bf16.msrb.mxu3 %v4283_v43  ;;  %627 = vmatpush.bf16.msrb.mxu1 %v4464_v62 }
  0xbf   :  { %617 = vmatmul.bf16.vlgmr.msrb.gmra.mxu0 %v4232_v26 }
  0xc0   :  { %678 = vmatpush.bf16.msra.mxu0 %v4502_v15 }
  0xc2   :  { %603 = vmatpush.bf16.msrb.mxu3 %v4307_v54  ;;  %628 = vmatpush.bf16.msrb.mxu1 %v4490_v8 }
  0xc4   :  { %733 = vmatpush.bf16.msrb.mxu0 %v4350_v9 }
  0xc5   :  { %604 = vmatmul.bf16.vlgmr.msrb.gmra.mxu3 %v4321_v61 }
  0xc6   :  { %658 = vmatpush.bf16.msra.mxu3 %v4224_v23  ;;  %629 = vmatpush.bf16.msrb.mxu1 %v4506_v17 }
  0xc8   :  { %734 = vmatpush.bf16.msrb.mxu0 %v4370_v16 }
  0xca   :  { %659 = vmatpush.bf16.msra.mxu3 %v4237_v19 }
  0xcc   :  { %735 = vmatpush.bf16.msrb.mxu0 %v4394_v27 }
  0xce   :  { %660 = vmatpush.bf16.msra.mxu3 %v4247_v31 }
  0xd0   :  { %736 = vmatpush.bf16.msrb.mxu0 %v4415_v39 }
  0xd2   :  { %661 = vmatpush.bf16.msra.mxu3 %v4256_v33 }
  0xd4   :  { %737 = vmatpush.bf16.msrb.mxu0 %v4437_v50 }
  0xd6   :  { %662 = vmatpush.bf16.msra.mxu3 %v4265_v37 }
  0xd8   :  { %738 = vmatpush.bf16.msrb.mxu0 %v4459_v59 }
  0xda   :  { %663 = vmatpush.bf16.msra.mxu3 %v4274_v40 }
  0xdc   :  { %739 = vmatpush.bf16.msrb.mxu0 %v4478_v4 }
  0xde   :  { %664 = vmatpush.bf16.msra.mxu3 %v4283_v43 }
  0xe0   :  { %740 = vmatpush.bf16.msrb.mxu0 %v4502_v15 }
  0xe2   :  { %665 = vmatpush.bf16.msra.mxu3 %v4307_v54 }
  0xe6   :  { %720 = vmatpush.bf16.msrb.mxu3 %v4224_v23 }
  0xea   :  { %721 = vmatpush.bf16.msrb.mxu3 %v4237_v19 }
  0xee   :  { %722 = vmatpush.bf16.msrb.mxu3 %v4247_v31 }
  0xf2   :  { %723 = vmatpush.bf16.msrb.mxu3 %v4256_v33 }
  0xf6   :  { %724 = vmatpush.bf16.msrb.mxu3 %v4265_v37 }
  0xfa   :  { %725 = vmatpush.bf16.msrb.mxu3 %v4274_v40 }
  0xfc   :  { %v185_v32 = vpop.f32.mrf.mxu0 }
  0xfe   :  { %726 = vmatpush.bf16.msrb.mxu3 %v4283_v43 }
 0x102   :  { %727 = vmatpush.bf16.msrb.mxu3 %v4307_v54 }
 0x104   :  { %v187_v44 = vpop.f32.mrf.mxu0 }
 0x105   :  { %v205_v45 = vpack.c.bf16 %v187_v44, %v185_v32  ;;  %v592_v32 = vpop.f32.mrf.mxu3  ;;  %v4550_v44 = vperm.slane %v225_v41, 0 }
 0x107   :  { %319 = vmatmul.bf16.vlgmr.msra.gmra.mxu1 %v205_v45  ;;  %348 = vmatmul.bf16.vlgmr.msra.gmra.mxu2 %v205_v45 }
 0x108   :  { %707 = vmatpush.bf16.msra.mxu2 %v4088_v28  ;;  %684 = vmatpush.bf16.msra.mxu1 %v4355_v11 }
 0x10c   :  { %v190_v53 = vpop.f32.mrf.mxu0  ;;  %708 = vmatpush.bf16.msra.mxu2 %v4094_v30  ;;  %685 = vmatpush.bf16.msra.mxu1 %v4375_v18 }
 0x10d   :  { %v594_v36 = vpop.f32.mrf.mxu3 }
 0x110   :  { %709 = vmatpush.bf16.msra.mxu2 %v4106_v34  ;;  %686 = vmatpush.bf16.msra.mxu1 %v4399_v21 }
 0x114   :  { %v192_v63 = vpop.f32.mrf.mxu0  ;;  %710 = vmatpush.bf16.msra.mxu2 %v4136_v49  ;;  %687 = vmatpush.bf16.msra.mxu1 %v4420_v42 }
 0x115   :  { %v206_v0 = vpack.c.bf16 %v192_v63, %v190_v53 }
 0x117   :  { %324 = vmatmul.bf16.gmra.mxu1 %v206_v0  ;;  %353 = vmatmul.bf16.gmra.mxu2 %v206_v0 }
 0x118   :  { %711 = vmatpush.bf16.msra.mxu2 %v4159_v58  ;;  %688 = vmatpush.bf16.msra.mxu1 %v4444_v52 }
 0x11c   :  { %v195_v22 = vpop.f32.mrf.mxu0  ;;  %712 = vmatpush.bf16.msra.mxu2 %v4181_v3  ;;  %689 = vmatpush.bf16.msra.mxu1 %v4464_v62 }
 0x120   :  { %713 = vmatpush.bf16.msra.mxu2 %v4202_v12  ;;  %690 = vmatpush.bf16.msra.mxu1 %v4490_v8 }
 0x124   :  { %v197_v24 = vpop.f32.mrf.mxu0  ;;  %714 = vmatpush.bf16.msra.mxu2 %v4217_v20  ;;  %691 = vmatpush.bf16.msra.mxu1 %v4506_v17 }
 0x125   :  { %v207_v25 = vpack.c.bf16 %v197_v24, %v195_v22 }
 0x127   :  { %329 = vmatmul.bf16.gmra.mxu1 %v207_v25  ;;  %358 = vmatmul.bf16.gmra.mxu2 %v207_v25 }
 0x12c   :  { %v200_v26 = vpop.f32.mrf.mxu0 }
 0x134   :  { %v202_v29 = vpop.f32.mrf.mxu0 }
 0x135   :  { %v208_v35 = vpack.c.bf16 %v202_v29, %v200_v26 }
 0x137   :  { %334 = vmatmul.bf16.gmra.mxu1 %v208_v35  ;;  %363 = vmatmul.bf16.gmra.mxu2 %v208_v35 }
 0x13c   :  { %v618_v7 = vpop.f32.mrf.mxu0 }
 0x144   :  { %v620_v14 = vpop.f32.mrf.mxu0 }
 0x147   :  { %630 = vmatmul.bf16.vlgmr.msrb.gmra.mxu1 %v4321_v61 }
 0x148   :  { %746 = vmatpush.bf16.msrb.mxu1 %v4355_v11  ;;  %v605_v61 = vpop.f32.mrf.mxu3 }
 0x149   :  { %v606_v45 = vadd.f32 %v605_v61, %v592_v32 }
 0x14c   :  { %747 = vmatpush.bf16.msrb.mxu1 %v4375_v18 }
 0x150   :  { %748 = vmatpush.bf16.msrb.mxu1 %v4399_v21  ;;  %v607_v38 = vpop.f32.mrf.mxu3 }
 0x154   :  { %749 = vmatpush.bf16.msrb.mxu1 %v4420_v42 }
 0x158   :  { %750 = vmatpush.bf16.msrb.mxu1 %v4444_v52 }
 0x15c   :  { %751 = vmatpush.bf16.msrb.mxu1 %v4464_v62 }
 0x160   :  { %752 = vmatpush.bf16.msrb.mxu1 %v4490_v8 }
 0x164   :  { %753 = vmatpush.bf16.msrb.mxu1 %v4506_v17 }
 0x184   :  { %v320_v46 = vpop.f32.mrf.mxu1 }
 0x185   :  { %v321_v47 = vadd.f32 %v320_v46, %v4550_v44 }
 0x187   :  { %v635_v48 = vadd.f32 %v606_v45, %v321_v47 }
 0x189   :  { %3859 = vtanh.f32 %v635_v48 }
 0x18a   :  { %v349_v53 = vpop.f32.mrf.mxu2 }
 0x18b   :  { %v4556_v55 = vadd.f32 %v349_v53, %v4553_v51 }
 0x18c   :  { %v4558_v56 = vpop.f32.mrf.mxu1 }
 0x18f   :  { %v4560_v57 = vpop.eup %3859 }
 0x190   :  { %v643_v60 = vpack.c.bf16 %v4560_v57, %v4560_v57 }
 0x192   :  { %v4564_v63 = vpop.f32.mrf.mxu2  ;;  %653 = vmatmul.bf16.vlgmr.msrb.gmra.mxu2 %v643_v60  ;;  %679 = vmatmul.bf16.vlgmr.msra.gmra.mxu0 %v643_v60 }
 0x193   :  { %769 = vmatpush.bf16.msrb.mxu2 %v4088_v28  ;;  %795 = vmatpush.bf16.msra.mxu0 %v4350_v9 }
 0x194   :  { %v325_v0 = vpop.f32.mrf.mxu1 }
 0x195   :  { %v4569_v1 = vadd.f32 %v325_v0, %v4550_v44 }
 0x197   :  { %770 = vmatpush.bf16.msrb.mxu2 %v4094_v30  ;;  %796 = vmatpush.bf16.msra.mxu0 %v4370_v16 }
 0x19a   :  { %v354_v2 = vpop.f32.mrf.mxu2 }
 0x19b   :  { %v4574_v5 = vadd.f32 %v354_v2, %v4553_v51  ;;  %771 = vmatpush.bf16.msrb.mxu2 %v4106_v34  ;;  %797 = vmatpush.bf16.msra.mxu0 %v4394_v27 }
 0x19c   :  { %v4578_v6 = vpop.f32.mrf.mxu1 }
 0x19f   :  { %772 = vmatpush.bf16.msrb.mxu2 %v4136_v49  ;;  %798 = vmatpush.bf16.msra.mxu0 %v4415_v39 }
 0x1a2   :  { %v4582_v10 = vpop.f32.mrf.mxu2 }
 0x1a3   :  { %773 = vmatpush.bf16.msrb.mxu2 %v4159_v58  ;;  %799 = vmatpush.bf16.msra.mxu0 %v4437_v50 }
 0x1a4   :  { %v330_v13 = vpop.f32.mrf.mxu1 }
 0x1a5   :  { %v4587_v22 = vadd.f32 %v330_v13, %v4550_v44 }
 0x1a7   :  { %774 = vmatpush.bf16.msrb.mxu2 %v4181_v3  ;;  %800 = vmatpush.bf16.msra.mxu0 %v4459_v59 }
 0x1aa   :  { %v359_v24 = vpop.f32.mrf.mxu2 }
 0x1ab   :  { %v4592_v25 = vadd.f32 %v359_v24, %v4553_v51  ;;  %775 = vmatpush.bf16.msrb.mxu2 %v4202_v12  ;;  %801 = vmatpush.bf16.msra.mxu0 %v4478_v4 }
 0x1ac   :  { %v4596_v26 = vpop.f32.mrf.mxu1 }
 0x1af   :  { %776 = vmatpush.bf16.msrb.mxu2 %v4217_v20  ;;  %802 = vmatpush.bf16.msra.mxu0 %v4502_v15 }
 0x1b2   :  { %v4600_v29 = vpop.f32.mrf.mxu2 }
 0x1b4   :  { %v335_v32 = vpop.f32.mrf.mxu1 }
 0x1b5   :  { %v4603_v35 = vadd.f32 %v335_v32, %v4550_v44 }
 0x1ba   :  { %v364_v36 = vpop.f32.mrf.mxu2 }
 0x1bb   :  { %v365_v61 = vadd.f32 %v364_v36, %v4553_v51 }
 0x1bc   :  { %v4606_v38 = vpop.f32.mrf.mxu1 }
 0x1c2   :  { %v366_v41 = vpop.f32.mrf.mxu2 }
 0x1c3   :  { %v367_v46 = vadd.f32 %v366_v41, %v4553_v51 }
 0x1c4   :  { %v631_v45 = vpop.f32.mrf.mxu1 }
 0x1c5   :  { %v632_v47 = vadd.f32 %v631_v45, %v618_v7  ;;  %v323_v45 = vadd.f32 %v4558_v56, %v4550_v44 }
 0x1c7   :  { %v636_v48 = vadd.f32 %v632_v47, %v367_v46 }
 0x1c9   :  { %3861 = vtanh.f32 %v636_v48 }
 0x1cc   :  { %v633_v53 = vpop.f32.mrf.mxu1 }
 0x1cf   :  { %v4609_v60 = vpop.eup %3861 }
 0x1d0   :  { %6092 = vst [vmem:[#allocation4_spill] sm:$0xff] %v4609_v60  ;;  %v644_v0 = vpack.c.bf16 %v4609_v60, %v4609_v60 }
 0x1d2   :  { %666 = vmatmul.bf16.vlgmr.msra.gmra.mxu3 %v644_v0  ;;  %692 = vmatmul.bf16.vlgmr.msra.gmra.mxu1 %v644_v0 }
 0x1d3   :  { %782 = vmatpush.bf16.msra.mxu3 %v4224_v23  ;;  %808 = vmatpush.bf16.msra.mxu1 %v4355_v11 }
 0x1d7   :  { %783 = vmatpush.bf16.msra.mxu3 %v4237_v19  ;;  %809 = vmatpush.bf16.msra.mxu1 %v4375_v18 }
 0x1db   :  { %784 = vmatpush.bf16.msra.mxu3 %v4247_v31  ;;  %810 = vmatpush.bf16.msra.mxu1 %v4399_v21 }
 0x1df   :  { %785 = vmatpush.bf16.msra.mxu3 %v4256_v33  ;;  %811 = vmatpush.bf16.msra.mxu1 %v4420_v42 }
 0x1e3   :  { %786 = vmatpush.bf16.msra.mxu3 %v4265_v37  ;;  %812 = vmatpush.bf16.msra.mxu1 %v4444_v52 }
 0x1e7   :  { %787 = vmatpush.bf16.msra.mxu3 %v4274_v40  ;;  %813 = vmatpush.bf16.msra.mxu1 %v4464_v62 }
 0x1eb   :  { %788 = vmatpush.bf16.msra.mxu3 %v4283_v43  ;;  %814 = vmatpush.bf16.msra.mxu1 %v4490_v8 }
 0x1ef   :  { %789 = vmatpush.bf16.msra.mxu3 %v4307_v54  ;;  %815 = vmatpush.bf16.msra.mxu1 %v4506_v17 }
 0x20f   :  { %v680_v2 = vpop.f32.mrf.mxu0 }
 0x215   :  { %v654_v7 = vpop.f32.mrf.mxu2 }
 0x217   :  { %v682_v13 = vpop.f32.mrf.mxu0 }
 0x218   :  { %v362_v13 = vadd.f32 %v4600_v29, %v4553_v51 }
 0x21d   :  { %v656_v14 = vpop.f32.mrf.mxu2 }
 0x24f   :  { %v693_v24 = vpop.f32.mrf.mxu1 }
 0x250   :  { %v694_v32 = vadd.f32 %v693_v24, %v680_v2 }
 0x252   :  { %v698_v36 = vadd.f32 %v694_v32, %v365_v61 }
 0x254   :  { %3863 = vtanh.f32 %v698_v36 }
 0x255   :  { %v667_v41 = vpop.f32.mrf.mxu3 }
 0x256   :  { %v668_v46 = vadd.f32 %v667_v41, %v654_v7 }
 0x257   :  { %v695_v47 = vpop.f32.mrf.mxu1 }
 0x258   :  { %v697_v48 = vadd.f32 %v668_v46, %v323_v45 }
 0x25a   :  { %v4631_v53 = vpop.eup %3863  ;;  %3865 = vtanh.f32 %v697_v48 }
 0x25b   :  { %v706_v0 = vpack.c.bf16 %v4631_v53, %v4631_v53 }
 0x25d   :  { %v669_v60 = vpop.f32.mrf.mxu3  ;;  %728 = vmatmul.bf16.vlgmr.msrb.gmra.mxu3 %v706_v0  ;;  %754 = vmatmul.bf16.vlgmr.msrb.gmra.mxu1 %v706_v0 }
 0x25e   :  { %844 = vmatpush.bf16.msrb.mxu3 %v4224_v23  ;;  %870 = vmatpush.bf16.msrb.mxu1 %v4355_v11 }
 0x260   :  { %v4637_v61 = vpop.eup %3865 }
 0x261   :  { %v705_v56 = vpack.c.bf16 %v4637_v61, %v4637_v61 }
 0x262   :  { %845 = vmatpush.bf16.msrb.mxu3 %v4237_v19  ;;  %871 = vmatpush.bf16.msrb.mxu1 %v4375_v18 }
 0x263   :  { %715 = vmatmul.bf16.vlgmr.msra.gmra.mxu2 %v705_v56  ;;  %741 = vmatmul.bf16.vlgmr.msrb.gmra.mxu0 %v705_v56 }
 0x264   :  { %831 = vmatpush.bf16.msra.mxu2 %v4088_v28  ;;  %857 = vmatpush.bf16.msrb.mxu0 %v4350_v9 }
 0x266   :  { %846 = vmatpush.bf16.msrb.mxu3 %v4247_v31  ;;  %872 = vmatpush.bf16.msrb.mxu1 %v4399_v21 }
 0x268   :  { %832 = vmatpush.bf16.msra.mxu2 %v4094_v30  ;;  %858 = vmatpush.bf16.msrb.mxu0 %v4370_v16 }
 0x26a   :  { %847 = vmatpush.bf16.msrb.mxu3 %v4256_v33  ;;  %873 = vmatpush.bf16.msrb.mxu1 %v4420_v42 }
 0x26c   :  { %833 = vmatpush.bf16.msra.mxu2 %v4106_v34  ;;  %859 = vmatpush.bf16.msrb.mxu0 %v4394_v27 }
 0x26e   :  { %848 = vmatpush.bf16.msrb.mxu3 %v4265_v37  ;;  %874 = vmatpush.bf16.msrb.mxu1 %v4444_v52 }
 0x270   :  { %834 = vmatpush.bf16.msra.mxu2 %v4136_v49  ;;  %860 = vmatpush.bf16.msrb.mxu0 %v4415_v39 }
 0x272   :  { %849 = vmatpush.bf16.msrb.mxu3 %v4274_v40  ;;  %875 = vmatpush.bf16.msrb.mxu1 %v4464_v62 }
 0x274   :  { %835 = vmatpush.bf16.msra.mxu2 %v4159_v58  ;;  %861 = vmatpush.bf16.msrb.mxu0 %v4437_v50 }
 0x276   :  { %850 = vmatpush.bf16.msrb.mxu3 %v4283_v43  ;;  %876 = vmatpush.bf16.msrb.mxu1 %v4490_v8 }
 0x278   :  { %836 = vmatpush.bf16.msra.mxu2 %v4181_v3  ;;  %862 = vmatpush.bf16.msrb.mxu0 %v4459_v59 }
 0x27a   :  { %851 = vmatpush.bf16.msrb.mxu3 %v4307_v54  ;;  %877 = vmatpush.bf16.msrb.mxu1 %v4506_v17 }
 0x27c   :  { %837 = vmatpush.bf16.msra.mxu2 %v4202_v12  ;;  %863 = vmatpush.bf16.msrb.mxu0 %v4478_v4 }
 0x280   :  { %838 = vmatpush.bf16.msra.mxu2 %v4217_v20  ;;  %864 = vmatpush.bf16.msrb.mxu0 %v4502_v15 }
 0x2da   :  { %v755_v60 = vpop.f32.mrf.mxu1 }
 0x2e0   :  { %v729_v2 = vpop.f32.mrf.mxu3  ;;  %v742_v7 = vpop.f32.mrf.mxu0 }
 0x2e1   :  { %v756_v14 = vadd.f32 %v755_v60, %v742_v7 }
 0x2e2   :  { %v757_v24 = vpop.f32.mrf.mxu1 }
 0x2e3   :  { %v760_v32 = vadd.f32 %v756_v14, %v362_v13 }
 0x2e5   :  { %3867 = vtanh.f32 %v760_v32 }
 0x2e6   :  { %v716_v36 = vpop.f32.mrf.mxu2 }
 0x2e7   :  { %v730_v41 = vadd.f32 %v729_v2, %v716_v36  ;;  %v328_v36 = vadd.f32 %v4578_v6, %v4550_v44 }
 0x2e8   :  { %v731_v45 = vpop.f32.mrf.mxu3  ;;  %v744_v46 = vpop.f32.mrf.mxu0 }
 0x2e9   :  { %v759_v47 = vadd.f32 %v730_v41, %v4569_v1 }
 0x2eb   :  { %v4674_v48 = vpop.eup %3867  ;;  %3869 = vtanh.f32 %v759_v47 }
 0x2ec   :  { %v768_v0 = vpack.c.bf16 %v4674_v48, %v4674_v48 }
 0x2ee   :  { %v718_v56 = vpop.f32.mrf.mxu2  ;;  %790 = vmatmul.bf16.vlgmr.msra.gmra.mxu3 %v768_v0  ;;  %816 = vmatmul.bf16.vlgmr.msra.gmra.mxu1 %v768_v0 }
 0x2ef   :  { %906 = vmatpush.bf16.msra.mxu3 %v4224_v23  ;;  %932 = vmatpush.bf16.msra.mxu1 %v4355_v11 }
 0x2f1   :  { %v4680_v29 = vpop.eup %3869 }
 0x2f2   :  { %v767_v60 = vpack.c.bf16 %v4680_v29, %v4680_v29 }
 0x2f3   :  { %907 = vmatpush.bf16.msra.mxu3 %v4237_v19  ;;  %933 = vmatpush.bf16.msra.mxu1 %v4375_v18 }
 0x2f4   :  { %777 = vmatmul.bf16.vlgmr.msrb.gmra.mxu2 %v767_v60  ;;  %803 = vmatmul.bf16.vlgmr.msra.gmra.mxu0 %v767_v60 }
 0x2f5   :  { %893 = vmatpush.bf16.msrb.mxu2 %v4088_v28  ;;  %919 = vmatpush.bf16.msra.mxu0 %v4350_v9 }
 0x2f7   :  { %908 = vmatpush.bf16.msra.mxu3 %v4247_v31  ;;  %934 = vmatpush.bf16.msra.mxu1 %v4399_v21 }
 0x2f9   :  { %894 = vmatpush.bf16.msrb.mxu2 %v4094_v30  ;;  %920 = vmatpush.bf16.msra.mxu0 %v4370_v16 }
 0x2fb   :  { %909 = vmatpush.bf16.msra.mxu3 %v4256_v33  ;;  %935 = vmatpush.bf16.msra.mxu1 %v4420_v42 }
 0x2fd   :  { %895 = vmatpush.bf16.msrb.mxu2 %v4106_v34  ;;  %921 = vmatpush.bf16.msra.mxu0 %v4394_v27 }
 0x2ff   :  { %910 = vmatpush.bf16.msra.mxu3 %v4265_v37  ;;  %936 = vmatpush.bf16.msra.mxu1 %v4444_v52 }
 0x301   :  { %896 = vmatpush.bf16.msrb.mxu2 %v4136_v49  ;;  %922 = vmatpush.bf16.msra.mxu0 %v4415_v39 }
 0x303   :  { %911 = vmatpush.bf16.msra.mxu3 %v4274_v40  ;;  %937 = vmatpush.bf16.msra.mxu1 %v4464_v62 }
 0x305   :  { %897 = vmatpush.bf16.msrb.mxu2 %v4159_v58  ;;  %923 = vmatpush.bf16.msra.mxu0 %v4437_v50 }
 0x307   :  { %912 = vmatpush.bf16.msra.mxu3 %v4283_v43  ;;  %938 = vmatpush.bf16.msra.mxu1 %v4490_v8 }
 0x309   :  { %898 = vmatpush.bf16.msrb.mxu2 %v4181_v3  ;;  %924 = vmatpush.bf16.msra.mxu0 %v4459_v59 }
 0x30b   :  { %913 = vmatpush.bf16.msra.mxu3 %v4307_v54  ;;  %939 = vmatpush.bf16.msra.mxu1 %v4506_v17 }
 0x30d   :  { %899 = vmatpush.bf16.msrb.mxu2 %v4202_v12  ;;  %925 = vmatpush.bf16.msra.mxu0 %v4478_v4 }
 0x311   :  { %900 = vmatpush.bf16.msrb.mxu2 %v4217_v20  ;;  %926 = vmatpush.bf16.msra.mxu0 %v4502_v15 }
 0x36b   :  { %v817_v1 = vpop.f32.mrf.mxu1 }
 0x371   :  { %v791_v2 = vpop.f32.mrf.mxu3  ;;  %v804_v7 = vpop.f32.mrf.mxu0 }
 0x372   :  { %v818_v13 = vadd.f32 %v817_v1, %v804_v7 }
 0x373   :  { %v819_v14 = vpop.f32.mrf.mxu1 }
 0x374   :  { %v822_v24 = vadd.f32 %v818_v13, %v4592_v25  ;;  %v357_v13 = vadd.f32 %v4582_v10, %v4553_v51 }
 0x376   :  { %3871 = vtanh.f32 %v822_v24 }
 0x377   :  { %v778_v32 = vpop.f32.mrf.mxu2 }
 0x378   :  { %v792_v41 = vadd.f32 %v791_v2, %v778_v32 }
 0x379   :  { %v793_v45 = vpop.f32.mrf.mxu3  ;;  %v806_v46 = vpop.f32.mrf.mxu0 }
 0x37a   :  { %v821_v47 = vadd.f32 %v792_v41, %v328_v36 }
 0x37c   :  { %v4717_v0 = vpop.eup %3871  ;;  %3873 = vtanh.f32 %v821_v47 }
 0x37d   :  { %v830_v56 = vpack.c.bf16 %v4717_v0, %v4717_v0 }
 0x37f   :  { %v780_v60 = vpop.f32.mrf.mxu2  ;;  %852 = vmatmul.bf16.vlgmr.msrb.gmra.mxu3 %v830_v56  ;;  %878 = vmatmul.bf16.vlgmr.msrb.gmra.mxu1 %v830_v56 }
 0x380   :  { %968 = vmatpush.bf16.msrb.mxu3 %v4224_v23  ;;  %994 = vmatpush.bf16.msrb.mxu1 %v4355_v11 }
 0x382   :  { %v4723_v25 = vpop.eup %3873 }
 0x383   :  { %v829_v6 = vpack.c.bf16 %v4723_v25, %v4723_v25 }
 0x384   :  { %969 = vmatpush.bf16.msrb.mxu3 %v4237_v19  ;;  %995 = vmatpush.bf16.msrb.mxu1 %v4375_v18 }
 0x385   :  { %839 = vmatmul.bf16.vlgmr.msra.gmra.mxu2 %v829_v6  ;;  %865 = vmatmul.bf16.vlgmr.msrb.gmra.mxu0 %v829_v6 }
 0x386   :  { %955 = vmatpush.bf16.msra.mxu2 %v4088_v28  ;;  %981 = vmatpush.bf16.msrb.mxu0 %v4350_v9 }
 0x388   :  { %970 = vmatpush.bf16.msrb.mxu3 %v4247_v31  ;;  %996 = vmatpush.bf16.msrb.mxu1 %v4399_v21 }
 0x38a   :  { %956 = vmatpush.bf16.msra.mxu2 %v4094_v30  ;;  %982 = vmatpush.bf16.msrb.mxu0 %v4370_v16 }
 0x38c   :  { %971 = vmatpush.bf16.msrb.mxu3 %v4256_v33  ;;  %997 = vmatpush.bf16.msrb.mxu1 %v4420_v42 }
 0x38e   :  { %957 = vmatpush.bf16.msra.mxu2 %v4106_v34  ;;  %983 = vmatpush.bf16.msrb.mxu0 %v4394_v27 }
 0x390   :  { %972 = vmatpush.bf16.msrb.mxu3 %v4265_v37  ;;  %998 = vmatpush.bf16.msrb.mxu1 %v4444_v52 }
 0x392   :  { %958 = vmatpush.bf16.msra.mxu2 %v4136_v49  ;;  %984 = vmatpush.bf16.msrb.mxu0 %v4415_v39 }
 0x394   :  { %973 = vmatpush.bf16.msrb.mxu3 %v4274_v40  ;;  %999 = vmatpush.bf16.msrb.mxu1 %v4464_v62 }
 0x396   :  { %959 = vmatpush.bf16.msra.mxu2 %v4159_v58  ;;  %985 = vmatpush.bf16.msrb.mxu0 %v4437_v50 }
 0x398   :  { %974 = vmatpush.bf16.msrb.mxu3 %v4283_v43  ;;  %1000 = vmatpush.bf16.msrb.mxu1 %v4490_v8 }
 0x39a   :  { %960 = vmatpush.bf16.msra.mxu2 %v4181_v3  ;;  %986 = vmatpush.bf16.msrb.mxu0 %v4459_v59 }
 0x39c   :  { %975 = vmatpush.bf16.msrb.mxu3 %v4307_v54  ;;  %1001 = vmatpush.bf16.msrb.mxu1 %v4506_v17 }
 0x39e   :  { %961 = vmatpush.bf16.msra.mxu2 %v4202_v12  ;;  %987 = vmatpush.bf16.msrb.mxu0 %v4478_v4 }
 0x3a2   :  { %962 = vmatpush.bf16.msra.mxu2 %v4217_v20  ;;  %988 = vmatpush.bf16.msrb.mxu0 %v4502_v15 }
 0x3fc   :  { %v879_v1 = vpop.f32.mrf.mxu1 }
 0x402   :  { %v853_v2 = vpop.f32.mrf.mxu3  ;;  %v866_v7 = vpop.f32.mrf.mxu0 }
 0x403   :  { %v880_v14 = vadd.f32 %v879_v1, %v866_v7  ;;  %v3734_v7 = vld [vmem:[%s6081_s6 + $0x44] sm:$0xf0] }
 0x404   :  { %v881_v24 = vpop.f32.mrf.mxu1 }
 0x405   :  { %v884_v32 = vadd.f32 %v880_v14, %v357_v13  ;;  %v3733_v13 = vld [vmem:[%s6081_s6 + $0x44] sm:$0xf]  ;;  %v3193_v24 = vld [vmem:[%s6081_s6 + $0x48] sm:$0xf0] }
 0x407   :  { %3875 = vtanh.f32 %v884_v32  ;;  %v3196_v32 = vor.u32 %v3733_v13, %v3193_v24  ;;  %v3281_v13 = vld [vmem:[%s6081_s6 + $0xf8] sm:$0xf0]  ;;  %v3753_v24 = vld [vmem:[%s6081_s6 + $0xe4] sm:$0xf] }
 0x408   :  { %v840_v36 = vpop.f32.mrf.mxu2 }
 0x409   :  { %v854_v41 = vadd.f32 %v853_v2, %v840_v36  ;;  %v3191_v2 = vld [vmem:[%s6081_s6 + $0x40] sm:$0xf]  ;;  %v3183_v36 = vld [vmem:[%s6081_s6 + $0x30] sm:$0xf] }
 0x40a   :  { %v855_v45 = vpop.f32.mrf.mxu3  ;;  %v868_v46 = vpop.f32.mrf.mxu0  ;;  %v3192_v14 = vor.u32 %v3734_v7, %v3191_v2  ;;  %v3755_v2 = vld [vmem:[%s6081_s6 + $0xf4] sm:$0xf] }
 0x40b   :  { %v883_v47 = vadd.f32 %v854_v41, %v4587_v22  ;;  %v3201_v22 = vld [vmem:[%s6081_s6 + $0x58] sm:$0xf0]  ;;  %v3732_v41 = vld [vmem:[%s6081_s6 + $0x34] sm:$0xf0]  ;;  %v3731_v45 = vld [vmem:[%s6081_s6 + $0x34] sm:$0xf] }
 0x40c   :  { %v3184_v46 = vor.u32 %v3732_v41, %v3183_v36 }
 0x40d   :  { %v4760_v56 = vpop.eup %3875  ;;  %3877 = vtanh.f32 %v883_v47  ;;  %v3185_v47 = vld [vmem:[%s6081_s6 + $0x38] sm:$0xf0] }
 0x40e   :  { %v892_v60 = vpack.c.bf16 %v4760_v56, %v4760_v56 }
 0x410   :  { %v842_v6 = vpop.f32.mrf.mxu2  ;;  %914 = vmatmul.bf16.vlgmr.msra.gmra.mxu3 %v892_v60  ;;  %940 = vmatmul.bf16.vlgmr.msra.gmra.mxu1 %v892_v60  ;;  %v3188_v60 = vor.u32 %v3731_v45, %v3185_v47  ;;  %v3263_v45 = vld [vmem:[%s6081_s6 + $0xd0] sm:$0xf]  ;;  %v3751_v47 = vld [vmem:[%s6081_s6 + $0xd4] sm:$0xf] }
 0x411   :  { %1030 = vmatpush.bf16.msra.mxu3 %v4224_v23  ;;  %1056 = vmatpush.bf16.msra.mxu1 %v4355_v11  ;;  %v3215_v11 = vld [vmem:[%s6081_s6 + $0x70] sm:$0xf]  ;;  %v3175_v6 = vld [vmem:[%s6081_s6 + $0x20] sm:$0xf] }
 0x413   :  { %v4766_v10 = vpop.eup %3877 }
 0x414   :  { %v891_v1 = vpack.c.bf16 %v4766_v10, %v4766_v10 }
 0x415   :  { %1031 = vmatpush.bf16.msra.mxu3 %v4237_v19  ;;  %1057 = vmatpush.bf16.msra.mxu1 %v4375_v18  ;;  %v333_v19 = vadd.f32 %v4596_v26, %v4550_v44  ;;  %v3739_v18 = vld [vmem:[%s6081_s6 + $0x74] sm:$0xf] }
 0x416   :  { %901 = vmatmul.bf16.vlgmr.msrb.gmra.mxu2 %v891_v1  ;;  %927 = vmatmul.bf16.vlgmr.msra.gmra.mxu0 %v891_v1  ;;  %v3730_v1 = vld [vmem:[%s6081_s6 + $0x24] sm:$0xf0] }
 0x417   :  { %1017 = vmatpush.bf16.msrb.mxu2 %v4088_v28  ;;  %1043 = vmatpush.bf16.msra.mxu0 %v4350_v9 }
 0x419   :  { %1032 = vmatpush.bf16.msra.mxu3 %v4247_v31  ;;  %1058 = vmatpush.bf16.msra.mxu1 %v4399_v21  ;;  %v3217_v21 = vld [vmem:[%s6081_s6 + $0x78] sm:$0xf0] }
 0x41b   :  { %1018 = vmatpush.bf16.msrb.mxu2 %v4094_v30  ;;  %1044 = vmatpush.bf16.msra.mxu0 %v4370_v16  ;;  %v3740_v16 = vld [vmem:[%s6081_s6 + $0x74] sm:$0xf0] }
 0x41d   :  { %1033 = vmatpush.bf16.msra.mxu3 %v4256_v33  ;;  %1059 = vmatpush.bf16.msra.mxu1 %v4420_v42  ;;  %v3207_v42 = vld [vmem:[%s6081_s6 + $0x60] sm:$0xf] }
 0x41f   :  { %1019 = vmatpush.bf16.msrb.mxu2 %v4106_v34  ;;  %1045 = vmatpush.bf16.msra.mxu0 %v4394_v27  ;;  %v3216_v27 = vor.u32 %v3740_v16, %v3215_v11 }
 0x421   :  { %1034 = vmatpush.bf16.msra.mxu3 %v4265_v37  ;;  %1060 = vmatpush.bf16.msra.mxu1 %v4444_v52  ;;  %v3737_v52 = vld [vmem:[%s6081_s6 + $0x64] sm:$0xf] }
 0x423   :  { %1020 = vmatpush.bf16.msrb.mxu2 %v4136_v49  ;;  %1046 = vmatpush.bf16.msra.mxu0 %v4415_v39  ;;  %v3220_v39 = vor.u32 %v3739_v18, %v3217_v21  ;;  %v352_v21 = vadd.f32 %v4564_v63, %v4553_v51 }
 0x425   :  { %1035 = vmatpush.bf16.msra.mxu3 %v4274_v40  ;;  %1061 = vmatpush.bf16.msra.mxu1 %v4464_v62  ;;  %v3209_v62 = vld [vmem:[%s6081_s6 + $0x68] sm:$0xf0] }
 0x427   :  { %1021 = vmatpush.bf16.msrb.mxu2 %v4159_v58  ;;  %1047 = vmatpush.bf16.msra.mxu0 %v4437_v50  ;;  %v3738_v50 = vld [vmem:[%s6081_s6 + $0x64] sm:$0xf0] }
 0x429   :  { %1036 = vmatpush.bf16.msra.mxu3 %v4283_v43  ;;  %1062 = vmatpush.bf16.msra.mxu1 %v4490_v8  ;;  %v3199_v8 = vld [vmem:[%s6081_s6 + $0x50] sm:$0xf] }
 0x42b   :  { %1022 = vmatpush.bf16.msrb.mxu2 %v4181_v3  ;;  %1048 = vmatpush.bf16.msra.mxu0 %v4459_v59  ;;  %v3208_v59 = vor.u32 %v3738_v50, %v3207_v42 }
 0x42d   :  { %1037 = vmatpush.bf16.msra.mxu3 %v4307_v54  ;;  %1063 = vmatpush.bf16.msra.mxu1 %v4506_v17  ;;  %v3735_v17 = vld [vmem:[%s6081_s6 + $0x54] sm:$0xf] }
 0x42e   :  { %v3204_v26 = vor.u32 %v3735_v17, %v3201_v22  ;;  %v1091_v22 = vpack.c.bf16 %v4637_v61, %v4560_v57  ;;  %v3271_v57 = vld [vmem:[%s6081_s6 + $0xe0] sm:$0xf]  ;;  %v3754_v61 = vld [vmem:[%s6081_s6 + $0xe4] sm:$0xf0] }
 0x42f   :  { %1023 = vmatpush.bf16.msrb.mxu2 %v4202_v12  ;;  %1049 = vmatpush.bf16.msra.mxu0 %v4478_v4  ;;  %v3212_v4 = vor.u32 %v3737_v52, %v3209_v62  ;;  %v3272_v36 = vor.u32 %v3754_v61, %v3271_v57  ;;  %v3225_v61 = vld [vmem:[%s6081_s6 + $0x88] sm:$0xf0] }
 0x433   :  { %1024 = vmatpush.bf16.msrb.mxu2 %v4217_v20  ;;  %1050 = vmatpush.bf16.msra.mxu0 %v4502_v15  ;;  %v3736_v15 = vld [vmem:[%s6081_s6 + $0x54] sm:$0xf0] }
 0x48d   :  { %v941_v28 = vpop.f32.mrf.mxu1 }
 0x493   :  { %v915_v30 = vpop.f32.mrf.mxu3  ;;  %v928_v34 = vpop.f32.mrf.mxu0 }
 0x494   :  { %v942_v49 = vadd.f32 %v941_v28, %v928_v34  ;;  %v3729_v28 = vld [vmem:[%s6081_s6 + $0x24] sm:$0xf]  ;;  %v3177_v34 = vld [vmem:[%s6081_s6 + $0x28] sm:$0xf0] }
 0x495   :  { %v943_v58 = vpop.f32.mrf.mxu1 }
 0x496   :  { %v946_v3 = vadd.f32 %v942_v49, %v4574_v5  ;;  %v3200_v5 = vor.u32 %v3736_v15, %v3199_v8  ;;  %v3180_v49 = vor.u32 %v3729_v28, %v3177_v34  ;;  %v3167_v58 = vld [vmem:[%s6081_s6 + $0x10] sm:$0xf]  ;;  %v1093_v28 = vpack.c.bf16 %v4723_v25, %v4680_v29  ;;  %v3255_v34 = vld [vmem:[%s6081_s6 + $0xc0] sm:$0xf]  ;;  %v3257_v25 = vld [vmem:[%s6081_s6 + $0xc8] sm:$0xf0] }
 0x498   :  { %3879 = vtanh.f32 %v946_v3  ;;  %v3728_v3 = vld [vmem:[%s6081_s6 + $0x14] sm:$0xf0] }
 0x499   :  { %v902_v23 = vpop.f32.mrf.mxu2 }
 0x49a   :  { %v916_v31 = vadd.f32 %v915_v30, %v902_v23  ;;  %v3176_v30 = vor.u32 %v3730_v1, %v3175_v6  ;;  %v3727_v23 = vld [vmem:[%s6081_s6 + $0x14] sm:$0xf] }
 0x49b   :  { %v917_v12 = vpop.f32.mrf.mxu3  ;;  %v930_v33 = vpop.f32.mrf.mxu0 }
 0x49c   :  { %v945_v37 = vadd.f32 %v916_v31, %v333_v19  ;;  %v3169_v19 = vld [vmem:[%s6081_s6 + $0x18] sm:$0xf0]  ;;  %v3168_v31 = vor.u32 %v3728_v3, %v3167_v58  ;;  %v3749_v58 = vld [vmem:[%s6081_s6 + $0xc4] sm:$0xf]  ;;  %v3748_v3 = vld [vmem:[%s6081_s6 + $0xb4] sm:$0xf0] }
 0x49d   :  { %v3172_v33 = vor.u32 %v3727_v23, %v3169_v19  ;;  %v3747_v23 = vld [vmem:[%s6081_s6 + $0xb4] sm:$0xf] }
 0x49e   :  { %v4803_v40 = vpop.eup %3879  ;;  %3881 = vtanh.f32 %v945_v37  ;;  %v3159_v37 = vld [vmem:[%s6081_s6] sm:$0xf] }
 0x49f   :  { %v954_v20 = vpack.c.bf16 %v4803_v40, %v4803_v40 }
 0x4a1   :  { %v904_v43 = vpop.f32.mrf.mxu2  ;;  %976 = vmatmul.bf16.vlgmr.msrb.gmra.mxu3 %v954_v20  ;;  %1002 = vmatmul.bf16.vlgmr.msrb.gmra.mxu1 %v954_v20  ;;  %v3726_v20 = vld [vmem:[%s6081_s6 + $0x4] sm:$0xf0] }
 0x4a2   :  { %v3725_v43 = vld [vmem:[%s6081_s6 + $0x4] sm:$0xf]  ;;  %v3160_v11 = vor.u32 %v3726_v20, %v3159_v37  ;;  %v3746_v37 = vld [vmem:[%s6081_s6 + $0xa4] sm:$0xf0] }
 0x4a3   :  { %v3745_v20 = vld [vmem:[%s6081_s6 + $0xa4] sm:$0xf] }
 0x4a4   :  { %v4807_v54 = vpop.eup %3881 }
 0x4a5   :  { %v953_v9 = vpack.c.bf16 %v4807_v54, %v4807_v54 }
 0x4a7   :  { %963 = vmatmul.bf16.vlgmr.msra.gmra.mxu2 %v953_v9  ;;  %989 = vmatmul.bf16.vlgmr.msrb.gmra.mxu0 %v953_v9  ;;  %v3161_v9 = vld [vmem:[%s6081_s6 + $0x8] sm:$0xf0] }
 0x4a8   :  { %1297 = vmatpush.bf16.msra.mxu2 %v3216_v27  ;;  %1355 = vmatpush.bf16.msrb.mxu0 %v3220_v39  ;;  %v3164_v16 = vor.u32 %v3725_v43, %v3161_v9  ;;  %v3241_v9 = vld [vmem:[%s6081_s6 + $0xa8] sm:$0xf0] }
 0x4ac   :  { %1298 = vmatpush.bf16.msra.mxu2 %v3208_v59  ;;  %1356 = vmatpush.bf16.msrb.mxu0 %v3212_v4 }
 0x4b0   :  { %1299 = vmatpush.bf16.msra.mxu2 %v3200_v5  ;;  %1357 = vmatpush.bf16.msrb.mxu0 %v3204_v26  ;;  %v3756_v26 = vld [vmem:[%s6081_s6 + $0xf4] sm:$0xf0] }
 0x4b4   :  { %1300 = vmatpush.bf16.msra.mxu2 %v3192_v14  ;;  %1358 = vmatpush.bf16.msrb.mxu0 %v3196_v32  ;;  %v3284_v14 = vor.u32 %v3755_v2, %v3281_v13  ;;  %v3273_v32 = vld [vmem:[%s6081_s6 + $0xe8] sm:$0xf0]  ;;  %v3223_v2 = vld [vmem:[%s6081_s6 + $0x80] sm:$0xf]  ;;  %v3741_v13 = vld [vmem:[%s6081_s6 + $0x84] sm:$0xf] }
 0x4b5   :  { %v3276_v41 = vor.u32 %v3753_v24, %v3273_v32  ;;  %v3327_v24 = vld [vmem:[%s6082_s7 + $0x50] sm:$0xf]  ;;  %v3768_v32 = vld [vmem:[%s6082_s7 + $0x54] sm:$0xf0] }
 0x4b6   :  { %1384 = vmatpush.bf16.msrb.mxu1 %v3284_v14  ;;  %v3228_v14 = vor.u32 %v3741_v13, %v3225_v61  ;;  %v3391_v13 = vld [vmem:[%s6082_s7 + $0xd0] sm:$0xf] }
 0x4b8   :  { %1301 = vmatpush.bf16.msra.mxu2 %v3184_v46  ;;  %1359 = vmatpush.bf16.msrb.mxu0 %v3188_v60  ;;  %v3752_v46 = vld [vmem:[%s6081_s6 + $0xd4] sm:$0xf0]  ;;  %v3265_v60 = vld [vmem:[%s6081_s6 + $0xd8] sm:$0xf0] }
 0x4b9   :  { %v3264_v6 = vor.u32 %v3752_v46, %v3263_v45  ;;  %v3268_v1 = vor.u32 %v3751_v47, %v3265_v60  ;;  %v3329_v45 = vld [vmem:[%s6082_s7 + $0x58] sm:$0xf0]  ;;  %v3319_v47 = vld [vmem:[%s6082_s7 + $0x40] sm:$0xf]  ;;  %v3766_v60 = vld [vmem:[%s6082_s7 + $0x44] sm:$0xf0] }
 0x4ba   :  { %1385 = vmatpush.bf16.msrb.mxu1 %v3276_v41  ;;  %v5065_v41 = vor.u32 %v3768_v32, %v3327_v24 }
 0x4bc   :  { %1302 = vmatpush.bf16.msra.mxu2 %v3176_v30  ;;  %1360 = vmatpush.bf16.msrb.mxu0 %v3180_v49  ;;  %v1095_v30 = vpack.c.bf16 %v4807_v54, %v4766_v10  ;;  %v3750_v49 = vld [vmem:[%s6081_s6 + $0xc4] sm:$0xf0]  ;;  %v3260_v10 = vor.u32 %v3749_v58, %v3257_v25  ;;  %v3247_v54 = vld [vmem:[%s6081_s6 + $0xb0] sm:$0xf]  ;;  %v3764_v25 = vld [vmem:[%s6082_s7 + $0x34] sm:$0xf0] }
 0x4bd   :  { %v3256_v29 = vor.u32 %v3750_v49, %v3255_v34  ;;  %v3248_v19 = vor.u32 %v3748_v3, %v3247_v54  ;;  %v3407_v34 = vld [vmem:[%s6082_s7 + $0xf0] sm:$0xf]  ;;  %v3788_v49 = vld [vmem:[%s6082_s7 + $0xf4] sm:$0xf0]  ;;  %v3313_v54 = vld [vmem:[%s6082_s7 + $0x38] sm:$0xf0] }
 0x4be   :  { %1386 = vmatpush.bf16.msrb.mxu1 %v3268_v1  ;;  %v3765_v1 = vld [vmem:[%s6082_s7 + $0x44] sm:$0xf]  ;;  %v3311_v58 = vld [vmem:[%s6082_s7 + $0x30] sm:$0xf]  ;;  %v3787_v3 = vld [vmem:[%s6082_s7 + $0xf4] sm:$0xf] }
 0x4c0   :  { %1303 = vmatpush.bf16.msra.mxu2 %v3168_v31  ;;  %1361 = vmatpush.bf16.msrb.mxu0 %v3172_v33  ;;  %v3249_v31 = vld [vmem:[%s6081_s6 + $0xb8] sm:$0xf0]  ;;  %v3239_v33 = vld [vmem:[%s6081_s6 + $0xa0] sm:$0xf] }
 0x4c1   :  { %v3240_v43 = vor.u32 %v3746_v37, %v3239_v33  ;;  %v3303_v33 = vld [vmem:[%s6082_s7 + $0x20] sm:$0xf]  ;;  %v3762_v37 = vld [vmem:[%s6082_s7 + $0x24] sm:$0xf0] }
 0x4c2   :  { %1387 = vmatpush.bf16.msrb.mxu1 %v3260_v10  ;;  %v3763_v10 = vld [vmem:[%s6082_s7 + $0x34] sm:$0xf] }
 0x4c4   :  { %1304 = vmatpush.bf16.msra.mxu2 %v3160_v11  ;;  %1362 = vmatpush.bf16.msrb.mxu0 %v3164_v16  ;;  %v3244_v11 = vor.u32 %v3745_v20, %v3241_v9  ;;  %v3343_v16 = vld [vmem:[%s6082_s7 + $0x70] sm:$0xf]  ;;  %v3761_v20 = vld [vmem:[%s6082_s7 + $0x24] sm:$0xf]  ;;  %v3786_v9 = vld [vmem:[%s6082_s7 + $0xe4] sm:$0xf0] }
 0x51e   :  { %v1003_v12 = vpop.f32.mrf.mxu1 }
 0x524   :  { %v977_v18 = vpop.f32.mrf.mxu3  ;;  %v990_v27 = vpop.f32.mrf.mxu0 }
 0x525   :  { %v1004_v39 = vadd.f32 %v1003_v12, %v990_v27  ;;  %v3252_v12 = vor.u32 %v3747_v23, %v3249_v31  ;;  %v3771_v27 = vld [vmem:[%s6082_s7 + $0x74] sm:$0xf]  ;;  %v3409_v23 = vld [vmem:[%s6082_s7 + $0xf8] sm:$0xf0]  ;;  %v5120_v31 = vor.u32 %v3763_v10, %v3313_v54  ;;  %v3383_v10 = vld [vmem:[%s6082_s7 + $0xc0] sm:$0xf] }
 0x526   :  { %v1005_v42 = vpop.f32.mrf.mxu1  ;;  %v3782_v54 = vld [vmem:[%s6082_s7 + $0xc4] sm:$0xf0] }
 0x527   :  { %v1008_v50 = vadd.f32 %v1004_v39, %v352_v21  ;;  %1388 = vmatpush.bf16.msrb.mxu1 %v3252_v12  ;;  %v3345_v39 = vld [vmem:[%s6082_s7 + $0x78] sm:$0xf0]  ;;  %v5123_v12 = vor.u32 %v3787_v3, %v3409_v23 }
 0x528   :  { %v5010_v42 = vor.u32 %v3771_v27, %v3345_v39  ;;  %v3785_v39 = vld [vmem:[%s6082_s7 + $0xe4] sm:$0xf] }
 0x529   :  { %3883 = vtanh.f32 %v1008_v50  ;;  %v3231_v50 = vld [vmem:[%s6081_s6 + $0x90] sm:$0xf] }
 0x52a   :  { %v964_v52 = vpop.f32.mrf.mxu2 }
 0x52b   :  { %v978_v59 = vadd.f32 %v977_v18, %v964_v52  ;;  %v3772_v18 = vld [vmem:[%s6082_s7 + $0x74] sm:$0xf0]  ;;  %1389 = vmatpush.bf16.msrb.mxu1 %v3244_v11  ;;  %v5143_v11 = vor.u32 %v3762_v37, %v3303_v33  ;;  %v5230_v33 = vor.u32 %v3782_v54, %v3383_v10  ;;  %v3385_v37 = vld [vmem:[%s6082_s7 + $0xc8] sm:$0xf0]  ;;  %v1096_v54 = vpack.c.bf16 %v4674_v48, %v4717_v0  ;;  %v6093_v48 = vld [vmem:[#allocation4_spill] sm:$0xff] }
 0x52c   :  { %v979_v62 = vpop.f32.mrf.mxu3  ;;  %v992_v4 = vpop.f32.mrf.mxu0  ;;  %v5005_v21 = vor.u32 %v3772_v18, %v3343_v16  ;;  %v3744_v52 = vld [vmem:[%s6081_s6 + $0x94] sm:$0xf0]  ;;  %v3305_v16 = vld [vmem:[%s6082_s7 + $0x28] sm:$0xf0]  ;;  %v1098_v0 = vpack.c.bf16 %v6093_v48, %v4631_v53 }
 0x52d   :  { %v1007_v8 = vadd.f32 %v978_v59, %v4603_v35  ;;  %v3279_v35 = vld [vmem:[%s6081_s6 + $0xf0] sm:$0xf]  ;;  %v3743_v59 = vld [vmem:[%s6081_s6 + $0x94] sm:$0xf]  ;;  %v3232_v62 = vor.u32 %v3744_v52, %v3231_v50  ;;  %v3233_v4 = vld [vmem:[%s6081_s6 + $0x98] sm:$0xf0]  ;;  %v5150_v27 = vor.u32 %v3761_v20, %v3305_v16 }
 0x52e   :  { %v3280_v7 = vor.u32 %v3756_v26, %v3279_v35  ;;  %v3337_v35 = vld [vmem:[%s6082_s7 + $0x68] sm:$0xf0]  ;;  %v3295_v52 = vld [vmem:[%s6082_s7 + $0x10] sm:$0xf] }
 0x52f   :  { %v4910_v15 = vpop.eup %3883  ;;  %3885 = vtanh.f32 %v1007_v8  ;;  %v3236_v8 = vor.u32 %v3743_v59, %v3233_v4  ;;  %v3401_v50 = vld [vmem:[%s6082_s7 + $0xe8] sm:$0xf0]  ;;  %v3760_v4 = vld [vmem:[%s6082_s7 + $0x14] sm:$0xf0] }
 0x530   :  { %v1016_v17 = vpack.c.bf16 %v4910_v15, %v4910_v15  ;;  %1326 = vmatpush.bf16.msrb.mxu3 %v3280_v7  ;;  %v3742_v7 = vld [vmem:[%s6081_s6 + $0x84] sm:$0xf0] }
 0x531   :  { %1390 = vmatpush.bf16.msrb.mxu1 %v3236_v8  ;;  %v3224_v57 = vor.u32 %v3742_v7, %v3223_v2  ;;  %v3759_v8 = vld [vmem:[%s6082_s7 + $0x14] sm:$0xf]  ;;  %v3758_v2 = vld [vmem:[%s6082_s7 + $0x4] sm:$0xf0]  ;;  %v3757_v7 = vld [vmem:[%s6082_s7 + $0x4] sm:$0xf] }
 0x532   :  { %v966_v5 = vpop.f32.mrf.mxu2  ;;  %1038 = vmatmul.bf16.vlgmr.msra.gmra.mxu3 %v1016_v17  ;;  %1064 = vmatmul.bf16.vlgmr.msra.gmra.mxu1 %v1016_v17  ;;  %v3335_v17 = vld [vmem:[%s6082_s7 + $0x60] sm:$0xf] }
 0x533   :  { %v3770_v5 = vld [vmem:[%s6082_s7 + $0x64] sm:$0xf0] }
 0x534   :  { %1327 = vmatpush.bf16.msrb.mxu3 %v3272_v36  ;;  %v3767_v36 = vld [vmem:[%s6082_s7 + $0x54] sm:$0xf] }
 0x535   :  { %v4914_v51 = vpop.eup %3885  ;;  %1391 = vmatpush.bf16.msrb.mxu1 %v3228_v14  ;;  %v5070_v46 = vor.u32 %v3767_v36, %v3329_v45  ;;  %v3289_v14 = vld [vmem:[%s6082_s7 + $0x8] sm:$0xf0] }
 0x536   :  { %v1015_v63 = vpack.c.bf16 %v4914_v51, %v4914_v51  ;;  %v5204_v45 = vor.u32 %v3757_v7, %v3289_v14  ;;  %v3777_v7 = vld [vmem:[%s6082_s7 + $0xa4] sm:$0xf]  ;;  %v1094_v14 = vpack.c.bf16 %v4760_v56, %v4803_v40  ;;  %v3361_v40 = vld [vmem:[%s6082_s7 + $0x98] sm:$0xf0] }
 0x538   :  { %1025 = vmatmul.bf16.vlgmr.msrb.gmra.mxu2 %v1015_v63  ;;  %1051 = vmatmul.bf16.vlgmr.msra.gmra.mxu0 %v1015_v63  ;;  %v3769_v63 = vld [vmem:[%s6082_s7 + $0x64] sm:$0xf] }
 0x539   :  { %1328 = vmatpush.bf16.msrb.mxu3 %v3264_v6  ;;  %1625 = vmatpush.bf16.msrb.mxu2 %v5005_v21  ;;  %v5040_v26 = vor.u32 %v3769_v63, %v3337_v35  ;;  %v5080_v6 = vor.u32 %v3766_v60, %v3319_v47  ;;  %v3287_v35 = vld [vmem:[%s6082_s7] sm:$0xf] }
 0x53a   :  { %1651 = vmatpush.bf16.msra.mxu0 %v5010_v42  ;;  %1664 = vmatpush.bf16.msra.mxu1 %v5123_v12  ;;  %v5197_v61 = vor.u32 %v3758_v2, %v3287_v35  ;;  %v3367_v35 = vld [vmem:[%s6082_s7 + $0xa0] sm:$0xf] }
 0x53d   :  { %1329 = vmatpush.bf16.msrb.mxu3 %v3256_v29  ;;  %v5101_v29 = vor.u32 %v3788_v49, %v3407_v34  ;;  %v3393_v34 = vld [vmem:[%s6082_s7 + $0xd8] sm:$0xf0] }
 0x53e   :  { %1652 = vmatpush.bf16.msra.mxu0 %v5040_v26 }
 0x541   :  { %1330 = vmatpush.bf16.msrb.mxu3 %v3248_v19  ;;  %v5118_v19 = vor.u32 %v3764_v25, %v3311_v58 }
 0x542   :  { %1653 = vmatpush.bf16.msra.mxu0 %v5070_v46 }
 0x545   :  { %1331 = vmatpush.bf16.msrb.mxu3 %v3240_v43  ;;  %v3399_v43 = vld [vmem:[%s6082_s7 + $0xe0] sm:$0xf] }
 0x546   :  { %v5148_v18 = vor.u32 %v3786_v9, %v3399_v43 }
 0x548   :  { %1305 = vmatmul.bf16.vlgmr.msra.gmra.mxu2 %v1091_v22  ;;  %1363 = vmatmul.bf16.vlgmr.msrb.gmra.mxu0 %v1091_v22  ;;  %v5035_v22 = vor.u32 %v3770_v5, %v3335_v17  ;;  %v3297_v17 = vld [vmem:[%s6082_s7 + $0x18] sm:$0xf0]  ;;  %v5175_v5 = vor.u32 %v3760_v4, %v3295_v52 }
 0x549   :  { %1332 = vmatpush.bf16.msrb.mxu3 %v3232_v62  ;;  %v5163_v62 = vor.u32 %v3785_v39, %v3401_v50  ;;  %v5177_v63 = vor.u32 %v3759_v8, %v3297_v17  ;;  %v3375_v39 = vld [vmem:[%s6082_s7 + $0xb0] sm:$0xf]  ;;  %v3780_v50 = vld [vmem:[%s6082_s7 + $0xb4] sm:$0xf0]  ;;  %v3377_v4 = vld [vmem:[%s6082_s7 + $0xb8] sm:$0xf0] }
 0x54a   :  { %1626 = vmatpush.bf16.msrb.mxu2 %v5035_v22  ;;  %v5256_v52 = vor.u32 %v3780_v50, %v3375_v39  ;;  %v1131_v50 = vld [vmem:[%s6083_s8] sm:$0x3] }
 0x54b   :  { %1665 = vmatpush.bf16.msra.mxu1 %v5163_v62 }
 0x54d   :  { %1333 = vmatpush.bf16.msrb.mxu3 %v3224_v57  ;;  %v3784_v57 = vld [vmem:[%s6082_s7 + $0xd4] sm:$0xf0] }
 0x54e   :  { %1627 = vmatpush.bf16.msrb.mxu2 %v5065_v41  ;;  %v5202_v36 = vor.u32 %v3784_v57, %v3391_v13  ;;  %v3369_v13 = vld [vmem:[%s6082_s7 + $0xa8] sm:$0xf0] }
 0x54f   :  { %v5289_v57 = vor.u32 %v3777_v7, %v3369_v13 }
 0x551   :  { %1638 = vmatpush.bf16.msra.mxu3 %v5101_v29 }
 0x552   :  { %1628 = vmatpush.bf16.msrb.mxu2 %v5080_v6 }
 0x555   :  { %1639 = vmatpush.bf16.msra.mxu3 %v5148_v18 }
 0x556   :  { %1629 = vmatpush.bf16.msrb.mxu2 %v5118_v19 }
 0x558   :  { %1310 = vmatmul.bf16.gmra.mxu2 %v1093_v28  ;;  %1368 = vmatmul.bf16.gmra.mxu0 %v1093_v28  ;;  %v3321_v28 = vld [vmem:[%s6082_s7 + $0x48] sm:$0xf0] }
 0x559   :  { %1640 = vmatpush.bf16.msra.mxu3 %v5202_v36 }
 0x55a   :  { %1630 = vmatpush.bf16.msrb.mxu2 %v5143_v11 }
 0x55d   :  { %1641 = vmatpush.bf16.msra.mxu3 %v5230_v33 }
 0x55e   :  { %1631 = vmatpush.bf16.msrb.mxu2 %v5175_v5 }
 0x561   :  { %1642 = vmatpush.bf16.msra.mxu3 %v5256_v52 }
 0x562   :  { %1632 = vmatpush.bf16.msrb.mxu2 %v5197_v61 }
 0x566   :  { %1687 = vmatpush.bf16.msra.mxu2 %v5005_v21 }
 0x568   :  { %1315 = vmatmul.bf16.gmra.mxu2 %v1095_v30  ;;  %1373 = vmatmul.bf16.gmra.mxu0 %v1095_v30  ;;  %v5088_v30 = vor.u32 %v3765_v1, %v3321_v28  ;;  %v3783_v28 = vld [vmem:[%s6082_s7 + $0xd4] sm:$0xf] }
 0x569   :  { %v5218_v49 = vor.u32 %v3783_v28, %v3393_v34  ;;  %v3773_v34 = vld [vmem:[%s6082_s7 + $0x84] sm:$0xf] }
 0x56a   :  { %1654 = vmatpush.bf16.msra.mxu0 %v5088_v30  ;;  %1688 = vmatpush.bf16.msra.mxu2 %v5035_v22 }
 0x56b   :  { %1666 = vmatpush.bf16.msra.mxu1 %v5218_v49 }
 0x56e   :  { %1655 = vmatpush.bf16.msra.mxu0 %v5120_v31  ;;  %1689 = vmatpush.bf16.msra.mxu2 %v5065_v41 }
 0x572   :  { %1656 = vmatpush.bf16.msra.mxu0 %v5150_v27  ;;  %1690 = vmatpush.bf16.msra.mxu2 %v5080_v6 }
 0x576   :  { %1657 = vmatpush.bf16.msra.mxu0 %v5177_v63  ;;  %1691 = vmatpush.bf16.msra.mxu2 %v5118_v19 }
 0x57a   :  { %1658 = vmatpush.bf16.msra.mxu0 %v5204_v45  ;;  %1692 = vmatpush.bf16.msra.mxu2 %v5143_v11 }
 0x57e   :  { %1713 = vmatpush.bf16.msrb.mxu0 %v5010_v42  ;;  %1693 = vmatpush.bf16.msra.mxu2 %v5175_v5 }
 0x582   :  { %1714 = vmatpush.bf16.msrb.mxu0 %v5040_v26  ;;  %1694 = vmatpush.bf16.msra.mxu2 %v5197_v61 }
 0x586   :  { %1715 = vmatpush.bf16.msrb.mxu0 %v5070_v46 }
 0x58a   :  { %1716 = vmatpush.bf16.msrb.mxu0 %v5088_v30 }
 0x58e   :  { %1717 = vmatpush.bf16.msrb.mxu0 %v5120_v31 }
 0x592   :  { %1718 = vmatpush.bf16.msrb.mxu0 %v5150_v27 }
 0x596   :  { %1719 = vmatpush.bf16.msrb.mxu0 %v5177_v63 }
 0x59a   :  { %1720 = vmatpush.bf16.msrb.mxu0 %v5204_v45 }
 0x5af   :  { %v1065_v59 = vpop.f32.mrf.mxu1 }
 0x5b5   :  { %v1039_v24 = vpop.f32.mrf.mxu3  ;;  %v1052_v32 = vpop.f32.mrf.mxu0 }
 0x5b6   :  { %v1066_v47 = vadd.f32 %v1065_v59, %v1052_v32  ;;  %v3779_v59 = vld [vmem:[%s6082_s7 + $0xb4] sm:$0xf]  ;;  %v3776_v32 = vld [vmem:[%s6082_s7 + $0x94] sm:$0xf0] }
 0x5b7   :  { %v1067_v60 = vpop.f32.mrf.mxu1  ;;  %v5267_v17 = vor.u32 %v3779_v59, %v3377_v4  ;;  %v5399_v59 = vperm.slane %v1131_v50, 1 }
 0x5b8   :  { %v1070_v1 = vadd.f32 %v1066_v47, %v4556_v55  ;;  %v338_v55 = vadd.f32 %v4606_v38, %v4550_v44  ;;  %v3781_v38 = vld [vmem:[%s6082_s7 + $0xc4] sm:$0xf]  ;;  %v3775_v47 = vld [vmem:[%s6082_s7 + $0x94] sm:$0xf]  ;;  %v3351_v60 = vld [vmem:[%s6082_s7 + $0x80] sm:$0xf] }
 0x5b9   :  { %v5240_v20 = vor.u32 %v3781_v38, %v3385_v37  ;;  %v5317_v28 = vor.u32 %v3775_v47, %v3361_v40 }
 0x5ba   :  { %3887 = vtanh.f32 %v1070_v1  ;;  %v3774_v1 = vld [vmem:[%s6082_s7 + $0x84] sm:$0xf0] }
 0x5bb   :  { %v1026_v58 = vpop.f32.mrf.mxu2  ;;  %1667 = vmatpush.bf16.msra.mxu1 %v5240_v20 }
 0x5bc   :  { %v1040_v25 = vadd.f32 %v1039_v24, %v1026_v58  ;;  %v3359_v24 = vld [vmem:[%s6082_s7 + $0x90] sm:$0xf]  ;;  %v3353_v58 = vld [vmem:[%s6082_s7 + $0x88] sm:$0xf0] }
 0x5bd   :  { %v1041_v3 = vpop.f32.mrf.mxu3  ;;  %v1054_v23 = vpop.f32.mrf.mxu0  ;;  %v5306_v56 = vor.u32 %v3776_v32, %v3359_v24  ;;  %v5330_v10 = vor.u32 %v3773_v34, %v3353_v58 }
 0x5be   :  { %v1069_v44 = vadd.f32 %v1040_v25, %v338_v55  ;;  %v5327_v25 = vor.u32 %v3774_v1, %v3351_v60 }
 0x5bf   :  { %1668 = vmatpush.bf16.msra.mxu1 %v5267_v17 }
 0x5c0   :  { %v5242_v43 = vpop.eup %3887  ;;  %3889 = vtanh.f32 %v1069_v44 }
 0x5c1   :  { %v1092_v9 = vpack.c.bf16 %v4910_v15, %v5242_v43  ;;  %v1464_v53 = vpack.c.bf16 %v5242_v43, %v5242_v43 }
 0x5c3   :  { %v1028_v16 = vpop.f32.mrf.mxu2  ;;  %1334 = vmatmul.bf16.vlgmr.msrb.gmra.mxu3 %v1092_v9  ;;  %1392 = vmatmul.bf16.vlgmr.msrb.gmra.mxu1 %v1092_v9 }
 0x5c4   :  { %1669 = vmatpush.bf16.msra.mxu1 %v5289_v57 }
 0x5c5   :  { %v1364_v3 = vpop.f32.mrf.mxu0 }
 0x5c6   :  { %v3890_v15 = vpop.eup %3889 }
 0x5c7   :  { %v1097_v8 = vpack.c.bf16 %v3890_v15, %v4914_v51  ;;  %v3778_v51 = vld [vmem:[%s6082_s7 + $0xa4] sm:$0xf0]  ;;  %v1463_v55 = vpack.c.bf16 %v3890_v15, %v3890_v15 }
 0x5c8   :  { %v5279_v2 = vor.u32 %v3778_v51, %v3367_v35  ;;  %1670 = vmatpush.bf16.msra.mxu1 %v5317_v28  ;;  %v5404_v51 = vperm.slane %v1131_v50, 0 }
 0x5c9   :  { %1320 = vmatmul.bf16.gmra.mxu2 %v1097_v8  ;;  %1378 = vmatmul.bf16.gmra.mxu0 %v1097_v8  ;;  %v1365_v8 = vadd.f32 %v1364_v3, %v5399_v59 }
 0x5ca   :  { %1643 = vmatpush.bf16.msra.mxu3 %v5279_v2 }
 0x5cb   :  { %v1306_v23 = vpop.f32.mrf.mxu2 }
 0x5cc   :  { %1671 = vmatpush.bf16.msra.mxu1 %v5330_v10 }
 0x5cd   :  { %v5382_v44 = vpop.f32.mrf.mxu0 }
 0x5ce   :  { %1644 = vmatpush.bf16.msra.mxu3 %v5306_v56  ;;  %6094 = vst [vmem:[#allocation4_spill] sm:$0xff] %v5382_v44 }
 0x5d0   :  { %1726 = vmatpush.bf16.msrb.mxu1 %v5123_v12 }
 0x5d2   :  { %1645 = vmatpush.bf16.msra.mxu3 %v5327_v25 }
 0x5d3   :  { %1339 = vmatmul.bf16.gmra.mxu3 %v1094_v14  ;;  %1397 = vmatmul.bf16.gmra.mxu1 %v1094_v14  ;;  %v5386_v38 = vpop.f32.mrf.mxu2  ;;  %v1307_v14 = vadd.f32 %v1306_v23, %v5404_v51 }
 0x5d4   :  { %1727 = vmatpush.bf16.msrb.mxu1 %v5163_v62 }
 0x5d5   :  { %v1369_v37 = vpop.f32.mrf.mxu0 }
 0x5d6   :  { %1700 = vmatpush.bf16.msrb.mxu3 %v5101_v29  ;;  %v1370_v58 = vadd.f32 %v1369_v37, %v5399_v59 }
 0x5d8   :  { %1728 = vmatpush.bf16.msrb.mxu1 %v5218_v49 }
 0x5d9   :  { %1633 = vmatmul.bf16.vlgmr.msrb.gmra.mxu2 %v1463_v55  ;;  %1659 = vmatmul.bf16.vlgmr.msra.gmra.mxu0 %v1463_v55 }
 0x5da   :  { %1749 = vmatpush.bf16.msrb.mxu2 %v5005_v21  ;;  %1775 = vmatpush.bf16.msra.mxu0 %v5010_v42 }
 0x5db   :  { %1701 = vmatpush.bf16.msrb.mxu3 %v5148_v18  ;;  %v1311_v43 = vpop.f32.mrf.mxu2 }
 0x5dc   :  { %1729 = vmatpush.bf16.msrb.mxu1 %v5240_v20 }
 0x5dd   :  { %v5392_v9 = vpop.f32.mrf.mxu0 }
 0x5de   :  { %1750 = vmatpush.bf16.msrb.mxu2 %v5035_v22  ;;  %1776 = vmatpush.bf16.msra.mxu0 %v5040_v26 }
 0x5df   :  { %1702 = vmatpush.bf16.msrb.mxu3 %v5202_v36 }
 0x5e0   :  { %1730 = vmatpush.bf16.msrb.mxu1 %v5267_v17 }
 0x5e2   :  { %1751 = vmatpush.bf16.msrb.mxu2 %v5065_v41  ;;  %1777 = vmatpush.bf16.msra.mxu0 %v5070_v46 }
 0x5e3   :  { %1344 = vmatmul.bf16.gmra.mxu3 %v1096_v54  ;;  %1402 = vmatmul.bf16.gmra.mxu1 %v1096_v54  ;;  %v5394_v16 = vpop.f32.mrf.mxu2 }
 0x5e4   :  { %1703 = vmatpush.bf16.msrb.mxu3 %v5230_v33  ;;  %1731 = vmatpush.bf16.msrb.mxu1 %v5289_v57 }
 0x5e5   :  { %v1374_v39 = vpop.f32.mrf.mxu0 }
 0x5e6   :  { %1752 = vmatpush.bf16.msrb.mxu2 %v5080_v6  ;;  %1778 = vmatpush.bf16.msra.mxu0 %v5088_v30 }
 0x5e8   :  { %1704 = vmatpush.bf16.msrb.mxu3 %v5256_v52  ;;  %1732 = vmatpush.bf16.msrb.mxu1 %v5317_v28 }
 0x5ea   :  { %1753 = vmatpush.bf16.msrb.mxu2 %v5118_v19  ;;  %1779 = vmatpush.bf16.msra.mxu0 %v5120_v31 }
 0x5eb   :  { %v1316_v15 = vpop.f32.mrf.mxu2 }
 0x5ec   :  { %1705 = vmatpush.bf16.msrb.mxu3 %v5279_v2  ;;  %1733 = vmatpush.bf16.msrb.mxu1 %v5330_v10 }
 0x5ed   :  { %v5401_v4 = vpop.f32.mrf.mxu0 }
 0x5ee   :  { %1754 = vmatpush.bf16.msrb.mxu2 %v5143_v11  ;;  %1780 = vmatpush.bf16.msra.mxu0 %v5150_v27 }
 0x5f0   :  { %1706 = vmatpush.bf16.msrb.mxu3 %v5306_v56 }
 0x5f2   :  { %1755 = vmatpush.bf16.msrb.mxu2 %v5175_v5  ;;  %1781 = vmatpush.bf16.msra.mxu0 %v5177_v63 }
 0x5f3   :  { %1349 = vmatmul.bf16.gmra.mxu3 %v1098_v0  ;;  %1407 = vmatmul.bf16.gmra.mxu1 %v1098_v0  ;;  %v5408_v13 = vpop.f32.mrf.mxu2  ;;  %v1312_v0 = vadd.f32 %v1311_v43, %v5404_v51 }
 0x5f4   :  { %1707 = vmatpush.bf16.msrb.mxu3 %v5327_v25  ;;  %6096 = vst [vmem:[#allocation6_spill] sm:$0xff] %v5408_v13 }
 0x5f6   :  { %1756 = vmatpush.bf16.msrb.mxu2 %v5197_v61  ;;  %1782 = vmatpush.bf16.msra.mxu0 %v5204_v45 }
 0x603   :  { %1646 = vmatmul.bf16.vlgmr.msra.gmra.mxu3 %v1464_v53  ;;  %1672 = vmatmul.bf16.vlgmr.msra.gmra.mxu1 %v1464_v53 }
 0x604   :  { %1762 = vmatpush.bf16.msra.mxu3 %v5101_v29  ;;  %1788 = vmatpush.bf16.msra.mxu1 %v5123_v12 }
 0x608   :  { %1763 = vmatpush.bf16.msra.mxu3 %v5148_v18  ;;  %1789 = vmatpush.bf16.msra.mxu1 %v5163_v62 }
 0x60c   :  { %1764 = vmatpush.bf16.msra.mxu3 %v5202_v36  ;;  %1790 = vmatpush.bf16.msra.mxu1 %v5218_v49 }
 0x610   :  { %1765 = vmatpush.bf16.msra.mxu3 %v5230_v33  ;;  %1791 = vmatpush.bf16.msra.mxu1 %v5240_v20 }
 0x614   :  { %1766 = vmatpush.bf16.msra.mxu3 %v5256_v52  ;;  %1792 = vmatpush.bf16.msra.mxu1 %v5267_v17 }
 0x618   :  { %1767 = vmatpush.bf16.msra.mxu3 %v5279_v2  ;;  %1793 = vmatpush.bf16.msra.mxu1 %v5289_v57 }
 0x61c   :  { %1768 = vmatpush.bf16.msra.mxu3 %v5306_v56  ;;  %1794 = vmatpush.bf16.msra.mxu1 %v5317_v28 }
 0x620   :  { %1769 = vmatpush.bf16.msra.mxu3 %v5327_v25  ;;  %1795 = vmatpush.bf16.msra.mxu1 %v5330_v10 }
 0x640   :  { %v1393_v35 = vpop.f32.mrf.mxu1 }
 0x641   :  { %v5406_v7 = vadd.f32 %v1393_v35, %v1365_v8 }
 0x643   :  { %6095 = vst [vmem:[#allocation5_spill] sm:$0xff] %v5406_v7 }
 0x646   :  { %v1335_v24 = vpop.f32.mrf.mxu3  ;;  %v1379_v32 = vpop.f32.mrf.mxu0 }
 0x647   :  { %v1336_v47 = vadd.f32 %v1335_v24, %v1307_v14  ;;  %v1375_v24 = vadd.f32 %v1374_v39, %v5399_v59 }
 0x648   :  { %v5411_v40 = vpop.f32.mrf.mxu1 }
 0x649   :  { %6097 = vst [vmem:[#allocation7_spill] sm:$0xff] %v5411_v40 }
 0x64c   :  { %v1321_v60 = vpop.f32.mrf.mxu2 }
 0x64d   :  { %v1322_v39 = vadd.f32 %v1321_v60, %v5404_v51 }
 0x64e   :  { %v5413_v1 = vpop.f32.mrf.mxu3  ;;  %v1381_v34 = vpop.f32.mrf.mxu0 }
 0x650   :  { %v1398_v55 = vpop.f32.mrf.mxu1 }
 0x651   :  { %v5416_v54 = vadd.f32 %v1398_v55, %v1370_v58  ;;  %v1317_v55 = vadd.f32 %v1316_v15, %v5404_v51  ;;  %v1382_v15 = vadd.f32 %v1381_v34, %v5399_v59 }
 0x653   :  { %6098 = vst [vmem:[#allocation8_spill] sm:$0xff] %v5416_v54 }
 0x654   :  { %v5418_v48 = vpop.f32.mrf.mxu2 }
 0x655   :  { %6099 = vst [vmem:[#allocation9_spill] sm:$0xff] %v5418_v48 }
 0x656   :  { %v1340_v53 = vpop.f32.mrf.mxu3  ;;  %v1660_v3 = vpop.f32.mrf.mxu0 }
 0x657   :  { %v5421_v23 = vadd.f32 %v1340_v53, %v1312_v0  ;;  %v1380_v53 = vadd.f32 %v1379_v32, %v5399_v59 }
 0x658   :  { %v5423_v50 = vpop.f32.mrf.mxu1 }
 0x659   :  { %6100 = vst [vmem:[#allocation10_spill] sm:$0xff] %v5423_v50 }
 0x65c   :  { %v1634_v8 = vpop.f32.mrf.mxu2 }
 0x65e   :  { %v5425_v35 = vpop.f32.mrf.mxu3  ;;  %v1662_v14 = vpop.f32.mrf.mxu0 }
 0x660   :  { %v1403_v37 = vpop.f32.mrf.mxu1 }
 0x661   :  { %v5428_v7 = vadd.f32 %v1403_v37, %v1375_v24 }
 0x664   :  { %v1636_v58 = vpop.f32.mrf.mxu2 }
 0x666   :  { %v1345_v48 = vpop.f32.mrf.mxu3 }
 0x667   :  { %v5431_v43 = vadd.f32 %v1345_v48, %v1317_v55 }
 0x668   :  { %v5433_v40 = vpop.f32.mrf.mxu1 }
 0x669   :  { %6101 = vst [vmem:[#allocation11_spill] sm:$0xff] %v5431_v43 }
 0x66e   :  { %v5435_v0 = vpop.f32.mrf.mxu3 }
 0x66f   :  { %6102 = vst [vmem:[#allocation12_spill] sm:$0xff] %v5435_v0 }
 0x670   :  { %v1408_v44 = vpop.f32.mrf.mxu1 }
 0x671   :  { %v5438_v13 = vadd.f32 %v1408_v44, %v1380_v53 }
 0x676   :  { %v1350_v14 = vpop.f32.mrf.mxu3 }
 0x677   :  { %v5441_v24 = vadd.f32 %v1350_v14, %v1322_v39  ;;  %v1309_v14 = vadd.f32 %v5386_v38, %v5404_v51 }
 0x678   :  { %v1410_v37 = vpop.f32.mrf.mxu1 }
 0x679   :  { %v1411_v55 = vadd.f32 %v1410_v37, %v1382_v15  ;;  %v1338_v15 = vadd.f32 %v5413_v1, %v1309_v14 }
 0x67e   :  { %v5443_v58 = vpop.f32.mrf.mxu3 }
 0x680   :  { %v1673_v48 = vpop.f32.mrf.mxu1 }
 0x681   :  { %v1674_v54 = vadd.f32 %v1673_v48, %v1660_v3 }
 0x683   :  { %v1678_v43 = vadd.f32 %v1674_v54, %v1411_v55 }
 0x685   :  { %3891 = vtanh.f32 %v1678_v43 }
 0x686   :  { %v1647_v0 = vpop.f32.mrf.mxu3 }
 0x687   :  { %v1648_v32 = vadd.f32 %v1647_v0, %v1634_v8 }
 0x688   :  { %v1675_v50 = vpop.f32.mrf.mxu1 }
 0x689   :  { %v1677_v44 = vadd.f32 %v1648_v32, %v1336_v47 }
 0x68b   :  { %v5446_v53 = vpop.eup %3891  ;;  %3893 = vtanh.f32 %v1677_v44 }
 0x68c   :  { %v1686_v60 = vpack.c.bf16 %v5446_v53, %v5446_v53 }
 0x68e   :  { %v1649_v39 = vpop.f32.mrf.mxu3  ;;  %1708 = vmatmul.bf16.vlgmr.msrb.gmra.mxu3 %v1686_v60  ;;  %1734 = vmatmul.bf16.vlgmr.msrb.gmra.mxu1 %v1686_v60 }
 0x68f   :  { %1824 = vmatpush.bf16.msrb.mxu3 %v5101_v29  ;;  %1850 = vmatpush.bf16.msrb.mxu1 %v5123_v12 }
 0x691   :  { %v5452_v34 = vpop.eup %3893 }
 0x692   :  { %v1685_v54 = vpack.c.bf16 %v5452_v34, %v5452_v34 }
 0x693   :  { %1825 = vmatpush.bf16.msrb.mxu3 %v5148_v18  ;;  %1851 = vmatpush.bf16.msrb.mxu1 %v5163_v62 }
 0x694   :  { %1695 = vmatmul.bf16.vlgmr.msra.gmra.mxu2 %v1685_v54  ;;  %1721 = vmatmul.bf16.vlgmr.msrb.gmra.mxu0 %v1685_v54 }
 0x695   :  { %1811 = vmatpush.bf16.msra.mxu2 %v5005_v21  ;;  %1837 = vmatpush.bf16.msrb.mxu0 %v5010_v42 }
 0x697   :  { %1826 = vmatpush.bf16.msrb.mxu3 %v5202_v36  ;;  %1852 = vmatpush.bf16.msrb.mxu1 %v5218_v49 }
 0x699   :  { %1812 = vmatpush.bf16.msra.mxu2 %v5035_v22  ;;  %1838 = vmatpush.bf16.msrb.mxu0 %v5040_v26 }
 0x69b   :  { %1827 = vmatpush.bf16.msrb.mxu3 %v5230_v33  ;;  %1853 = vmatpush.bf16.msrb.mxu1 %v5240_v20 }
 0x69d   :  { %1813 = vmatpush.bf16.msra.mxu2 %v5065_v41  ;;  %1839 = vmatpush.bf16.msrb.mxu0 %v5070_v46 }
 0x69f   :  { %1828 = vmatpush.bf16.msrb.mxu3 %v5256_v52  ;;  %1854 = vmatpush.bf16.msrb.mxu1 %v5267_v17 }
 0x6a1   :  { %1814 = vmatpush.bf16.msra.mxu2 %v5080_v6  ;;  %1840 = vmatpush.bf16.msrb.mxu0 %v5088_v30 }
 0x6a3   :  { %1829 = vmatpush.bf16.msrb.mxu3 %v5279_v2  ;;  %1855 = vmatpush.bf16.msrb.mxu1 %v5289_v57 }
 0x6a5   :  { %1815 = vmatpush.bf16.msra.mxu2 %v5118_v19  ;;  %1841 = vmatpush.bf16.msrb.mxu0 %v5120_v31 }
 0x6a7   :  { %1830 = vmatpush.bf16.msrb.mxu3 %v5306_v56  ;;  %1856 = vmatpush.bf16.msrb.mxu1 %v5317_v28 }
 0x6a9   :  { %1816 = vmatpush.bf16.msra.mxu2 %v5143_v11  ;;  %1842 = vmatpush.bf16.msrb.mxu0 %v5150_v27 }
 0x6ab   :  { %1831 = vmatpush.bf16.msrb.mxu3 %v5327_v25  ;;  %1857 = vmatpush.bf16.msrb.mxu1 %v5330_v10 }
 0x6ad   :  { %1817 = vmatpush.bf16.msra.mxu2 %v5175_v5  ;;  %1843 = vmatpush.bf16.msrb.mxu0 %v5177_v63 }
 0x6b1   :  { %1818 = vmatpush.bf16.msra.mxu2 %v5197_v61  ;;  %1844 = vmatpush.bf16.msrb.mxu0 %v5204_v45 }
 0x70b   :  { %v1735_v47 = vpop.f32.mrf.mxu1 }
 0x711   :  { %v1709_v3 = vpop.f32.mrf.mxu3  ;;  %v1722_v50 = vpop.f32.mrf.mxu0 }
 0x712   :  { %v1736_v8 = vadd.f32 %v1735_v47, %v1722_v50  ;;  %v1377_v47 = vadd.f32 %v5401_v4, %v5399_v59 }
 0x713   :  { %v1737_v43 = vpop.f32.mrf.mxu1 }
 0x714   :  { %v1740_v0 = vadd.f32 %v1736_v8, %v5438_v13  ;;  %v1406_v8 = vadd.f32 %v5433_v40, %v1377_v47 }
 0x716   :  { %3895 = vtanh.f32 %v1740_v0 }
 0x717   :  { %v1696_v37 = vpop.f32.mrf.mxu2 }
 0x718   :  { %v1710_v48 = vadd.f32 %v1709_v3, %v1696_v37 }
 0x719   :  { %v1711_v55 = vpop.f32.mrf.mxu3  ;;  %v1724_v32 = vpop.f32.mrf.mxu0 }
 0x71a   :  { %v1739_v44 = vadd.f32 %v1710_v48, %v1338_v15 }
 0x71c   :  { %v5490_v60 = vpop.eup %3895  ;;  %3897 = vtanh.f32 %v1739_v44 }
 0x71d   :  { %v1748_v39 = vpack.c.bf16 %v5490_v60, %v5490_v60 }
 0x71f   :  { %v1698_v54 = vpop.f32.mrf.mxu2  ;;  %1770 = vmatmul.bf16.vlgmr.msra.gmra.mxu3 %v1748_v39  ;;  %1796 = vmatmul.bf16.vlgmr.msra.gmra.mxu1 %v1748_v39 }
 0x720   :  { %1886 = vmatpush.bf16.msra.mxu3 %v5101_v29  ;;  %1912 = vmatpush.bf16.msra.mxu1 %v5123_v12 }
 0x722   :  { %v5496_v38 = vpop.eup %3897 }
 0x723   :  { %v1747_v13 = vpack.c.bf16 %v5496_v38, %v5496_v38 }
 0x724   :  { %1887 = vmatpush.bf16.msra.mxu3 %v5148_v18  ;;  %1913 = vmatpush.bf16.msra.mxu1 %v5163_v62 }
 0x725   :  { %1757 = vmatmul.bf16.vlgmr.msrb.gmra.mxu2 %v1747_v13  ;;  %1783 = vmatmul.bf16.vlgmr.msra.gmra.mxu0 %v1747_v13 }
 0x726   :  { %1873 = vmatpush.bf16.msrb.mxu2 %v5005_v21  ;;  %1899 = vmatpush.bf16.msra.mxu0 %v5010_v42 }
 0x728   :  { %1888 = vmatpush.bf16.msra.mxu3 %v5202_v36  ;;  %1914 = vmatpush.bf16.msra.mxu1 %v5218_v49 }
 0x72a   :  { %1874 = vmatpush.bf16.msrb.mxu2 %v5035_v22  ;;  %1900 = vmatpush.bf16.msra.mxu0 %v5040_v26 }
 0x72c   :  { %1889 = vmatpush.bf16.msra.mxu3 %v5230_v33  ;;  %1915 = vmatpush.bf16.msra.mxu1 %v5240_v20 }
 0x72e   :  { %1875 = vmatpush.bf16.msrb.mxu2 %v5065_v41  ;;  %1901 = vmatpush.bf16.msra.mxu0 %v5070_v46 }
 0x730   :  { %1890 = vmatpush.bf16.msra.mxu3 %v5256_v52  ;;  %1916 = vmatpush.bf16.msra.mxu1 %v5267_v17 }
 0x732   :  { %1876 = vmatpush.bf16.msrb.mxu2 %v5080_v6  ;;  %1902 = vmatpush.bf16.msra.mxu0 %v5088_v30 }
 0x734   :  { %1891 = vmatpush.bf16.msra.mxu3 %v5279_v2  ;;  %1917 = vmatpush.bf16.msra.mxu1 %v5289_v57 }
 0x736   :  { %1877 = vmatpush.bf16.msrb.mxu2 %v5118_v19  ;;  %1903 = vmatpush.bf16.msra.mxu0 %v5120_v31 }
 0x738   :  { %1892 = vmatpush.bf16.msra.mxu3 %v5306_v56  ;;  %1918 = vmatpush.bf16.msra.mxu1 %v5317_v28 }
 0x73a   :  { %1878 = vmatpush.bf16.msrb.mxu2 %v5143_v11  ;;  %1904 = vmatpush.bf16.msra.mxu0 %v5150_v27 }
 0x73c   :  { %1893 = vmatpush.bf16.msra.mxu3 %v5327_v25  ;;  %1919 = vmatpush.bf16.msra.mxu1 %v5330_v10 }
 0x73e   :  { %1879 = vmatpush.bf16.msrb.mxu2 %v5175_v5  ;;  %1905 = vmatpush.bf16.msra.mxu0 %v5177_v63 }
 0x742   :  { %1880 = vmatpush.bf16.msrb.mxu2 %v5197_v61  ;;  %1906 = vmatpush.bf16.msra.mxu0 %v5204_v45 }
 0x79c   :  { %v1797_v1 = vpop.f32.mrf.mxu1 }
 0x7a2   :  { %v1771_v3 = vpop.f32.mrf.mxu3  ;;  %v1784_v50 = vpop.f32.mrf.mxu0 }
 0x7a3   :  { %v1798_v43 = vadd.f32 %v1797_v1, %v1784_v50 }
 0x7a4   :  { %v1799_v0 = vpop.f32.mrf.mxu1 }
 0x7a5   :  { %v1802_v14 = vadd.f32 %v1798_v43, %v1406_v8  ;;  %v1314_v8 = vadd.f32 %v5394_v16, %v5404_v51 }
 0x7a7   :  { %3899 = vtanh.f32 %v1802_v14  ;;  %v1343_v0 = vadd.f32 %v5425_v35, %v1314_v8 }
 0x7a8   :  { %v1758_v37 = vpop.f32.mrf.mxu2 }
 0x7a9   :  { %v1772_v15 = vadd.f32 %v1771_v3, %v1758_v37 }
 0x7aa   :  { %v1773_v48 = vpop.f32.mrf.mxu3  ;;  %v1786_v55 = vpop.f32.mrf.mxu0 }
 0x7ab   :  { %v1801_v32 = vadd.f32 %v1772_v15, %v5421_v23 }
 0x7ad   :  { %v5534_v44 = vpop.eup %3899  ;;  %3901 = vtanh.f32 %v1801_v32 }
 0x7ae   :  { %v1810_v4 = vpack.c.bf16 %v5534_v44, %v5534_v44 }
 0x7b0   :  { %v1760_v39 = vpop.f32.mrf.mxu2  ;;  %1832 = vmatmul.bf16.vlgmr.msrb.gmra.mxu3 %v1810_v4  ;;  %1858 = vmatmul.bf16.vlgmr.msrb.gmra.mxu1 %v1810_v4 }
 0x7b1   :  { %1948 = vmatpush.bf16.msrb.mxu3 %v5101_v29  ;;  %1974 = vmatpush.bf16.msrb.mxu1 %v5123_v12  ;;  %v1372_v39 = vadd.f32 %v5392_v9, %v5399_v59 }
 0x7b3   :  { %v5540_v40 = vpop.eup %3901 }
 0x7b4   :  { %v1809_v54 = vpack.c.bf16 %v5540_v40, %v5540_v40 }
 0x7b5   :  { %1949 = vmatpush.bf16.msrb.mxu3 %v5148_v18  ;;  %1975 = vmatpush.bf16.msrb.mxu1 %v5163_v62 }
 0x7b6   :  { %1819 = vmatmul.bf16.vlgmr.msra.gmra.mxu2 %v1809_v54  ;;  %1845 = vmatmul.bf16.vlgmr.msrb.gmra.mxu0 %v1809_v54 }
 0x7b7   :  { %1935 = vmatpush.bf16.msra.mxu2 %v5005_v21  ;;  %1961 = vmatpush.bf16.msrb.mxu0 %v5010_v42 }
 0x7b9   :  { %1950 = vmatpush.bf16.msrb.mxu3 %v5202_v36  ;;  %1976 = vmatpush.bf16.msrb.mxu1 %v5218_v49 }
 0x7bb   :  { %1936 = vmatpush.bf16.msra.mxu2 %v5035_v22  ;;  %1962 = vmatpush.bf16.msrb.mxu0 %v5040_v26 }
 0x7bd   :  { %1951 = vmatpush.bf16.msrb.mxu3 %v5230_v33  ;;  %1977 = vmatpush.bf16.msrb.mxu1 %v5240_v20 }
 0x7bf   :  { %1937 = vmatpush.bf16.msra.mxu2 %v5065_v41  ;;  %1963 = vmatpush.bf16.msrb.mxu0 %v5070_v46 }
 0x7c1   :  { %1952 = vmatpush.bf16.msrb.mxu3 %v5256_v52  ;;  %1978 = vmatpush.bf16.msrb.mxu1 %v5267_v17 }
 0x7c3   :  { %1938 = vmatpush.bf16.msra.mxu2 %v5080_v6  ;;  %1964 = vmatpush.bf16.msrb.mxu0 %v5088_v30 }
 0x7c5   :  { %1953 = vmatpush.bf16.msrb.mxu3 %v5279_v2  ;;  %1979 = vmatpush.bf16.msrb.mxu1 %v5289_v57 }
 0x7c7   :  { %1939 = vmatpush.bf16.msra.mxu2 %v5118_v19  ;;  %1965 = vmatpush.bf16.msrb.mxu0 %v5120_v31 }
 0x7c9   :  { %1954 = vmatpush.bf16.msrb.mxu3 %v5306_v56  ;;  %1980 = vmatpush.bf16.msrb.mxu1 %v5317_v28 }
 0x7cb   :  { %1940 = vmatpush.bf16.msra.mxu2 %v5143_v11  ;;  %1966 = vmatpush.bf16.msrb.mxu0 %v5150_v27 }
 0x7cd   :  { %1955 = vmatpush.bf16.msrb.mxu3 %v5327_v25  ;;  %1981 = vmatpush.bf16.msrb.mxu1 %v5330_v10 }
 0x7cf   :  { %1941 = vmatpush.bf16.msra.mxu2 %v5175_v5  ;;  %1967 = vmatpush.bf16.msrb.mxu0 %v5177_v63 }
 0x7d3   :  { %1942 = vmatpush.bf16.msra.mxu2 %v5197_v61  ;;  %1968 = vmatpush.bf16.msrb.mxu0 %v5204_v45 }
 0x82d   :  { %v1859_v23 = vpop.f32.mrf.mxu1 }
 0x833   :  { %v1833_v13 = vpop.f32.mrf.mxu3  ;;  %v1846_v1 = vpop.f32.mrf.mxu0 }
 0x834   :  { %v1860_v47 = vadd.f32 %v1859_v23, %v1846_v1 }
 0x835   :  { %v1861_v3 = vpop.f32.mrf.mxu1 }
 0x836   :  { %v1864_v50 = vadd.f32 %v1860_v47, %v5428_v7 }
 0x838   :  { %3903 = vtanh.f32 %v1864_v50 }
 0x839   :  { %v1820_v43 = vpop.f32.mrf.mxu2 }
 0x83a   :  { %v1834_v14 = vadd.f32 %v1833_v13, %v1820_v43  ;;  %v6103_v13 = vld [vmem:[#allocation10_spill] sm:$0xff] }
 0x83b   :  { %v1835_v37 = vpop.f32.mrf.mxu3  ;;  %v1848_v15 = vpop.f32.mrf.mxu0  ;;  %v1401_v1 = vadd.f32 %v6103_v13, %v1372_v39  ;;  %v3455_v39 = vld [vmem:[%s6084_s9 + $0x50] sm:$0xf] }
 0x83c   :  { %v1863_v48 = vadd.f32 %v1834_v14, %v1343_v0  ;;  %v6104_v37 = vld [vmem:[#allocation11_spill] sm:$0xff] }
 0x83e   :  { %v5578_v55 = vpop.eup %3903  ;;  %3905 = vtanh.f32 %v1863_v48 }
 0x83f   :  { %v1872_v32 = vpack.c.bf16 %v5578_v55, %v5578_v55 }
 0x841   :  { %v1822_v4 = vpop.f32.mrf.mxu2  ;;  %1894 = vmatmul.bf16.vlgmr.msra.gmra.mxu3 %v1872_v32  ;;  %1920 = vmatmul.bf16.vlgmr.msra.gmra.mxu1 %v1872_v32 }
 0x842   :  { %2010 = vmatpush.bf16.msra.mxu3 %v5101_v29  ;;  %2036 = vmatpush.bf16.msra.mxu1 %v5123_v12 }
 0x844   :  { %v5584_v16 = vpop.eup %3905 }
 0x845   :  { %v1871_v7 = vpack.c.bf16 %v5584_v16, %v5584_v16 }
 0x846   :  { %2011 = vmatpush.bf16.msra.mxu3 %v5148_v18  ;;  %2037 = vmatpush.bf16.msra.mxu1 %v5163_v62 }
 0x847   :  { %1881 = vmatmul.bf16.vlgmr.msrb.gmra.mxu2 %v1871_v7  ;;  %1907 = vmatmul.bf16.vlgmr.msra.gmra.mxu0 %v1871_v7 }
 0x848   :  { %1997 = vmatpush.bf16.msrb.mxu2 %v5005_v21  ;;  %2023 = vmatpush.bf16.msra.mxu0 %v5010_v42 }
 0x84a   :  { %2012 = vmatpush.bf16.msra.mxu3 %v5202_v36  ;;  %2038 = vmatpush.bf16.msra.mxu1 %v5218_v49 }
 0x84c   :  { %1998 = vmatpush.bf16.msrb.mxu2 %v5035_v22  ;;  %2024 = vmatpush.bf16.msra.mxu0 %v5040_v26 }
 0x84e   :  { %2013 = vmatpush.bf16.msra.mxu3 %v5230_v33  ;;  %2039 = vmatpush.bf16.msra.mxu1 %v5240_v20 }
 0x850   :  { %1999 = vmatpush.bf16.msrb.mxu2 %v5065_v41  ;;  %2025 = vmatpush.bf16.msra.mxu0 %v5070_v46 }
 0x852   :  { %2014 = vmatpush.bf16.msra.mxu3 %v5256_v52  ;;  %2040 = vmatpush.bf16.msra.mxu1 %v5267_v17 }
 0x854   :  { %2000 = vmatpush.bf16.msrb.mxu2 %v5080_v6  ;;  %2026 = vmatpush.bf16.msra.mxu0 %v5088_v30 }
 0x856   :  { %2015 = vmatpush.bf16.msra.mxu3 %v5279_v2  ;;  %2041 = vmatpush.bf16.msra.mxu1 %v5289_v57 }
 0x858   :  { %2001 = vmatpush.bf16.msrb.mxu2 %v5118_v19  ;;  %2027 = vmatpush.bf16.msra.mxu0 %v5120_v31 }
 0x85a   :  { %2016 = vmatpush.bf16.msra.mxu3 %v5306_v56  ;;  %2042 = vmatpush.bf16.msra.mxu1 %v5317_v28 }
 0x85c   :  { %2002 = vmatpush.bf16.msrb.mxu2 %v5143_v11  ;;  %2028 = vmatpush.bf16.msra.mxu0 %v5150_v27 }
 0x85e   :  { %2017 = vmatpush.bf16.msra.mxu3 %v5327_v25  ;;  %2043 = vmatpush.bf16.msra.mxu1 %v5330_v10 }
 0x860   :  { %2003 = vmatpush.bf16.msrb.mxu2 %v5175_v5  ;;  %2029 = vmatpush.bf16.msra.mxu0 %v5177_v63 }
 0x864   :  { %2004 = vmatpush.bf16.msrb.mxu2 %v5197_v61  ;;  %2030 = vmatpush.bf16.msra.mxu0 %v5204_v45 }
 0x8be   :  { %v1921_v35 = vpop.f32.mrf.mxu1 }
 0x8c4   :  { %v1895_v54 = vpop.f32.mrf.mxu3  ;;  %v1908_v23 = vpop.f32.mrf.mxu0 }
 0x8c5   :  { %v1922_v47 = vadd.f32 %v1921_v35, %v1908_v23  ;;  %v3799_v23 = vld [vmem:[%s6084_s9 + $0x54] sm:$0xf] }
 0x8c6   :  { %v1923_v3 = vpop.f32.mrf.mxu1 }
 0x8c7   :  { %v1926_v50 = vadd.f32 %v1922_v47, %v1401_v1  ;;  %v3457_v1 = vld [vmem:[%s6084_s9 + $0x58] sm:$0xf0]  ;;  %v3447_v3 = vld [vmem:[%s6084_s9 + $0x40] sm:$0xf] }
 0x8c8   :  { %v3460_v47 = vor.u32 %v3799_v23, %v3457_v1 }
 0x8c9   :  { %3907 = vtanh.f32 %v1926_v50  ;;  %v3798_v50 = vld [vmem:[%s6084_s9 + $0x44] sm:$0xf0] }
 0x8ca   :  { %v1882_v8 = vpop.f32.mrf.mxu2 }
 0x8cb   :  { %v1896_v43 = vadd.f32 %v1895_v54, %v1882_v8  ;;  %v3800_v54 = vld [vmem:[%s6084_s9 + $0x54] sm:$0xf0]  ;;  %v3797_v8 = vld [vmem:[%s6084_s9 + $0x44] sm:$0xf] }
 0x8cc   :  { %v1897_v0 = vpop.f32.mrf.mxu3  ;;  %v1910_v14 = vpop.f32.mrf.mxu0  ;;  %v3456_v13 = vor.u32 %v3800_v54, %v3455_v39 }
 0x8cd   :  { %v1925_v15 = vadd.f32 %v1896_v43, %v6104_v37  ;;  %v3448_v43 = vor.u32 %v3798_v50, %v3447_v3  ;;  %v3449_v0 = vld [vmem:[%s6084_s9 + $0x48] sm:$0xf0]  ;;  %v3439_v37 = vld [vmem:[%s6084_s9 + $0x30] sm:$0xf]  ;;  %v2133_v50 = vpack.c.bf16 %v5496_v38, %v5452_v34  ;;  %v3527_v34 = vld [vmem:[%s6084_s9 + $0xe0] sm:$0xf] }
 0x8ce   :  { %v3452_v14 = vor.u32 %v3797_v8, %v3449_v0  ;;  %v3820_v8 = vld [vmem:[%s6084_s9 + $0xf4] sm:$0xf0]  ;;  %v3818_v38 = vld [vmem:[%s6084_s9 + $0xe4] sm:$0xf0] }
 0x8cf   :  { %v5622_v48 = vpop.eup %3907  ;;  %3909 = vtanh.f32 %v1925_v15  ;;  %v3796_v15 = vld [vmem:[%s6084_s9 + $0x34] sm:$0xf0] }
 0x8d0   :  { %v1934_v9 = vpack.c.bf16 %v5622_v48, %v5622_v48 }
 0x8d2   :  { %v1884_v32 = vpop.f32.mrf.mxu2  ;;  %1956 = vmatmul.bf16.vlgmr.msrb.gmra.mxu3 %v1934_v9  ;;  %1982 = vmatmul.bf16.vlgmr.msrb.gmra.mxu1 %v1934_v9  ;;  %v3795_v9 = vld [vmem:[%s6084_s9 + $0x34] sm:$0xf] }
 0x8d3   :  { %2072 = vmatpush.bf16.msrb.mxu3 %v5101_v29  ;;  %2098 = vmatpush.bf16.msrb.mxu1 %v5123_v12  ;;  %v3440_v32 = vor.u32 %v3796_v15, %v3439_v37  ;;  %v3817_v15 = vld [vmem:[%s6084_s9 + $0xe4] sm:$0xf] }
 0x8d5   :  { %v5628_v4 = vpop.eup %3909 }
 0x8d6   :  { %v1933_v7 = vpack.c.bf16 %v5628_v4, %v5628_v4 }
 0x8d7   :  { %2073 = vmatpush.bf16.msrb.mxu3 %v5148_v18  ;;  %2099 = vmatpush.bf16.msrb.mxu1 %v5163_v62 }
 0x8d8   :  { %1943 = vmatmul.bf16.vlgmr.msra.gmra.mxu2 %v1933_v7  ;;  %1969 = vmatmul.bf16.vlgmr.msrb.gmra.mxu0 %v1933_v7  ;;  %v3441_v7 = vld [vmem:[%s6084_s9 + $0x38] sm:$0xf0] }
 0x8d9   :  { %2059 = vmatpush.bf16.msra.mxu2 %v5005_v21  ;;  %2085 = vmatpush.bf16.msrb.mxu0 %v5010_v42 }
 0x8db   :  { %2074 = vmatpush.bf16.msrb.mxu3 %v5202_v36  ;;  %2100 = vmatpush.bf16.msrb.mxu1 %v5218_v49  ;;  %v3471_v49 = vld [vmem:[%s6084_s9 + $0x70] sm:$0xf] }
 0x8dd   :  { %2060 = vmatpush.bf16.msra.mxu2 %v5035_v22  ;;  %2086 = vmatpush.bf16.msrb.mxu0 %v5040_v26 }
 0x8df   :  { %2075 = vmatpush.bf16.msrb.mxu3 %v5230_v33  ;;  %2101 = vmatpush.bf16.msrb.mxu1 %v5240_v20  ;;  %v3804_v33 = vld [vmem:[%s6084_s9 + $0x74] sm:$0xf0]  ;;  %v3803_v20 = vld [vmem:[%s6084_s9 + $0x74] sm:$0xf] }
 0x8e1   :  { %2061 = vmatpush.bf16.msra.mxu2 %v5065_v41  ;;  %2087 = vmatpush.bf16.msrb.mxu0 %v5070_v46  ;;  %v6105_v46 = vld [vmem:[#allocation8_spill] sm:$0xff] }
 0x8e3   :  { %2076 = vmatpush.bf16.msrb.mxu3 %v5256_v52  ;;  %2102 = vmatpush.bf16.msrb.mxu1 %v5267_v17  ;;  %v3472_v52 = vor.u32 %v3804_v33, %v3471_v49  ;;  %v3473_v17 = vld [vmem:[%s6084_s9 + $0x78] sm:$0xf0]  ;;  %v6108_v33 = vld [vmem:[#allocation4_spill] sm:$0xff] }
 0x8e5   :  { %2062 = vmatpush.bf16.msra.mxu2 %v5080_v6  ;;  %2088 = vmatpush.bf16.msrb.mxu0 %v5088_v30  ;;  %v6106_v30 = vld [vmem:[#allocation6_spill] sm:$0xff] }
 0x8e6   :  { %v1319_v29 = vadd.f32 %v6106_v30, %v5404_v51  ;;  %v3423_v30 = vld [vmem:[%s6084_s9 + $0x10] sm:$0xf] }
 0x8e7   :  { %2077 = vmatpush.bf16.msrb.mxu3 %v5279_v2  ;;  %2103 = vmatpush.bf16.msrb.mxu1 %v5289_v57  ;;  %v3476_v2 = vor.u32 %v3803_v20, %v3473_v17  ;;  %v3463_v57 = vld [vmem:[%s6084_s9 + $0x60] sm:$0xf]  ;;  %v1367_v20 = vadd.f32 %v6108_v33, %v5399_v59  ;;  %v3497_v33 = vld [vmem:[%s6084_s9 + $0xa8] sm:$0xf0] }
 0x8e9   :  { %2063 = vmatpush.bf16.msra.mxu2 %v5118_v19  ;;  %2089 = vmatpush.bf16.msrb.mxu0 %v5120_v31  ;;  %v6107_v31 = vld [vmem:[#allocation12_spill] sm:$0xff] }
 0x8ea   :  { %v1348_v12 = vadd.f32 %v6107_v31, %v1319_v29  ;;  %v3792_v29 = vld [vmem:[%s6084_s9 + $0x14] sm:$0xf0]  ;;  %v3425_v31 = vld [vmem:[%s6084_s9 + $0x18] sm:$0xf0] }
 0x8eb   :  { %2078 = vmatpush.bf16.msrb.mxu3 %v5306_v56  ;;  %2104 = vmatpush.bf16.msrb.mxu1 %v5317_v28  ;;  %v3802_v56 = vld [vmem:[%s6084_s9 + $0x64] sm:$0xf0]  ;;  %v3801_v28 = vld [vmem:[%s6084_s9 + $0x64] sm:$0xf] }
 0x8ed   :  { %2064 = vmatpush.bf16.msra.mxu2 %v5143_v11  ;;  %2090 = vmatpush.bf16.msrb.mxu0 %v5150_v27 }
 0x8ef   :  { %2079 = vmatpush.bf16.msrb.mxu3 %v5327_v25  ;;  %2105 = vmatpush.bf16.msrb.mxu1 %v5330_v10  ;;  %v3464_v25 = vor.u32 %v3802_v56, %v3463_v57  ;;  %v3465_v10 = vld [vmem:[%s6084_s9 + $0x68] sm:$0xf0] }
 0x8f0   :  { %v3468_v35 = vor.u32 %v3801_v28, %v3465_v10 }
 0x8f1   :  { %2065 = vmatpush.bf16.msra.mxu2 %v5175_v5  ;;  %2091 = vmatpush.bf16.msrb.mxu0 %v5177_v63 }
 0x8f5   :  { %2066 = vmatpush.bf16.msra.mxu2 %v5197_v61  ;;  %2092 = vmatpush.bf16.msrb.mxu0 %v5204_v45 }
 0x94f   :  { %v1983_v21 = vpop.f32.mrf.mxu1 }
 0x955   :  { %v1957_v42 = vpop.f32.mrf.mxu3  ;;  %v1970_v22 = vpop.f32.mrf.mxu0 }
 0x956   :  { %v1984_v26 = vadd.f32 %v1983_v21, %v1970_v22  ;;  %v3444_v21 = vor.u32 %v3795_v9, %v3441_v7  ;;  %v3794_v22 = vld [vmem:[%s6084_s9 + $0x24] sm:$0xf0]  ;;  %v3529_v9 = vld [vmem:[%s6084_s9 + $0xe8] sm:$0xf0] }
 0x957   :  { %v1985_v41 = vpop.f32.mrf.mxu1  ;;  %v3532_v7 = vor.u32 %v3817_v15, %v3529_v9 }
 0x958   :  { %v1988_v6 = vadd.f32 %v1984_v26, %v6105_v46  ;;  %v3793_v26 = vld [vmem:[%s6084_s9 + $0x24] sm:$0xf]  ;;  %v3433_v46 = vld [vmem:[%s6084_s9 + $0x28] sm:$0xf0] }
 0x95a   :  { %3911 = vtanh.f32 %v1988_v6  ;;  %v3436_v6 = vor.u32 %v3793_v26, %v3433_v46  ;;  %v3521_v26 = vld [vmem:[%s6084_s9 + $0xd8] sm:$0xf0] }
 0x95b   :  { %v1944_v19 = vpop.f32.mrf.mxu2 }
 0x95c   :  { %v1958_v11 = vadd.f32 %v1957_v42, %v1944_v19  ;;  %v3431_v42 = vld [vmem:[%s6084_s9 + $0x20] sm:$0xf]  ;;  %v3791_v19 = vld [vmem:[%s6084_s9 + $0x14] sm:$0xf] }
 0x95d   :  { %v1959_v18 = vpop.f32.mrf.mxu3  ;;  %v1972_v27 = vpop.f32.mrf.mxu0  ;;  %v3432_v41 = vor.u32 %v3794_v22, %v3431_v42  ;;  %v3816_v42 = vld [vmem:[%s6084_s9 + $0xd4] sm:$0xf0]  ;;  %v3815_v22 = vld [vmem:[%s6084_s9 + $0xd4] sm:$0xf] }
 0x95e   :  { %v1987_v62 = vadd.f32 %v1958_v11, %v1348_v12  ;;  %v3424_v12 = vor.u32 %v3792_v29, %v3423_v30  ;;  %v3428_v18 = vor.u32 %v3791_v19, %v3425_v31  ;;  %v3415_v27 = vld [vmem:[%s6084_s9] sm:$0xf]  ;;  %v3524_v46 = vor.u32 %v3815_v22, %v3521_v26  ;;  %v3814_v19 = vld [vmem:[%s6084_s9 + $0xc4] sm:$0xf0]  ;;  %v3813_v31 = vld [vmem:[%s6084_s9 + $0xc4] sm:$0xf] }
 0x95f   :  { %v3511_v29 = vld [vmem:[%s6084_s9 + $0xc0] sm:$0xf]  ;;  %v6111_v22 = vld [vmem:[#allocation9_spill] sm:$0xff] }
 0x960   :  { %v5666_v5 = vpop.eup %3911  ;;  %3913 = vtanh.f32 %v1987_v62  ;;  %v3790_v62 = vld [vmem:[%s6084_s9 + $0x4] sm:$0xf0]  ;;  %v1324_v26 = vadd.f32 %v6111_v22, %v5404_v51 }
 0x961   :  { %v1996_v63 = vpack.c.bf16 %v5666_v5, %v5666_v5 }
 0x963   :  { %v1946_v61 = vpop.f32.mrf.mxu2  ;;  %2018 = vmatmul.bf16.vlgmr.msra.gmra.mxu3 %v1996_v63  ;;  %2044 = vmatmul.bf16.vlgmr.msra.gmra.mxu1 %v1996_v63  ;;  %v3789_v63 = vld [vmem:[%s6084_s9 + $0x4] sm:$0xf] }
 0x964   :  { %v3417_v61 = vld [vmem:[%s6084_s9 + $0x8] sm:$0xf0] }
 0x965   :  { %v3420_v49 = vor.u32 %v3789_v63, %v3417_v61  ;;  %v3495_v63 = vld [vmem:[%s6084_s9 + $0xa0] sm:$0xf]  ;;  %v3810_v61 = vld [vmem:[%s6084_s9 + $0xa4] sm:$0xf0] }
 0x966   :  { %v5670_v36 = vpop.eup %3913 }
 0x967   :  { %v1995_v45 = vpack.c.bf16 %v5670_v36, %v5670_v36  ;;  %v2137_v30 = vpack.c.bf16 %v5670_v36, %v5628_v4  ;;  %v3503_v36 = vld [vmem:[%s6084_s9 + $0xb0] sm:$0xf] }
 0x969   :  { %2005 = vmatmul.bf16.vlgmr.msrb.gmra.mxu2 %v1995_v45  ;;  %2031 = vmatmul.bf16.vlgmr.msra.gmra.mxu0 %v1995_v45  ;;  %v3416_v45 = vor.u32 %v3790_v62, %v3415_v27  ;;  %v3505_v27 = vld [vmem:[%s6084_s9 + $0xb8] sm:$0xf0] }
 0x96a   :  { %2339 = vmatpush.bf16.msrb.mxu2 %v3472_v52  ;;  %2397 = vmatpush.bf16.msra.mxu0 %v3476_v2  ;;  %v6109_v2 = vld [vmem:[#allocation7_spill] sm:$0xff] }
 0x96b   :  { %v1396_v57 = vadd.f32 %v6109_v2, %v1367_v20  ;;  %v3808_v2 = vld [vmem:[%s6084_s9 + $0x94] sm:$0xf0] }
 0x96e   :  { %2340 = vmatpush.bf16.msrb.mxu2 %v3464_v25  ;;  %2398 = vmatpush.bf16.msra.mxu0 %v3468_v35 }
 0x972   :  { %2341 = vmatpush.bf16.msrb.mxu2 %v3456_v13  ;;  %2399 = vmatpush.bf16.msra.mxu0 %v3460_v47 }
 0x976   :  { %2342 = vmatpush.bf16.msrb.mxu2 %v3448_v43  ;;  %2400 = vmatpush.bf16.msra.mxu0 %v3452_v14  ;;  %v3819_v43 = vld [vmem:[%s6084_s9 + $0xf4] sm:$0xf]  ;;  %v3537_v14 = vld [vmem:[%s6084_s9 + $0xf8] sm:$0xf0] }
 0x977   :  { %v3540_v37 = vor.u32 %v3819_v43, %v3537_v14  ;;  %v5910_v43 = vld [vmem:[%s6086_s10 + $0x30] sm:$0xff]  ;;  %v3822_v14 = vld [vmem:[%s6085_s11 + $0x8] sm:$0xff] }
 0x979   :  { %2426 = vmatpush.bf16.msra.mxu1 %v3540_v37  ;;  %v3821_v37 = vld [vmem:[%s6085_s11] sm:$0xff] }
 0x97a   :  { %2343 = vmatpush.bf16.msrb.mxu2 %v3440_v32  ;;  %2401 = vmatpush.bf16.msra.mxu0 %v3444_v21  ;;  %v3528_v32 = vor.u32 %v3818_v38, %v3527_v34  ;;  %v3519_v21 = vld [vmem:[%s6084_s9 + $0xd0] sm:$0xf]  ;;  %v5924_v38 = vld [vmem:[%s6086_s10 + $0x28] sm:$0xff] }
 0x97d   :  { %2427 = vmatpush.bf16.msra.mxu1 %v3532_v7 }
 0x97e   :  { %2344 = vmatpush.bf16.msrb.mxu2 %v3432_v41  ;;  %2402 = vmatpush.bf16.msra.mxu0 %v3436_v6  ;;  %v3520_v41 = vor.u32 %v3816_v42, %v3519_v21  ;;  %v2135_v6 = vpack.c.bf16 %v5584_v16, %v5540_v40  ;;  %v3512_v40 = vor.u32 %v3814_v19, %v3511_v29  ;;  %v3513_v16 = vld [vmem:[%s6084_s9 + $0xc8] sm:$0xf0] }
 0x97f   :  { %v3516_v4 = vor.u32 %v3813_v31, %v3513_v16  ;;  %v6110_v21 = vld [vmem:[#allocation5_spill] sm:$0xff]  ;;  %v3832_v16 = vld [vmem:[%s6086_s10 + $0x18] sm:$0xff] }
 0x981   :  { %2428 = vmatpush.bf16.msra.mxu1 %v3524_v46  ;;  %v1353_v46 = vadd.f32 %v5443_v58, %v1324_v26 }
 0x982   :  { %2345 = vmatpush.bf16.msrb.mxu2 %v3424_v12  ;;  %2403 = vmatpush.bf16.msra.mxu0 %v3428_v18  ;;  %v3812_v12 = vld [vmem:[%s6084_s9 + $0xb4] sm:$0xf0] }
 0x983   :  { %v3504_v18 = vor.u32 %v3812_v12, %v3503_v36 }
 0x985   :  { %2429 = vmatpush.bf16.msra.mxu1 %v3516_v4 }
 0x986   :  { %2346 = vmatpush.bf16.msrb.mxu2 %v3416_v45  ;;  %2404 = vmatpush.bf16.msra.mxu0 %v3420_v49  ;;  %v3809_v45 = vld [vmem:[%s6084_s9 + $0xa4] sm:$0xf]  ;;  %v3496_v49 = vor.u32 %v3810_v61, %v3495_v63 }
 0x987   :  { %v3500_v20 = vor.u32 %v3809_v45, %v3497_v33 }
 0x9e0   :  { %v2045_v11 = vpop.f32.mrf.mxu1 }
 0x9e6   :  { %v2019_v52 = vpop.f32.mrf.mxu3  ;;  %v2032_v17 = vpop.f32.mrf.mxu0 }
 0x9e7   :  { %v2046_v56 = vadd.f32 %v2045_v11, %v2032_v17  ;;  %v3811_v11 = vld [vmem:[%s6084_s9 + $0xb4] sm:$0xf]  ;;  %v3487_v17 = vld [vmem:[%s6084_s9 + $0x90] sm:$0xf] }
 0x9e8   :  { %v2047_v28 = vpop.f32.mrf.mxu1  ;;  %v3508_v62 = vor.u32 %v3811_v11, %v3505_v27 }
 0x9e9   :  { %v2050_v25 = vadd.f32 %v2046_v56, %v1396_v57  ;;  %v3807_v57 = vld [vmem:[%s6084_s9 + $0x94] sm:$0xf]  ;;  %v3488_v56 = vor.u32 %v3808_v2, %v3487_v17  ;;  %v3489_v28 = vld [vmem:[%s6084_s9 + $0x98] sm:$0xf0] }
 0x9ea   :  { %2430 = vmatpush.bf16.msra.mxu1 %v3508_v62  ;;  %v3829_v62 = vld [vmem:[%s6086_s10] sm:$0xff] }
 0x9eb   :  { %3915 = vtanh.f32 %v2050_v25  ;;  %v3492_v25 = vor.u32 %v3807_v57, %v3489_v28 }
 0x9ec   :  { %v2006_v10 = vpop.f32.mrf.mxu2 }
 0x9ed   :  { %v2020_v35 = vadd.f32 %v2019_v52, %v2006_v10  ;;  %v3828_v52 = vld [vmem:[%s6085_s11 + $0x38] sm:$0xff]  ;;  %v3827_v10 = vld [vmem:[%s6085_s11 + $0x30] sm:$0xff] }
 0x9ee   :  { %v2021_v39 = vpop.f32.mrf.mxu3  ;;  %v2034_v54 = vpop.f32.mrf.mxu0  ;;  %2431 = vmatpush.bf16.msra.mxu1 %v3500_v20 }
 0x9ef   :  { %v2049_v23 = vadd.f32 %v2020_v35, %v5441_v24  ;;  %v3535_v24 = vld [vmem:[%s6084_s9 + $0xf0] sm:$0xf]  ;;  %v3479_v35 = vld [vmem:[%s6084_s9 + $0x80] sm:$0xf]  ;;  %v3806_v39 = vld [vmem:[%s6084_s9 + $0x84] sm:$0xf0] }
 0x9f0   :  { %v3536_v0 = vor.u32 %v3820_v8, %v3535_v24  ;;  %v3805_v54 = vld [vmem:[%s6084_s9 + $0x84] sm:$0xf]  ;;  %v5899_v24 = vld [vmem:[%s6086_s10 + $0x38] sm:$0xff] }
 0x9f1   :  { %v5774_v13 = vpop.eup %3915  ;;  %3917 = vtanh.f32 %v2049_v23  ;;  %v3480_v23 = vor.u32 %v3806_v39, %v3479_v35  ;;  %v3824_v8 = vld [vmem:[%s6085_s11 + $0x18] sm:$0xff] }
 0x9f2   :  { %v2058_v59 = vpack.c.bf16 %v5774_v13, %v5774_v13  ;;  %2368 = vmatpush.bf16.msra.mxu3 %v3536_v0  ;;  %2432 = vmatpush.bf16.msra.mxu1 %v3492_v25  ;;  %v3823_v0 = vld [vmem:[%s6085_s11 + $0x10] sm:$0xff] }
 0x9f4   :  { %v2008_v1 = vpop.f32.mrf.mxu2  ;;  %2080 = vmatmul.bf16.vlgmr.msrb.gmra.mxu3 %v2058_v59  ;;  %2106 = vmatmul.bf16.vlgmr.msrb.gmra.mxu1 %v2058_v59  ;;  %v3481_v59 = vld [vmem:[%s6084_s9 + $0x88] sm:$0xf0] }
 0x9f5   :  { %v3484_v1 = vor.u32 %v3805_v54, %v3481_v59 }
 0x9f6   :  { %2369 = vmatpush.bf16.msra.mxu3 %v3528_v32 }
 0x9f7   :  { %v5778_v47 = vpop.eup %3917  ;;  %2433 = vmatpush.bf16.msra.mxu1 %v3484_v1 }
 0x9f8   :  { %v2057_v3 = vpack.c.bf16 %v5778_v47, %v5778_v47 }
 0x9fa   :  { %2067 = vmatmul.bf16.vlgmr.msra.gmra.mxu2 %v2057_v3  ;;  %2093 = vmatmul.bf16.vlgmr.msrb.gmra.mxu0 %v2057_v3  ;;  %v3826_v3 = vld [vmem:[%s6085_s11 + $0x28] sm:$0xff] }
 0x9fb   :  { %2370 = vmatpush.bf16.msra.mxu3 %v3520_v41  ;;  %2537 = vmatpush.bf16.msra.mxu2 %v3828_v52 }
 0x9fc   :  { %2635 = vmatpush.bf16.msrb.mxu0 %v5899_v24  ;;  %2652 = vmatpush.bf16.msrb.mxu1 %v5899_v24 }
 0x9ff   :  { %2371 = vmatpush.bf16.msra.mxu3 %v3512_v40  ;;  %2538 = vmatpush.bf16.msra.mxu2 %v3827_v10 }
 0xa00   :  { %2636 = vmatpush.bf16.msrb.mxu0 %v5910_v43  ;;  %2653 = vmatpush.bf16.msrb.mxu1 %v5910_v43 }
 0xa03   :  { %2372 = vmatpush.bf16.msra.mxu3 %v3504_v18  ;;  %2539 = vmatpush.bf16.msra.mxu2 %v3826_v3  ;;  %v2136_v18 = vpack.c.bf16 %v5622_v48, %v5666_v5  ;;  %v2138_v5 = vpack.c.bf16 %v5534_v44, %v5578_v55  ;;  %v2140_v55 = vpack.c.bf16 %v5446_v53, %v5490_v60 }
 0xa04   :  { %2637 = vmatpush.bf16.msrb.mxu0 %v5924_v38  ;;  %2654 = vmatpush.bf16.msrb.mxu1 %v5924_v38 }
 0xa07   :  { %2373 = vmatpush.bf16.msra.mxu3 %v3496_v49 }
 0xa0a   :  { %2347 = vmatmul.bf16.vlgmr.msrb.gmra.mxu2 %v2133_v50  ;;  %2405 = vmatmul.bf16.vlgmr.msra.gmra.mxu0 %v2133_v50  ;;  %v3825_v50 = vld [vmem:[%s6085_s11 + $0x20] sm:$0xff] }
 0xa0b   :  { %2374 = vmatpush.bf16.msra.mxu3 %v3488_v56  ;;  %2540 = vmatpush.bf16.msra.mxu2 %v3825_v50  ;;  %v5994_v56 = vld [vmem:[%s6087_s12] sm:$0x3] }
 0xa0c   :  { %v5997_v25 = vperm.slane %v5994_v56, 0 }
 0xa0f   :  { %2375 = vmatpush.bf16.msra.mxu3 %v3480_v23  ;;  %2541 = vmatpush.bf16.msra.mxu2 %v3824_v8 }
 0xa13   :  { %2618 = vmatpush.bf16.msrb.mxu3 %v5899_v24  ;;  %2542 = vmatpush.bf16.msra.mxu2 %v3823_v0 }
 0xa17   :  { %2619 = vmatpush.bf16.msrb.mxu3 %v5910_v43  ;;  %2543 = vmatpush.bf16.msra.mxu2 %v3822_v14 }
 0xa1a   :  { %2352 = vmatmul.bf16.gmra.mxu2 %v2135_v6  ;;  %2410 = vmatmul.bf16.gmra.mxu0 %v2135_v6 }
 0xa1b   :  { %2620 = vmatpush.bf16.msrb.mxu3 %v5924_v38  ;;  %2544 = vmatpush.bf16.msra.mxu2 %v3821_v37 }
 0xa1f   :  { %2669 = vmatpush.bf16.msrb.mxu2 %v5899_v24 }
 0xa23   :  { %2670 = vmatpush.bf16.msrb.mxu2 %v5910_v43 }
 0xa27   :  { %2671 = vmatpush.bf16.msrb.mxu2 %v5924_v38 }
 0xa2a   :  { %2357 = vmatmul.bf16.gmra.mxu2 %v2137_v30  ;;  %2415 = vmatmul.bf16.gmra.mxu0 %v2137_v30  ;;  %v5940_v30 = vld [vmem:[%s6086_s10 + $0x20] sm:$0xff] }
 0xa2b   :  { %2621 = vmatpush.bf16.msrb.mxu3 %v5940_v30  ;;  %2638 = vmatpush.bf16.msrb.mxu0 %v5940_v30 }
 0xa2c   :  { %2655 = vmatpush.bf16.msrb.mxu1 %v5940_v30  ;;  %2672 = vmatpush.bf16.msrb.mxu2 %v5940_v30 }
 0xa2f   :  { %2622 = vmatpush.bf16.msrb.mxu3 %v3832_v16  ;;  %2639 = vmatpush.bf16.msrb.mxu0 %v3832_v16 }
 0xa30   :  { %2656 = vmatpush.bf16.msrb.mxu1 %v3832_v16  ;;  %2673 = vmatpush.bf16.msrb.mxu2 %v3832_v16 }
 0xa71   :  { %v2107_v34 = vpop.f32.mrf.mxu1 }
 0xa77   :  { %v2081_v15 = vpop.f32.mrf.mxu3  ;;  %v2094_v9 = vpop.f32.mrf.mxu0 }
 0xa78   :  { %v2108_v32 = vadd.f32 %v2107_v34, %v2094_v9 }
 0xa79   :  { %v2109_v7 = vpop.f32.mrf.mxu1 }
 0xa7a   :  { %v2112_v42 = vadd.f32 %v2108_v32, %v6110_v21 }
 0xa7c   :  { %3919 = vtanh.f32 %v2112_v42 }
 0xa7d   :  { %v2068_v41 = vpop.f32.mrf.mxu2 }
 0xa7e   :  { %v2082_v6 = vadd.f32 %v2081_v15, %v2068_v41 }
 0xa7f   :  { %v2083_v29 = vpop.f32.mrf.mxu3  ;;  %v2096_v19 = vpop.f32.mrf.mxu0 }
 0xa80   :  { %v2111_v31 = vadd.f32 %v2082_v6, %v1353_v46 }
 0xa82   :  { %v3920_v51 = vpop.eup %3919  ;;  %3921 = vtanh.f32 %v2111_v31 }
 0xa83   :  { %v2134_v58 = vpack.c.bf16 %v5774_v13, %v3920_v51  ;;  %v3831_v13 = vld [vmem:[%s6086_s10 + $0x10] sm:$0xff]  ;;  %v2472_v63 = vpack.c.bf16 %v3920_v51, %v3920_v51 }
 0xa84   :  { %2623 = vmatpush.bf16.msrb.mxu3 %v3831_v13  ;;  %2640 = vmatpush.bf16.msrb.mxu0 %v3831_v13 }
 0xa85   :  { %v2070_v40 = vpop.f32.mrf.mxu2  ;;  %2376 = vmatmul.bf16.vlgmr.msra.gmra.mxu3 %v2134_v58  ;;  %2434 = vmatmul.bf16.vlgmr.msra.gmra.mxu1 %v2134_v58 }
 0xa86   :  { %2657 = vmatpush.bf16.msrb.mxu1 %v3831_v13  ;;  %2674 = vmatpush.bf16.msrb.mxu2 %v3831_v13 }
 0xa87   :  { %v2406_v4 = vpop.f32.mrf.mxu0 }
 0xa88   :  { %v5952_v36 = vpop.eup %3921 }
 0xa89   :  { %v2139_v12 = vpack.c.bf16 %v5952_v36, %v5778_v47  ;;  %v3830_v47 = vld [vmem:[%s6086_s10 + $0x8] sm:$0xff]  ;;  %v2569_v45 = vpack.c.bf16 %v5952_v36, %v5952_v36 }
 0xa8a   :  { %2624 = vmatpush.bf16.msrb.mxu3 %v3830_v47  ;;  %2641 = vmatpush.bf16.msrb.mxu0 %v3830_v47 }
 0xa8b   :  { %2362 = vmatmul.bf16.gmra.mxu2 %v2139_v12  ;;  %2420 = vmatmul.bf16.gmra.mxu0 %v2139_v12 }
 0xa8c   :  { %2658 = vmatpush.bf16.msrb.mxu1 %v3830_v47  ;;  %2675 = vmatpush.bf16.msrb.mxu2 %v3830_v47 }
 0xa8d   :  { %v2348_v49 = vpop.f32.mrf.mxu2 }
 0xa8e   :  { %2625 = vmatpush.bf16.msrb.mxu3 %v3829_v62  ;;  %2642 = vmatpush.bf16.msrb.mxu0 %v3829_v62 }
 0xa8f   :  { %v2408_v11 = vpop.f32.mrf.mxu0 }
 0xa90   :  { %2659 = vmatpush.bf16.msrb.mxu1 %v3829_v62  ;;  %2676 = vmatpush.bf16.msrb.mxu2 %v3829_v62 }
 0xa92   :  { %2686 = vmatpush.bf16.msra.mxu3 %v5899_v24  ;;  %2703 = vmatpush.bf16.msra.mxu0 %v5899_v24 }
 0xa94   :  { %2720 = vmatpush.bf16.msra.mxu1 %v5899_v24 }
 0xa95   :  { %2381 = vmatmul.bf16.gmra.mxu3 %v2136_v18  ;;  %2439 = vmatmul.bf16.gmra.mxu1 %v2136_v18  ;;  %v2350_v33 = vpop.f32.mrf.mxu2 }
 0xa96   :  { %2687 = vmatpush.bf16.msra.mxu3 %v5910_v43  ;;  %2704 = vmatpush.bf16.msra.mxu0 %v5910_v43  ;;  %v2351_v35 = vadd.f32 %v2350_v33, %v5997_v25  ;;  %v3851_v33 = vld [vmem:[%s6088_s13 + $0x70] sm:$0xff] }
 0xa97   :  { %v2411_v27 = vpop.f32.mrf.mxu0 }
 0xa98   :  { %2721 = vmatpush.bf16.msra.mxu1 %v5910_v43 }
 0xa9a   :  { %2688 = vmatpush.bf16.msra.mxu3 %v5924_v38  ;;  %2705 = vmatpush.bf16.msra.mxu0 %v5924_v38 }
 0xa9b   :  { %2545 = vmatmul.bf16.vlgmr.msra.gmra.mxu2 %v2472_v63 }
 0xa9c   :  { %2737 = vmatpush.bf16.msra.mxu2 %v5899_v24  ;;  %2722 = vmatpush.bf16.msra.mxu1 %v5924_v38 }
 0xa9d   :  { %v2353_v20 = vpop.f32.mrf.mxu2 }
 0xa9e   :  { %2689 = vmatpush.bf16.msra.mxu3 %v5940_v30  ;;  %2706 = vmatpush.bf16.msra.mxu0 %v5940_v30  ;;  %v2354_v1 = vadd.f32 %v2353_v20, %v5997_v25  ;;  %v3850_v20 = vld [vmem:[%s6088_s13 + $0x68] sm:$0xff] }
 0xa9f   :  { %v2413_v48 = vpop.f32.mrf.mxu0 }
 0xaa0   :  { %2738 = vmatpush.bf16.msra.mxu2 %v5910_v43  ;;  %2723 = vmatpush.bf16.msra.mxu1 %v5940_v30 }
 0xaa2   :  { %2690 = vmatpush.bf16.msra.mxu3 %v3832_v16  ;;  %2707 = vmatpush.bf16.msra.mxu0 %v3832_v16 }
 0xaa4   :  { %2739 = vmatpush.bf16.msra.mxu2 %v5924_v38  ;;  %2724 = vmatpush.bf16.msra.mxu1 %v3832_v16 }
 0xaa5   :  { %2386 = vmatmul.bf16.gmra.mxu3 %v2138_v5  ;;  %2444 = vmatmul.bf16.gmra.mxu1 %v2138_v5  ;;  %v2355_v53 = vpop.f32.mrf.mxu2  ;;  %v3852_v5 = vld [vmem:[%s6088_s13 + $0x78] sm:$0xff] }
 0xaa6   :  { %2691 = vmatpush.bf16.msra.mxu3 %v3831_v13  ;;  %2708 = vmatpush.bf16.msra.mxu0 %v3831_v13  ;;  %v2356_v43 = vadd.f32 %v2355_v53, %v5997_v25  ;;  %v3849_v53 = vld [vmem:[%s6088_s13 + $0x60] sm:$0xff] }
 0xaa7   :  { %v2416_v61 = vpop.f32.mrf.mxu0 }
 0xaa8   :  { %2740 = vmatpush.bf16.msra.mxu2 %v5940_v30  ;;  %2725 = vmatpush.bf16.msra.mxu1 %v3831_v13  ;;  %v2349_v30 = vadd.f32 %v2348_v49, %v5997_v25 }
 0xaaa   :  { %2692 = vmatpush.bf16.msra.mxu3 %v3830_v47  ;;  %2709 = vmatpush.bf16.msra.mxu0 %v3830_v47 }
 0xaac   :  { %2741 = vmatpush.bf16.msra.mxu2 %v3832_v16  ;;  %2726 = vmatpush.bf16.msra.mxu1 %v3830_v47 }
 0xaad   :  { %v2358_v60 = vpop.f32.mrf.mxu2 }
 0xaae   :  { %2693 = vmatpush.bf16.msra.mxu3 %v3829_v62  ;;  %2710 = vmatpush.bf16.msra.mxu0 %v3829_v62  ;;  %v2359_v37 = vadd.f32 %v2358_v60, %v5997_v25  ;;  %v3848_v60 = vld [vmem:[%s6088_s13 + $0x58] sm:$0xff] }
 0xaaf   :  { %v2418_v44 = vpop.f32.mrf.mxu0 }
 0xab0   :  { %2742 = vmatpush.bf16.msra.mxu2 %v3831_v13  ;;  %2727 = vmatpush.bf16.msra.mxu1 %v3829_v62 }
 0xab4   :  { %2743 = vmatpush.bf16.msra.mxu2 %v3830_v47 }
 0xab5   :  { %2391 = vmatmul.bf16.gmra.mxu3 %v2140_v55  ;;  %2449 = vmatmul.bf16.gmra.mxu1 %v2140_v55  ;;  %v5989_v17 = vpop.f32.mrf.mxu2 }
 0xab8   :  { %2744 = vmatpush.bf16.msra.mxu2 %v3829_v62 }
 0xac5   :  { %2626 = vmatmul.bf16.vlgmr.msrb.gmra.mxu3 %v2569_v45 }
 0xb02   :  { %v2435_v52 = vpop.f32.mrf.mxu1 }
 0xb03   :  { %v3847_v52 = vld [vmem:[%s6088_s13 + $0x50] sm:$0xff] }
 0xb08   :  { %v2377_v2 = vpop.f32.mrf.mxu3  ;;  %v2421_v57 = vpop.f32.mrf.mxu0 }
 0xb09   :  { %v2378_v29 = vadd.f32 %v2377_v2, %v2349_v30  ;;  %v3846_v2 = vld [vmem:[%s6088_s13 + $0x48] sm:$0xff]  ;;  %v3845_v57 = vld [vmem:[%s6088_s13 + $0x40] sm:$0xff]  ;;  %v3839_v30 = vld [vmem:[%s6088_s13 + $0x10] sm:$0xff] }
 0xb0a   :  { %v2437_v28 = vpop.f32.mrf.mxu1 }
 0xb0e   :  { %v2363_v10 = vpop.f32.mrf.mxu2 }
 0xb0f   :  { %v2364_v42 = vadd.f32 %v2363_v10, %v5997_v25 }
 0xb10   :  { %v2379_v39 = vpop.f32.mrf.mxu3  ;;  %v2423_v16 = vpop.f32.mrf.mxu0 }
 0xb11   :  { %v2380_v54 = vadd.f32 %v2379_v39, %v2351_v35  ;;  %v2176_v35 = vperm.slane %v5994_v56, 1 }
 0xb12   :  { %v2440_v23 = vpop.f32.mrf.mxu1 }
 0xb13   :  { %v2424_v39 = vadd.f32 %v2423_v16, %v2176_v35  ;;  %v3858_v16 = vld [vmem:[%s6089_s14] ss:$0 sm:$0xff] }
 0xb16   :  { %v2365_v59 = vpop.f32.mrf.mxu2 }
 0xb17   :  { %v2366_v41 = vadd.f32 %v2365_v59, %v5997_v25 }
 0xb18   :  { %v2382_v3 = vpop.f32.mrf.mxu3 }
 0xb19   :  { %v2383_v50 = vadd.f32 %v2382_v3, %v2354_v1 }
 0xb1a   :  { %v2442_v24 = vpop.f32.mrf.mxu1 }
 0xb1e   :  { %v6001_v8 = vpop.f32.mrf.mxu2 }
 0xb20   :  { %v2384_v0 = vpop.f32.mrf.mxu3 }
 0xb21   :  { %v2385_v14 = vadd.f32 %v2384_v0, %v2356_v43  ;;  %v2361_v43 = vadd.f32 %v5989_v17, %v5997_v25  ;;  %v3843_v17 = vld [vmem:[%s6088_s13 + $0x30] sm:$0xff]  ;;  %v3842_v25 = vld [vmem:[%s6088_s13 + $0x28] sm:$0xff] }
 0xb22   :  { %v2445_v34 = vpop.f32.mrf.mxu1 }
 0xb26   :  { %v2548_v38 = vpop.f32.mrf.mxu2 }
 0xb28   :  { %v2387_v15 = vpop.f32.mrf.mxu3 }
 0xb29   :  { %v2388_v9 = vadd.f32 %v2387_v15, %v2359_v37 }
 0xb2a   :  { %v2447_v32 = vpop.f32.mrf.mxu1 }
 0xb2b   :  { %v3841_v32 = vld [vmem:[%s6088_s13 + $0x20] sm:$0xff] }
 0xb30   :  { %v6005_v7 = vpop.f32.mrf.mxu3 }
 0xb31   :  { %v2390_v0 = vadd.f32 %v6005_v7, %v2361_v43  ;;  %v3840_v7 = vld [vmem:[%s6088_s13 + $0x18] sm:$0xff] }
 0xb32   :  { %v2450_v21 = vpop.f32.mrf.mxu1 }
 0xb38   :  { %v2392_v22 = vpop.f32.mrf.mxu3 }
 0xb39   :  { %v6008_v26 = vadd.f32 %v2392_v22, %v2364_v42 }
 0xb3a   :  { %v2452_v18 = vpop.f32.mrf.mxu1 }
 0xb3b   :  { %v2453_v59 = vadd.f32 %v2452_v18, %v2424_v39 }
 0xb3d   :  { %v2550_v3 = vadd.f32 %v6001_v8, %v2453_v59  ;;  %v3844_v8 = vld [vmem:[%s6088_s13 + $0x38] sm:$0xff] }
 0xb3e   :  { %2886 = vmatpush.bf16.msrb.mxu3 %v3844_v8 }
 0xb40   :  { %v2394_v46 = vpop.f32.mrf.mxu3 }
 0xb41   :  { %v6011_v6 = vadd.f32 %v2394_v46, %v2366_v41 }
 0xb42   :  { %2887 = vmatpush.bf16.msrb.mxu3 %v3843_v17 }
 0xb46   :  { %2888 = vmatpush.bf16.msrb.mxu3 %v3842_v25 }
 0xb48   :  { %v2627_v19 = vpop.f32.mrf.mxu3 }
 0xb49   :  { %v2631_v31 = vadd.f32 %v2627_v19, %v2378_v29  ;;  %v3838_v29 = vld [vmem:[%s6088_s13 + $0x8] sm:$0xff]  ;;  %v3837_v19 = vld [vmem:[%s6088_s13] sm:$0xff] }
 0xb4a   :  { %2889 = vmatpush.bf16.msrb.mxu3 %v3841_v32 }
 0xb4b   :  { %3923 = vtanh.f32 %v2631_v31 }
 0xb4e   :  { %2890 = vmatpush.bf16.msrb.mxu3 %v3840_v7 }
 0xb50   :  { %v2629_v51 = vpop.f32.mrf.mxu3 }
 0xb51   :  { %v3924_v58 = vpop.eup %3923 }
 0xb52   :  { %v2634_v40 = vpack.c.bf16 %v3924_v58, %v3924_v58  ;;  %2891 = vmatpush.bf16.msrb.mxu3 %v3839_v30 }
 0xb54   :  { %2643 = vmatmul.bf16.vlgmr.msrb.gmra.mxu0 %v2634_v40 }
 0xb55   :  { %2899 = vmatpush.bf16.msrb.mxu0 %v3852_v5 }
 0xb56   :  { %2892 = vmatpush.bf16.msrb.mxu3 %v3838_v29 }
 0xb59   :  { %2900 = vmatpush.bf16.msrb.mxu0 %v3851_v33 }
 0xb5a   :  { %2893 = vmatpush.bf16.msrb.mxu3 %v3837_v19 }
 0xb5d   :  { %2901 = vmatpush.bf16.msrb.mxu0 %v3850_v20 }
 0xb61   :  { %2902 = vmatpush.bf16.msrb.mxu0 %v3849_v53 }
 0xb65   :  { %2903 = vmatpush.bf16.msrb.mxu0 %v3848_v60 }
 0xb69   :  { %2904 = vmatpush.bf16.msrb.mxu0 %v3847_v52 }
 0xb6d   :  { %2905 = vmatpush.bf16.msrb.mxu0 %v3846_v2 }
 0xb71   :  { %2906 = vmatpush.bf16.msrb.mxu0 %v3845_v57 }
 0xbd1   :  { %v2644_v4 = vpop.f32.mrf.mxu0 }
 0xbd2   :  { %v2648_v36 = vadd.f32 %v2644_v4, %v2380_v54 }
 0xbd4   :  { %3925 = vtanh.f32 %v2648_v36 }
 0xbd9   :  { %v2646_v12 = vpop.f32.mrf.mxu0 }
 0xbda   :  { %v3926_v13 = vpop.eup %3925 }
 0xbdb   :  { %v2651_v11 = vpack.c.bf16 %v3926_v13, %v3926_v13 }
 0xbdd   :  { %2660 = vmatmul.bf16.vlgmr.msrb.gmra.mxu1 %v2651_v11 }
 0xc5a   :  { %v2661_v47 = vpop.f32.mrf.mxu1 }
 0xc5b   :  { %v2665_v27 = vadd.f32 %v2661_v47, %v2383_v50 }
 0xc5d   :  { %3927 = vtanh.f32 %v2665_v27 }
 0xc62   :  { %v2663_v62 = vpop.f32.mrf.mxu1 }
 0xc63   :  { %v3928_v63 = vpop.eup %3927 }
 0xc64   :  { %v2668_v48 = vpack.c.bf16 %v3928_v63, %v3928_v63 }
 0xc66   :  { %2677 = vmatmul.bf16.vlgmr.msrb.gmra.mxu2 %v2668_v48 }
 0xce9   :  { %v2678_v61 = vpop.f32.mrf.mxu2 }
 0xcea   :  { %v2682_v44 = vadd.f32 %v2678_v61, %v2385_v14 }
 0xcec   :  { %3929 = vtanh.f32 %v2682_v44 }
 0xcf1   :  { %v2680_v55 = vpop.f32.mrf.mxu2 }
 0xcf2   :  { %v3930_v45 = vpop.eup %3929 }
 0xcf3   :  { %v2685_v49 = vpack.c.bf16 %v3930_v45, %v3930_v45 }
 0xcf5   :  { %2694 = vmatmul.bf16.vlgmr.msra.gmra.mxu3 %v2685_v49 }
 0xd78   :  { %v2695_v28 = vpop.f32.mrf.mxu3 }
 0xd79   :  { %v2699_v10 = vadd.f32 %v2695_v28, %v2388_v9 }
 0xd7b   :  { %3931 = vtanh.f32 %v2699_v10 }
 0xd7c   :  { %3933 = vtanh.f32 %v2550_v3 }
 0xd80   :  { %v2697_v54 = vpop.f32.mrf.mxu3 }
 0xd81   :  { %v3932_v23 = vpop.eup %3931 }
 0xd82   :  { %v2702_v1 = vpack.c.bf16 %v3932_v23, %v3932_v23  ;;  %v3934_v50 = vpop.eup %3933 }
 0xd83   :  { %v2753_v24 = vpack.c.bf16 %v3934_v50, %v3934_v50 }
 0xd84   :  { %2711 = vmatmul.bf16.vlgmr.msra.gmra.mxu0 %v2702_v1 }
 0xd94   :  { %2907 = vmatmul.bf16.vlgmr.msrb.gmra.mxu0 %v2753_v24 }
 0xe01   :  { %v2712_v14 = vpop.f32.mrf.mxu0 }
 0xe02   :  { %v2716_v56 = vadd.f32 %v2712_v14, %v2390_v0 }
 0xe04   :  { %3935 = vtanh.f32 %v2716_v56 }
 0xe09   :  { %v2714_v34 = vpop.f32.mrf.mxu0 }
 0xe0a   :  { %v3936_v38 = vpop.eup %3935 }
 0xe0b   :  { %v2719_v37 = vpack.c.bf16 %v3936_v38, %v3936_v38 }
 0xe0d   :  { %2728 = vmatmul.bf16.vlgmr.msra.gmra.mxu1 %v2719_v37 }
 0xe11   :  { %v2908_v15 = vpop.f32.mrf.mxu0 }
 0xe19   :  { %v2910_v9 = vpop.f32.mrf.mxu0 }
 0xe8a   :  { %v2729_v21 = vpop.f32.mrf.mxu1 }
 0xe8b   :  { %v2733_v42 = vadd.f32 %v2729_v21, %v6008_v26 }
 0xe8d   :  { %3937 = vtanh.f32 %v2733_v42 }
 0xe92   :  { %v2731_v22 = vpop.f32.mrf.mxu1 }
 0xe93   :  { %v3938_v41 = vpop.eup %3937 }
 0xe94   :  { %v2736_v46 = vpack.c.bf16 %v3938_v41, %v3938_v41 }
 0xe96   :  { %2745 = vmatmul.bf16.vlgmr.msra.gmra.mxu2 %v2736_v46 }
 0xf19   :  { %v2746_v26 = vpop.f32.mrf.mxu2 }
 0xf1a   :  { %v2750_v31 = vadd.f32 %v2746_v26, %v6011_v6 }
 0xf1c   :  { %3939 = vtanh.f32 %v2750_v31 }
 0xf21   :  { %v2748_v51 = vpop.f32.mrf.mxu2 }
 0xf22   :  { %v3940_v58 = vpop.eup %3939 }
 0xf23   :  { %v2752_v40 = vpack.c.bf16 %v3940_v58, %v3940_v58 }
 0xf25   :  { %2894 = vmatmul.bf16.vlgmr.msrb.gmra.mxu3 %v2752_v40 }
 0xfa8   :  { %v2895_v4 = vpop.f32.mrf.mxu3 }
 0xfa9   :  { %v2896_v36 = vadd.f32 %v3858_v16, %v2895_v4 }
 0xfab   :  { %v2909_v12 = vadd.f32 %v2908_v15, %v2896_v36 }
 0xfad   :  { %2912 = vst [vmem:[%s6090_s15] sm:$0xff] %v2909_v12 }
 0xfb0   :  { %v2897_v13 = vpop.f32.mrf.mxu3 }

</bundles_post_ra>
